<compile_context>
chip_gen: v6e
topology: v6e:2x2x1
jax: 0.10.0
libtpu: 0.0.40
codegen_flags: <defaults>
</compile_context>

<pallas_src>
import functools

import jax
import jax.numpy as jnp
from jax.experimental import pallas as pl
from jax.experimental.pallas import tpu as pltpu


# ----------------------------------------------------------------------------
# helpers
# ----------------------------------------------------------------------------

def _round_up(x, m):
    return ((x + m - 1) // m) * m


def _pick_tk(K):
    """Largest 128-aligned tile dividing K (reduction dim must tile exactly)."""
    for c in (512, 256, 128):
        if K % c == 0:
            return c
    return K


def _gelu_tanh(x):
    # tanh-approximation GELU: tanh goes to the EUP slot instead of ~12 VALU ops.
    c = 0.7978845608028654  # sqrt(2/pi)
    return 0.5 * x * (1.0 + jnp.tanh(c * (x + 0.044715 * x * x * x)))


def _cparams(dims, block_bytes):
    """Compiler params with a VMEM limit derived from the per-step footprint."""
    limit = int(min(max(4 * block_bytes + (8 << 20), 32 << 20), 48 << 20))
    return pltpu.CompilerParams(dimension_semantics=dims,
                                vmem_limit_bytes=limit)


# ----------------------------------------------------------------------------
# generic fused matmul kernel:  out = [LN(x)] @ w [+ bias] [+ residual]
# ----------------------------------------------------------------------------

def _matmul_kernel(*refs, do_ln, do_bias, do_res):
    it = iter(refs)
    x_ref = next(it)
    g_ref = next(it) if do_ln else None
    b_ref = next(it) if do_ln else None
    w_ref = next(it)
    bias_ref = next(it) if do_bias else None
    res_ref = next(it) if do_res else None
    o_ref = next(it)
    acc_ref = next(it)
    ln_ref = next(it) if do_ln else None

    @pl.when(pl.program_id(2) == 0)
    def _init():
        acc_ref[...] = jnp.zeros_like(acc_ref)

    if do_ln:
        # LayerNorm prologue: computed once per row block (first N tile) and
        # cached in VMEM in the input dtype so the MXU sees native operands.
        @pl.when(pl.program_id(1) == 0)
        def _ln():
            x = x_ref[...].astype(jnp.float32)
            mu = jnp.mean(x, axis=-1, keepdims=True)
            var = jnp.mean(jnp.square(x - mu), axis=-1, keepdims=True)
            y = (x - mu) * jax.lax.rsqrt(var + 1e-5)
            y = y * g_ref[...].astype(jnp.float32) + b_ref[...].astype(jnp.float32)
            ln_ref[...] = y.astype(ln_ref.dtype)

        x_in = ln_ref[...]
    else:
        x_in = x_ref[...]

    acc_ref[...] += jnp.dot(x_in, w_ref[...],
                            preferred_element_type=jnp.float32)

    @pl.when(pl.program_id(2) == pl.num_programs(2) - 1)
    def _finalize():
        out = acc_ref[...]
        if do_bias:
            out = out + bias_ref[...].astype(jnp.float32)
        if do_res:
            out = out + res_ref[...].astype(jnp.float32)
        o_ref[...] = out.astype(o_ref.dtype)


def pallas_matmul(x, w, bias=None, residual=None, gamma=None, beta=None,
                  out_dtype=None):
    """x: (M, K), w: (K, N) -> (M, N) = [LN(x)] @ w [+ bias] [+ residual]."""
    M, K = x.shape
    N = w.shape[1]
    do_ln = gamma is not None
    do_bias = bias is not None
    do_res = residual is not None
    out_dtype = out_dtype or x.dtype

    tm = min(256, _round_up(M, 32))
    tn = min(512, _round_up(N, 128))
    tk = K if do_ln else _pick_tk(K)   # LN prologue needs the whole row
    gm, gn, gk = pl.cdiv(M, tm), pl.cdiv(N, tn), K // tk

    kernel = functools.partial(_matmul_kernel, do_ln=do_ln, do_bias=do_bias,
                               do_res=do_res)

    in_specs = [pl.BlockSpec((tm, tk), lambda i, j, k: (i, k))]
    inputs = [x]
    if do_ln:
        in_specs += [pl.BlockSpec((1, tk), lambda i, j, k: (0, k)),
                     pl.BlockSpec((1, tk), lambda i, j, k: (0, k))]
        inputs += [gamma.reshape(1, K), beta.reshape(1, K)]
    in_specs.append(pl.BlockSpec((tk, tn), lambda i, j, k: (k, j)))
    inputs.append(w)
    if do_bias:
        in_specs.append(pl.BlockSpec((1, tn), lambda i, j, k: (0, j)))
        inputs.append(bias.reshape(1, N))
    if do_res:
        in_specs.append(pl.BlockSpec((tm, tn), lambda i, j, k: (i, j)))
        inputs.append(residual)

    isz = x.dtype.itemsize
    scratch = [pltpu.VMEM((tm, tn), jnp.float32)]
    block_bytes = (tm * tk + tk * tn + 2 * tm * tn) * isz + tm * tn * 4
    if do_ln:
        scratch.append(pltpu.VMEM((tm, K), x.dtype))
        block_bytes += tm * K * isz + 2 * tk * isz
    if do_bias:
        block_bytes += tn * isz

    # LN cache is written at j == 0 and reused for j > 0, so the N axis must
    # not be megacore-split in that case.
    dims = (("parallel", "arbitrary", "arbitrary") if do_ln
            else ("parallel", "parallel", "arbitrary"))

    # TODO(synk): input_output_aliases={idx(residual): 0} would save one
    #             activation buffer per residual-fused call.
    return pl.pallas_call(
        kernel,
        out_shape=jax.ShapeDtypeStruct((M, N), out_dtype),
        grid=(gm, gn, gk),
        in_specs=in_specs,
        out_specs=pl.BlockSpec((tm, tn), lambda i, j, k: (i, j)),
        scratch_shapes=scratch,
        compiler_params=_cparams(dims, block_bytes),
    )(*inputs)


# ----------------------------------------------------------------------------
# fused LayerNorm + GEGLU feed-forward first stage
#   out = (LN(x) @ wa + ba) * gelu(LN(x) @ wg + bg)
# ----------------------------------------------------------------------------

def _ln_geglu_kernel(x_ref, g_ref, b_ref, wa_ref, ba_ref, wg_ref, bg_ref,
                     o_ref, ln_ref):
    @pl.when(pl.program_id(1) == 0)
    def _ln():
        x = x_ref[...].astype(jnp.float32)
        mu = jnp.mean(x, axis=-1, keepdims=True)
        var = jnp.mean(jnp.square(x - mu), axis=-1, keepdims=True)
        y = (x - mu) * jax.lax.rsqrt(var + 1e-5)
        y = y * g_ref[...].astype(jnp.float32) + b_ref[...].astype(jnp.float32)
        ln_ref[...] = y.astype(ln_ref.dtype)

    y = ln_ref[...]                                    # native dtype MXU operand
    a = jnp.dot(y, wa_ref[...], preferred_element_type=jnp.float32)
    a = a + ba_ref[...].astype(jnp.float32)
    g = jnp.dot(y, wg_ref[...], preferred_element_type=jnp.float32)
    g = g + bg_ref[...].astype(jnp.float32)
    o_ref[...] = (a * _gelu_tanh(g)).astype(o_ref.dtype)


def pallas_ln_geglu(x, gamma, beta, wa, ba, wg, bg):
    M, K = x.shape
    N = wa.shape[1]
    tm = min(256, _round_up(M, 32))
    tn = min(512, _round_up(N, 128))
    isz = x.dtype.itemsize
    block_bytes = (3 * tm * K + 2 * K * tn + 2 * tn + tm * tn) * isz
    return pl.pallas_call(
        _ln_geglu_kernel,
        out_shape=jax.ShapeDtypeStruct((M, N), x.dtype),
        grid=(pl.cdiv(M, tm), pl.cdiv(N, tn)),
        in_specs=[
            pl.BlockSpec((tm, K), lambda i, j: (i, 0)),
            pl.BlockSpec((1, K), lambda i, j: (0, 0)),
            pl.BlockSpec((1, K), lambda i, j: (0, 0)),
            pl.BlockSpec((K, tn), lambda i, j: (0, j)),
            pl.BlockSpec((1, tn), lambda i, j: (0, j)),
            pl.BlockSpec((K, tn), lambda i, j: (0, j)),
            pl.BlockSpec((1, tn), lambda i, j: (0, j)),
        ],
        out_specs=pl.BlockSpec((tm, tn), lambda i, j: (i, j)),
        scratch_shapes=[pltpu.VMEM((tm, K), x.dtype)],
        compiler_params=_cparams(("parallel", "arbitrary"), block_bytes),
    )(x, gamma.reshape(1, K), beta.reshape(1, K), wa, ba.reshape(1, N),
      wg, bg.reshape(1, N))


# ----------------------------------------------------------------------------
# fused TimeSformer attention kernel (per batch)
#   Reads the raw (N, 3*inner) qkv slab (cls row 0, tokens frame-major) and
#   writes (N, inner) directly in the layout the output projection wants.
# ----------------------------------------------------------------------------

def _attention_kernel(qkv_ref, o_ref, *, f, n, heads, dh, inner, time_mode):
    out_dtype = o_ref.dtype
    for h in range(heads):
        qc = h * dh
        kc = inner + h * dh
        vc = 2 * inner + h * dh

        # cls-token q/k/v for this head (q already carries the 1/sqrt(dh) scale)
        cq = qkv_ref[0:1, qc:qc + dh].astype(jnp.float32)        # (1, dh)
        ck = qkv_ref[0:1, kc:kc + dh].astype(jnp.float32)
        cv = qkv_ref[0:1, vc:vc + dh].astype(jnp.float32)

        q_all = qkv_ref[1:, qc:qc + dh]                          # (f*n, dh) native
        k_all = qkv_ref[1:, kc:kc + dh]
        v_all = qkv_ref[1:, vc:vc + dh]
        k_all32 = k_all.astype(jnp.float32)
        v_all32 = v_all.astype(jnp.float32)

        # ---- cls query attends to [cls] + all f*n tokens ---------------------
        s2 = jnp.sum(k_all32 * cq, axis=-1, keepdims=True)       # (f*n, 1)
        s2c = jnp.sum(cq * ck, axis=-1, keepdims=True)           # (1, 1)
        m2 = jnp.maximum(jnp.max(s2, axis=0, keepdims=True), s2c)
        p2 = jnp.exp(s2 - m2)
        p2c = jnp.exp(s2c - m2)
        den2 = jnp.sum(p2, axis=0, keepdims=True) + p2c
        o2 = jnp.sum(p2 * v_all32, axis=0, keepdims=True) + p2c * cv
        o_ref[0:1, qc:qc + dh] = (o2 / den2).astype(out_dtype)

        if not time_mode:
            # ---- spatial attention: groups = frames (contiguous rows) -> MXU
            for r in range(f):
                lo = r * n
                qg = q_all[lo:lo + n, :]
                kg = k_all[lo:lo + n, :]
                vg = v_all[lo:lo + n, :]
                s = jnp.einsum('id,jd->ij', qg, kg,
                               preferred_element_type=jnp.float32)     # (n, n)
                s_c = jnp.sum(qg.astype(jnp.float32) * ck, axis=-1,
                              keepdims=True)                            # (n, 1)
                m = jnp.maximum(jnp.max(s, axis=-1, keepdims=True), s_c)
                p = jnp.exp(s - m)
                p_c = jnp.exp(s_c - m)
                den = jnp.sum(p, axis=-1, keepdims=True) + p_c
                o = jnp.einsum('ij,jd->id', p.astype(vg.dtype), vg,
                               preferred_element_type=jnp.float32)
                o = (o + p_c * cv) / den
                o_ref[1 + lo:1 + lo + n, qc:qc + dh] = o.astype(out_dtype)
        else:
            # ---- time attention: group = spatial position, members = frames.
            # f is small, so an MXU matmul would be badly under-filled; use VPU
            # broadcast math on contiguous per-frame row blocks (no transposes).
            q_all32 = q_all.astype(jnp.float32)
            for i in range(f):
                qi = q_all32[i * n:(i + 1) * n, :]                      # (n, dh)
                s_cols = [jnp.sum(qi * k_all32[j * n:(j + 1) * n, :],
                                  axis=-1, keepdims=True)
                          for j in range(f)]                            # f x (n,1)
                s_c = jnp.sum(qi * ck, axis=-1, keepdims=True)          # (n, 1)
                m = s_c
                for sj in s_cols:
                    m = jnp.maximum(m, sj)
                p_cols = [jnp.exp(sj - m) for sj in s_cols]
                p_c = jnp.exp(s_c - m)
                den = p_c
                for pj in p_cols:
                    den = den + pj
                o = p_c * cv                                            # (n, dh)
                for j in range(f):
                    o = o + p_cols[j] * v_all32[j * n:(j + 1) * n, :]
                o_ref[1 + i * n:1 + (i + 1) * n, qc:qc + dh] = \
                    (o / den).astype(out_dtype)


def pallas_attention(qkv, f, n, heads, dim_head, time_mode, out_dtype):
    """qkv: (b, N, 3*inner) with N = 1 + f*n.  Returns (b, N, heads*dim_head)."""
    b, N, three_inner = qkv.shape
    inner = heads * dim_head
    kernel = functools.partial(_attention_kernel, f=f, n=n, heads=heads,
                               dh=dim_head, inner=inner, time_mode=time_mode)
    isz = qkv.dtype.itemsize
    block_bytes = (N * three_inner + N * inner) * isz
    # TODO(synk): for very large spatial token counts n, add a group-chunk grid
    #             axis so per-step VMEM stays bounded (v7x: 64 MiB physical).
    return pl.pallas_call(
        kernel,
        out_shape=jax.ShapeDtypeStruct((b, N, inner), out_dtype),
        grid=(b,),
        in_specs=[pl.BlockSpec((None, N, three_inner), lambda bi: (bi, 0, 0))],
        out_specs=pl.BlockSpec((None, N, inner), lambda bi: (bi, 0, 0)),
        compiler_params=_cparams(("parallel",), block_bytes),
    )(qkv)


# ----------------------------------------------------------------------------
# model pieces (glue in JAX, compute in Pallas)
# ----------------------------------------------------------------------------

def attention_forward(p, x, mode, f, n, heads, dim_head, ln_g, ln_b):
    """PreNorm + Attention + residual.  x: (b, N, dim)."""
    b, N, dim = x.shape
    inner = heads * dim_head
    x2 = x.reshape(b * N, dim)

    # LayerNorm fused as the qkv-matmul prologue; q scale folded into w_qkv.
    qkv = pallas_matmul(x2, p["w_qkv"], gamma=ln_g, beta=ln_b)   # (bN, 3*inner)
    qkv = qkv.reshape(b, N, 3 * inner)

    attn_out = pallas_attention(qkv, f=f, n=n, heads=heads, dim_head=dim_head,
                                time_mode=(mode == "time"), out_dtype=x.dtype)

    # output projection: bias + residual fused into the matmul epilogue
    out = pallas_matmul(attn_out.reshape(b * N, inner), p["w_out"],
                        bias=p["b_out"], residual=x2)
    return out.reshape(b, N, dim)


def feedforward_forward(p, x, ln_g, ln_b):
    """PreNorm + FeedForward(GEGLU) + residual.  x: (b, N, dim)."""
    b, N, dim = x.shape
    x2 = x.reshape(b * N, dim)
    h = pallas_ln_geglu(x2, ln_g, ln_b, p["w1a"], p["b1a"], p["w1g"], p["b1g"])
    out = pallas_matmul(h, p["w2"], bias=p["b2"], residual=x2)
    return out.reshape(b, N, dim)


def timesformer_forward(params, video, cfg):
    b, f, c, H, W = video.shape
    ph, pw = cfg["ph"], cfg["pw"]
    dim, heads, dim_head = cfg["dim"], cfg["heads"], cfg["dim_head"]
    hp, wp = H // ph, W // pw
    n = hp * wp

    # 'b f c (h p1) (w p2) -> b (f h w) (p1 p2 c)'  (layout plumbing in XLA)
    x = (video.reshape(b, f, c, hp, ph, wp, pw)
              .transpose(0, 1, 3, 5, 4, 6, 2)
              .reshape(b * f * n, ph * pw * c))

    tokens = pallas_matmul(x, params["patch_w"], bias=params["patch_b"])
    tokens = tokens.reshape(b, f * n, dim)

    cls = jnp.broadcast_to(params["cls_token"][None, :, :], (b, 1, dim))
    x = jnp.concatenate([cls.astype(tokens.dtype), tokens], axis=1)  # (b, N, dim)
    N = x.shape[1]
    x = x + params["pos_emb"][:N][None, :, :]    # learned pos emb (rotary_emb=False)

    for layer in params["layers"]:
        x = attention_forward(layer["time"], x, "time", f, n, heads, dim_head,
                              layer["t_ln_g"], layer["t_ln_b"])
        x = attention_forward(layer["spatial"], x, "spatial", f, n, heads,
                              dim_head, layer["s_ln_g"], layer["s_ln_b"])
        x = feedforward_forward(layer["ff"], x, layer["f_ln_g"], layer["f_ln_b"])

    cls_tok = x[:, 0]                                              # (b, dim)
    # final LayerNorm fused into the lane-padded classifier matmul
    logits = pallas_matmul(cls_tok, params["out_w"], bias=params["out_b"],
                           gamma=params["out_ln_g"], beta=params["out_ln_b"])
    return logits[:, :cfg["num_classes"]]


# ----------------------------------------------------------------------------
# deterministic parameter init
# ----------------------------------------------------------------------------

def init_params(key, cfg):
    dim, heads, dim_head = cfg["dim"], cfg["heads"], cfg["dim_head"]
    inner = heads * dim_head
    mult = 4
    dtype = cfg.get("dtype", jnp.float32)
    patch_dim = cfg["channels"] * cfg["ph"] * cfg["pw"]
    num_patches = (cfg["image_h"] // cfg["ph"]) * (cfg["image_w"] // cfg["pw"])
    num_positions = cfg["num_frames"] * num_patches
    nc = cfg["num_classes"]
    nc_pad = ((nc + 127) // 128) * 128          # lane-dense classifier head

    keys = iter(jax.random.split(key, 8 + 16 * cfg["depth"]))

    def nrm(shape, scale=0.02):
        return jax.random.normal(next(keys), shape, jnp.float32) * scale

    out_w = jnp.zeros((dim, nc_pad), jnp.float32).at[:, :nc].set(nrm((dim, nc)))
    out_b = jnp.zeros((nc_pad,), jnp.float32).at[:nc].set(nrm((nc,)))

    params = {
        "patch_w": nrm((patch_dim, dim)),
        "patch_b": nrm((dim,)),
        "cls_token": nrm((1, dim), 1.0),
        "pos_emb": nrm((num_positions + 1, dim)),
        "out_ln_g": jnp.ones((dim,), jnp.float32),
        "out_ln_b": jnp.zeros((dim,), jnp.float32),
        "out_w": out_w,
        "out_b": out_b,
        "layers": [],
    }

    scale = dim_head ** (-0.5)

    def attn_params():
        w_qkv = nrm((dim, 3 * inner))
        # fold the 1/sqrt(dim_head) query scale into the q-slice of w_qkv
        w_qkv = w_qkv.at[:, :inner].multiply(scale)
        return {"w_qkv": w_qkv, "w_out": nrm((inner, dim)), "b_out": nrm((dim,))}

    for _ in range(cfg["depth"]):
        params["layers"].append({
            "t_ln_g": jnp.ones((dim,), jnp.float32),
            "t_ln_b": jnp.zeros((dim,), jnp.float32),
            "time": attn_params(),
            "s_ln_g": jnp.ones((dim,), jnp.float32),
            "s_ln_b": jnp.zeros((dim,), jnp.float32),
            "spatial": attn_params(),
            "f_ln_g": jnp.ones((dim,), jnp.float32),
            "f_ln_b": jnp.zeros((dim,), jnp.float32),
            "ff": {
                # torch Linear(dim, 2*mult*dim) split into GEGLU value / gate halves
                "w1a": nrm((dim, dim * mult)), "b1a": nrm((dim * mult,)),
                "w1g": nrm((dim, dim * mult)), "b1g": nrm((dim * mult,)),
                "w2": nrm((dim * mult, dim)), "b2": nrm((dim,)),
            },
        })
    return jax.tree_util.tree_map(lambda a: a.astype(dtype), params)


# ----------------------------------------------------------------------------
# main
# ----------------------------------------------------------------------------

if __name__ == "__main__":
    cfg = dict(
        dim=32,
        num_frames=2,
        num_classes=10,
        image_h=16,
        image_w=16,
        ph=8,
        pw=8,
        channels=1,
        depth=2,
        heads=2,
        dim_head=8,
        dtype=jnp.bfloat16,   # bf16 params/activations; kernels keep f32
                              # accumulation and f32 LN/softmax statistics.
    )

    key = jax.random.PRNGKey(0)
    pkey, vkey = jax.random.split(key)
    params = init_params(pkey, cfg)

    # video: (b, f, c, h, w)
    video = jax.random.normal(
        vkey, (2, cfg["num_frames"], cfg["channels"], cfg["image_h"],
               cfg["image_w"]), cfg["dtype"])

    fwd = jax.jit(functools.partial(timesformer_forward, cfg=cfg))
    logits = fwd(params, video)
    jax.block_until_ready(logits)

    assert logits.shape == (2, cfg["num_classes"])
    assert bool(jnp.all(jnp.isfinite(logits.astype(jnp.float32))))
    print("KERNEL_OK")
</pallas_src>

<mosaic_0001>
module attributes {stable_mosaic.version = 11 : i64} {
  func.func @_matmul_kernel(%arg0: i32, %arg1: i32, %arg2: i32, %arg3: memref<32x64xbf16, #tpu.memory_space<vmem>>, %arg4: memref<64x128xbf16, #tpu.memory_space<vmem>>, %arg5: memref<1x128xbf16, #tpu.memory_space<vmem>>, %arg6: memref<32x128xbf16, #tpu.memory_space<vmem>>, %arg7: memref<32x128xf32, #tpu.memory_space<vmem>>) attributes {dimension_semantics = [#tpu.dimension_semantics<parallel>, #tpu.dimension_semantics<parallel>, #tpu.dimension_semantics<arbitrary>], iteration_bounds = array<i64: 1, 1, 1>, scalar_prefetch = 0 : i64, scratch_operands = 1 : i64, tpu.core_type = #tpu.core_type<tc>, window_params = [{transform_indices = @transform_0, window_bounds = array<i64: 32, 64>}, {transform_indices = @transform_1, window_bounds = array<i64: 64, 128>}, {transform_indices = @transform_2, window_bounds = array<i64: 1, 128>}, {transform_indices = @transform_3, window_bounds = array<i64: 32, 128>}]} {
    %c0_i32 = arith.constant 0 : i32
    %0 = arith.cmpi eq, %arg2, %c0_i32 : i32
    %1 = arith.extui %0 : i1 to i32
    %c0_i32_0 = arith.constant 0 : i32
    %2 = arith.cmpi ne, %1, %c0_i32_0 : i32
    scf.if %2 {
      %cst_10 = arith.constant 0.000000e+00 : f32
      %12 = vector.broadcast %cst_10 : f32 to vector<32x128xf32>
      %c0_11 = arith.constant 0 : index
      %c0_12 = arith.constant 0 : index
      %13 = vector.load %arg7[%c0_11, %c0_12] : memref<32x128xf32, #tpu.memory_space<vmem>>, vector<32x128xf32>
      tpu.vector_store %arg7[%c0_11, %c0_12], %12 {strides = array<i32>} : memref<32x128xf32, #tpu.memory_space<vmem>>, vector<32x128xf32>,
    } else {
    }
    %c0 = arith.constant 0 : index
    %c0_1 = arith.constant 0 : index
    %3 = vector.load %arg3[%c0, %c0_1] : memref<32x64xbf16, #tpu.memory_space<vmem>>, vector<32x64xbf16>
    %c0_2 = arith.constant 0 : index
    %c0_3 = arith.constant 0 : index
    %4 = vector.load %arg7[%c0_2, %c0_3] : memref<32x128xf32, #tpu.memory_space<vmem>>, vector<32x128xf32>
    %c0_4 = arith.constant 0 : index
    %c0_5 = arith.constant 0 : index
    %5 = vector.load %arg4[%c0_4, %c0_5] : memref<64x128xbf16, #tpu.memory_space<vmem>>, vector<64x128xbf16>
    %cst = arith.constant dense<0.000000e+00> : vector<32x128xf32>
    %6 = tpu.matmul %3, %5, %cst {dimension_numbers = #tpu.dot_dimension_numbers<[1], [0], [0], [1], [0, 0, 1, 1], [], []>} : vector<32x64xbf16>, vector<64x128xbf16>, vector<32x128xf32> -> vector<32x128xf32>
    %7 = arith.addf %4, %6 : vector<32x128xf32>
    %c0_6 = arith.constant 0 : index
    %c0_7 = arith.constant 0 : index
    %8 = vector.load %arg7[%c0_6, %c0_7] : memref<32x128xf32, #tpu.memory_space<vmem>>, vector<32x128xf32>
    tpu.vector_store %arg7[%c0_6, %c0_7], %7 {strides = array<i32>} : memref<32x128xf32, #tpu.memory_space<vmem>>, vector<32x128xf32>,
    %c0_i32_8 = arith.constant 0 : i32
    %9 = arith.cmpi eq, %arg2, %c0_i32_8 : i32
    %10 = arith.extui %9 : i1 to i32
    %c0_i32_9 = arith.constant 0 : i32
    %11 = arith.cmpi ne, %10, %c0_i32_9 : i32
    scf.if %11 {
      %c0_10 = arith.constant 0 : index
      %c0_11 = arith.constant 0 : index
      %12 = vector.load %arg7[%c0_10, %c0_11] : memref<32x128xf32, #tpu.memory_space<vmem>>, vector<32x128xf32>
      %c0_12 = arith.constant 0 : index
      %c0_13 = arith.constant 0 : index
      %13 = vector.load %arg5[%c0_12, %c0_13] : memref<1x128xbf16, #tpu.memory_space<vmem>>, vector<1x128xbf16>
      %14 = arith.extf %13 : vector<1x128xbf16> to vector<1x128xf32>
      %15 = vector.broadcast %14 : vector<1x128xf32> to vector<32x128xf32>
      %16 = arith.addf %12, %15 : vector<32x128xf32>
      %17 = arith.truncf %16 : vector<32x128xf32> to vector<32x128xbf16>
      %c0_14 = arith.constant 0 : index
      %c0_15 = arith.constant 0 : index
      %18 = vector.load %arg6[%c0_14, %c0_15] : memref<32x128xbf16, #tpu.memory_space<vmem>>, vector<32x128xbf16>
      tpu.vector_store %arg6[%c0_14, %c0_15], %17 {strides = array<i32>} : memref<32x128xbf16, #tpu.memory_space<vmem>>, vector<32x128xbf16>,
    } else {
    }
    return
  }
  func.func @transform_0(%arg0: i32, %arg1: i32, %arg2: i32) -> (i32, i32) {
    %c0_i32 = arith.constant 0 : i32
    return %arg0, %arg2 : i32, i32
  }
  func.func @transform_1(%arg0: i32, %arg1: i32, %arg2: i32) -> (i32, i32) {
    %c0_i32 = arith.constant 0 : i32
    return %arg2, %arg1 : i32, i32
  }
  func.func @transform_2(%arg0: i32, %arg1: i32, %arg2: i32) -> (i32, i32) {
    %c0_i32 = arith.constant 0 : i32
    %c0_i32_0 = arith.constant 0 : i32
    return %c0_i32, %arg1 : i32, i32
  }
  func.func @transform_3(%arg0: i32, %arg1: i32, %arg2: i32) -> (i32, i32) {
    %c0_i32 = arith.constant 0 : i32
    return %arg0, %arg1 : i32, i32
  }
}

module attributes {stable_mosaic.version = 11 : i64} {
  func.func @_attention_kernel(%arg0: i32, %arg1: memref<1x9x48xbf16, #tpu.memory_space<vmem>>, %arg2: memref<1x9x16xbf16, #tpu.memory_space<vmem>>) attributes {dimension_semantics = [#tpu.dimension_semantics<parallel>], iteration_bounds = array<i64: 2>, scalar_prefetch = 0 : i64, scratch_operands = 0 : i64, tpu.core_type = #tpu.core_type<tc>, window_params = [{transform_indices = @transform_0, window_bounds = array<i64: 1, 9, 48>}, {transform_indices = @transform_1, window_bounds = array<i64: 1, 9, 16>}]} {
    %c0 = arith.constant 0 : index
    %c0_0 = arith.constant 0 : index
    %c0_1 = arith.constant 0 : index
    %0 = vector.load %arg1[%c0, %c0_0, %c0_1] : memref<1x9x48xbf16, #tpu.memory_space<vmem>>, vector<1x1x8xbf16>
    %1 = vector.shape_cast %0 : vector<1x1x8xbf16> to vector<1x8xbf16>
    %2 = arith.extf %1 : vector<1x8xbf16> to vector<1x8xf32>
    %c0_2 = arith.constant 0 : index
    %c0_3 = arith.constant 0 : index
    %c16 = arith.constant 16 : index
    %3 = vector.load %arg1[%c0_2, %c0_3, %c16] : memref<1x9x48xbf16, #tpu.memory_space<vmem>>, vector<1x1x8xbf16>
    %4 = vector.shape_cast %3 : vector<1x1x8xbf16> to vector<1x8xbf16>
    %5 = arith.extf %4 : vector<1x8xbf16> to vector<1x8xf32>
    %c0_4 = arith.constant 0 : index
    %c0_5 = arith.constant 0 : index
    %c32 = arith.constant 32 : index
    %6 = vector.load %arg1[%c0_4, %c0_5, %c32] : memref<1x9x48xbf16, #tpu.memory_space<vmem>>, vector<1x1x8xbf16>
    %7 = vector.shape_cast %6 : vector<1x1x8xbf16> to vector<1x8xbf16>
    %8 = arith.extf %7 : vector<1x8xbf16> to vector<1x8xf32>
    %c0_6 = arith.constant 0 : index
    %c1 = arith.constant 1 : index
    %c0_7 = arith.constant 0 : index
    %9 = vector.load %arg1[%c0_6, %c1, %c0_7] : memref<1x9x48xbf16, #tpu.memory_space<vmem>>, vector<1x8x8xbf16>
    %10 = vector.shape_cast %9 : vector<1x8x8xbf16> to vector<8x8xbf16>
    %c0_8 = arith.constant 0 : index
    %c1_9 = arith.constant 1 : index
    %c16_10 = arith.constant 16 : index
    %11 = vector.load %arg1[%c0_8, %c1_9, %c16_10] : memref<1x9x48xbf16, #tpu.memory_space<vmem>>, vector<1x8x8xbf16>
    %12 = vector.shape_cast %11 : vector<1x8x8xbf16> to vector<8x8xbf16>
    %c0_11 = arith.constant 0 : index
    %c1_12 = arith.constant 1 : index
    %c32_13 = arith.constant 32 : index
    %13 = vector.load %arg1[%c0_11, %c1_12, %c32_13] : memref<1x9x48xbf16, #tpu.memory_space<vmem>>, vector<1x8x8xbf16>
    %14 = vector.shape_cast %13 : vector<1x8x8xbf16> to vector<8x8xbf16>
    %15 = arith.extf %12 : vector<8x8xbf16> to vector<8x8xf32>
    %16 = arith.extf %14 : vector<8x8xbf16> to vector<8x8xf32>
    %17 = vector.broadcast %2 : vector<1x8xf32> to vector<8x8xf32>
    %18 = arith.mulf %15, %17 : vector<8x8xf32>
    %cst = arith.constant dense<0.000000e+00> : vector<8xf32>
    %19 = vector.multi_reduction <add>, %18, %cst [1] : vector<8x8xf32> to vector<8xf32>
    %20 = vector.shape_cast %19 : vector<8xf32> to vector<8x1xf32>
    %21 = arith.mulf %2, %5 : vector<1x8xf32>
    %cst_14 = arith.constant dense<0.000000e+00> : vector<1xf32>
    %22 = vector.multi_reduction <add>, %21, %cst_14 [1] : vector<1x8xf32> to vector<1xf32>
    %23 = vector.shape_cast %22 : vector<1xf32> to vector<1x1xf32>
    %cst_15 = arith.constant dense<0xFF800000> : vector<1xf32>
    %24 = vector.multi_reduction <maximumf>, %20, %cst_15 [0] : vector<8x1xf32> to vector<1xf32>
    %25 = vector.shape_cast %24 : vector<1xf32> to vector<1x1xf32>
    %26 = arith.maximumf %25, %23 : vector<1x1xf32>
    %27 = vector.broadcast %26 : vector<1x1xf32> to vector<8x1xf32>
    %28 = arith.subf %20, %27 : vector<8x1xf32>
    %29 = math.exp %28 : vector<8x1xf32>
    %30 = arith.subf %23, %26 : vector<1x1xf32>
    %31 = math.exp %30 : vector<1x1xf32>
    %cst_16 = arith.constant dense<0.000000e+00> : vector<1xf32>
    %32 = vector.multi_reduction <add>, %29, %cst_16 [0] : vector<8x1xf32> to vector<1xf32>
    %33 = vector.shape_cast %32 : vector<1xf32> to vector<1x1xf32>
    %34 = arith.addf %33, %31 : vector<1x1xf32>
    %35 = vector.broadcast %29 : vector<8x1xf32> to vector<8x8xf32>
    %36 = arith.mulf %35, %16 : vector<8x8xf32>
    %cst_17 = arith.constant dense<0.000000e+00> : vector<8xf32>
    %37 = vector.multi_reduction <add>, %36, %cst_17 [0] : vector<8x8xf32> to vector<8xf32>
    %38 = vector.shape_cast %37 : vector<8xf32> to vector<1x8xf32>
    %39 = vector.broadcast %31 : vector<1x1xf32> to vector<1x8xf32>
    %40 = arith.mulf %39, %8 : vector<1x8xf32>
    %41 = arith.addf %38, %40 : vector<1x8xf32>
    %42 = vector.broadcast %34 : vector<1x1xf32> to vector<1x8xf32>
    %43 = arith.divf %41, %42 : vector<1x8xf32>
    %44 = arith.truncf %43 : vector<1x8xf32> to vector<1x8xbf16>
    %c0_18 = arith.constant 0 : index
    %c0_19 = arith.constant 0 : index
    %c0_20 = arith.constant 0 : index
    %45 = vector.load %arg2[%c0_18, %c0_19, %c0_20] : memref<1x9x16xbf16, #tpu.memory_space<vmem>>, vector<1x1x8xbf16>
    %46 = vector.shape_cast %45 : vector<1x1x8xbf16> to vector<1x8xbf16>
    %47 = vector.shape_cast %44 : vector<1x8xbf16> to vector<1x1x8xbf16>
    tpu.vector_store %arg2[%c0_18, %c0_19, %c0_20], %47 {strides = array<i32>} : memref<1x9x16xbf16, #tpu.memory_space<vmem>>, vector<1x1x8xbf16>,
    %48 = arith.extf %10 : vector<8x8xbf16> to vector<8x8xf32>
    %49 = vector.extract_strided_slice %48 {offsets = [0, 0], sizes = [4, 8], strides = [1, 1]} : vector<8x8xf32> to vector<4x8xf32>
    %50 = vector.extract_strided_slice %15 {offsets = [0, 0], sizes = [4, 8], strides = [1, 1]} : vector<8x8xf32> to vector<4x8xf32>
    %51 = arith.mulf %49, %50 : vector<4x8xf32>
    %cst_21 = arith.constant dense<0.000000e+00> : vector<4xf32>
    %52 = vector.multi_reduction <add>, %51, %cst_21 [1] : vector<4x8xf32> to vector<4xf32>
    %53 = vector.shape_cast %52 : vector<4xf32> to vector<4x1xf32>
    %54 = vector.extract_strided_slice %15 {offsets = [4, 0], sizes = [4, 8], strides = [1, 1]} : vector<8x8xf32> to vector<4x8xf32>
    %55 = arith.mulf %49, %54 : vector<4x8xf32>
    %cst_22 = arith.constant dense<0.000000e+00> : vector<4xf32>
    %56 = vector.multi_reduction <add>, %55, %cst_22 [1] : vector<4x8xf32> to vector<4xf32>
    %57 = vector.shape_cast %56 : vector<4xf32> to vector<4x1xf32>
    %58 = vector.broadcast %5 : vector<1x8xf32> to vector<4x8xf32>
    %59 = arith.mulf %49, %58 : vector<4x8xf32>
    %cst_23 = arith.constant dense<0.000000e+00> : vector<4xf32>
    %60 = vector.multi_reduction <add>, %59, %cst_23 [1] : vector<4x8xf32> to vector<4xf32>
    %61 = vector.shape_cast %60 : vector<4xf32> to vector<4x1xf32>
    %62 = arith.maximumf %61, %53 : vector<4x1xf32>
    %63 = arith.maximumf %62, %57 : vector<4x1xf32>
    %64 = arith.subf %53, %63 : vector<4x1xf32>
    %65 = math.exp %64 : vector<4x1xf32>
    %66 = arith.subf %57, %63 : vector<4x1xf32>
    %67 = math.exp %66 : vector<4x1xf32>
    %68 = arith.subf %61, %63 : vector<4x1xf32>
    %69 = math.exp %68 : vector<4x1xf32>
    %70 = arith.addf %69, %65 : vector<4x1xf32>
    %71 = arith.addf %70, %67 : vector<4x1xf32>
    %72 = vector.broadcast %69 : vector<4x1xf32> to vector<4x8xf32>
    %73 = vector.broadcast %8 : vector<1x8xf32> to vector<4x8xf32>
    %74 = arith.mulf %72, %73 : vector<4x8xf32>
    %75 = vector.extract_strided_slice %16 {offsets = [0, 0], sizes = [4, 8], strides = [1, 1]} : vector<8x8xf32> to vector<4x8xf32>
    %76 = vector.broadcast %65 : vector<4x1xf32> to vector<4x8xf32>
    %77 = arith.mulf %76, %75 : vector<4x8xf32>
    %78 = arith.addf %74, %77 : vector<4x8xf32>
    %79 = vector.extract_strided_slice %16 {offsets = [4, 0], sizes = [4, 8], strides = [1, 1]} : vector<8x8xf32> to vector<4x8xf32>
    %80 = vector.broadcast %67 : vector<4x1xf32> to vector<4x8xf32>
    %81 = arith.mulf %80, %79 : vector<4x8xf32>
    %82 = arith.addf %78, %81 : vector<4x8xf32>
    %83 = vector.broadcast %71 : vector<4x1xf32> to vector<4x8xf32>
    %84 = arith.divf %82, %83 : vector<4x8xf32>
    %85 = arith.truncf %84 : vector<4x8xf32> to vector<4x8xbf16>
    %c0_24 = arith.constant 0 : index
    %c1_25 = arith.constant 1 : index
    %c0_26 = arith.constant 0 : index
    %86 = vector.load %arg2[%c0_24, %c1_25, %c0_26] : memref<1x9x16xbf16, #tpu.memory_space<vmem>>, vector<1x4x8xbf16>
    %87 = vector.shape_cast %86 : vector<1x4x8xbf16> to vector<4x8xbf16>
    %88 = vector.shape_cast %85 : vector<4x8xbf16> to vector<1x4x8xbf16>
    tpu.vector_store %arg2[%c0_24, %c1_25, %c0_26], %88 {strides = array<i32>} : memref<1x9x16xbf16, #tpu.memory_space<vmem>>, vector<1x4x8xbf16>,
    %89 = vector.extract_strided_slice %48 {offsets = [4, 0], sizes = [4, 8], strides = [1, 1]} : vector<8x8xf32> to vector<4x8xf32>
    %90 = vector.extract_strided_slice %15 {offsets = [0, 0], sizes = [4, 8], strides = [1, 1]} : vector<8x8xf32> to vector<4x8xf32>
    %91 = arith.mulf %89, %90 : vector<4x8xf32>
    %cst_27 = arith.constant dense<0.000000e+00> : vector<4xf32>
    %92 = vector.multi_reduction <add>, %91, %cst_27 [1] : vector<4x8xf32> to vector<4xf32>
    %93 = vector.shape_cast %92 : vector<4xf32> to vector<4x1xf32>
    %94 = vector.extract_strided_slice %15 {offsets = [4, 0], sizes = [4, 8], strides = [1, 1]} : vector<8x8xf32> to vector<4x8xf32>
    %95 = arith.mulf %89, %94 : vector<4x8xf32>
    %cst_28 = arith.constant dense<0.000000e+00> : vector<4xf32>
    %96 = vector.multi_reduction <add>, %95, %cst_28 [1] : vector<4x8xf32> to vector<4xf32>
    %97 = vector.shape_cast %96 : vector<4xf32> to vector<4x1xf32>
    %98 = vector.broadcast %5 : vector<1x8xf32> to vector<4x8xf32>
    %99 = arith.mulf %89, %98 : vector<4x8xf32>
    %cst_29 = arith.constant dense<0.000000e+00> : vector<4xf32>
    %100 = vector.multi_reduction <add>, %99, %cst_29 [1] : vector<4x8xf32> to vector<4xf32>
    %101 = vector.shape_cast %100 : vector<4xf32> to vector<4x1xf32>
    %102 = arith.maximumf %101, %93 : vector<4x1xf32>
    %103 = arith.maximumf %102, %97 : vector<4x1xf32>
    %104 = arith.subf %93, %103 : vector<4x1xf32>
    %105 = math.exp %104 : vector<4x1xf32>
    %106 = arith.subf %97, %103 : vector<4x1xf32>
    %107 = math.exp %106 : vector<4x1xf32>
    %108 = arith.subf %101, %103 : vector<4x1xf32>
    %109 = math.exp %108 : vector<4x1xf32>
    %110 = arith.addf %109, %105 : vector<4x1xf32>
    %111 = arith.addf %110, %107 : vector<4x1xf32>
    %112 = vector.broadcast %109 : vector<4x1xf32> to vector<4x8xf32>
    %113 = vector.broadcast %8 : vector<1x8xf32> to vector<4x8xf32>
    %114 = arith.mulf %112, %113 : vector<4x8xf32>
    %115 = vector.extract_strided_slice %16 {offsets = [0, 0], sizes = [4, 8], strides = [1, 1]} : vector<8x8xf32> to vector<4x8xf32>
    %116 = vector.broadcast %105 : vector<4x1xf32> to vector<4x8xf32>
    %117 = arith.mulf %116, %115 : vector<4x8xf32>
    %118 = arith.addf %114, %117 : vector<4x8xf32>
    %119 = vector.extract_strided_slice %16 {offsets = [4, 0], sizes = [4, 8], strides = [1, 1]} : vector<8x8xf32> to vector<4x8xf32>
    %120 = vector.broadcast %107 : vector<4x1xf32> to vector<4x8xf32>
    %121 = arith.mulf %120, %119 : vector<4x8xf32>
    %122 = arith.addf %118, %121 : vector<4x8xf32>
    %123 = vector.broadcast %111 : vector<4x1xf32> to vector<4x8xf32>
    %124 = arith.divf %122, %123 : vector<4x8xf32>
    %125 = arith.truncf %124 : vector<4x8xf32> to vector<4x8xbf16>
    %c0_30 = arith.constant 0 : index
    %c5 = arith.constant 5 : index
    %c0_31 = arith.constant 0 : index
    %126 = vector.load %arg2[%c0_30, %c5, %c0_31] : memref<1x9x16xbf16, #tpu.memory_space<vmem>>, vector<1x4x8xbf16>
    %127 = vector.shape_cast %126 : vector<1x4x8xbf16> to vector<4x8xbf16>
    %128 = vector.shape_cast %125 : vector<4x8xbf16> to vector<1x4x8xbf16>
    tpu.vector_store %arg2[%c0_30, %c5, %c0_31], %128 {strides = array<i32>} : memref<1x9x16xbf16, #tpu.memory_space<vmem>>, vector<1x4x8xbf16>,
    %c0_32 = arith.constant 0 : index
    %c0_33 = arith.constant 0 : index
    %c8 = arith.constant 8 : index
    %129 = vector.load %arg1[%c0_32, %c0_33, %c8] : memref<1x9x48xbf16, #tpu.memory_space<vmem>>, vector<1x1x8xbf16>
    %130 = vector.shape_cast %129 : vector<1x1x8xbf16> to vector<1x8xbf16>
    %131 = arith.extf %130 : vector<1x8xbf16> to vector<1x8xf32>
    %c0_34 = arith.constant 0 : index
    %c0_35 = arith.constant 0 : index
    %c24 = arith.constant 24 : index
    %132 = vector.load %arg1[%c0_34, %c0_35, %c24] : memref<1x9x48xbf16, #tpu.memory_space<vmem>>, vector<1x1x8xbf16>
    %133 = vector.shape_cast %132 : vector<1x1x8xbf16> to vector<1x8xbf16>
    %134 = arith.extf %133 : vector<1x8xbf16> to vector<1x8xf32>
    %c0_36 = arith.constant 0 : index
    %c0_37 = arith.constant 0 : index
    %c40 = arith.constant 40 : index
    %135 = vector.load %arg1[%c0_36, %c0_37, %c40] : memref<1x9x48xbf16, #tpu.memory_space<vmem>>, vector<1x1x8xbf16>
    %136 = vector.shape_cast %135 : vector<1x1x8xbf16> to vector<1x8xbf16>
    %137 = arith.extf %136 : vector<1x8xbf16> to vector<1x8xf32>
    %c0_38 = arith.constant 0 : index
    %c1_39 = arith.constant 1 : index
    %c8_40 = arith.constant 8 : index
    %138 = vector.load %arg1[%c0_38, %c1_39, %c8_40] : memref<1x9x48xbf16, #tpu.memory_space<vmem>>, vector<1x8x8xbf16>
    %139 = vector.shape_cast %138 : vector<1x8x8xbf16> to vector<8x8xbf16>
    %c0_41 = arith.constant 0 : index
    %c1_42 = arith.constant 1 : index
    %c24_43 = arith.constant 24 : index
    %140 = vector.load %arg1[%c0_41, %c1_42, %c24_43] : memref<1x9x48xbf16, #tpu.memory_space<vmem>>, vector<1x8x8xbf16>
    %141 = vector.shape_cast %140 : vector<1x8x8xbf16> to vector<8x8xbf16>
    %c0_44 = arith.constant 0 : index
    %c1_45 = arith.constant 1 : index
    %c40_46 = arith.constant 40 : index
    %142 = vector.load %arg1[%c0_44, %c1_45, %c40_46] : memref<1x9x48xbf16, #tpu.memory_space<vmem>>, vector<1x8x8xbf16>
    %143 = vector.shape_cast %142 : vector<1x8x8xbf16> to vector<8x8xbf16>
    %144 = arith.extf %141 : vector<8x8xbf16> to vector<8x8xf32>
    %145 = arith.extf %143 : vector<8x8xbf16> to vector<8x8xf32>
    %146 = vector.broadcast %131 : vector<1x8xf32> to vector<8x8xf32>
    %147 = arith.mulf %144, %146 : vector<8x8xf32>
    %cst_47 = arith.constant dense<0.000000e+00> : vector<8xf32>
    %148 = vector.multi_reduction <add>, %147, %cst_47 [1] : vector<8x8xf32> to vector<8xf32>
    %149 = vector.shape_cast %148 : vector<8xf32> to vector<8x1xf32>
    %150 = arith.mulf %131, %134 : vector<1x8xf32>
    %cst_48 = arith.constant dense<0.000000e+00> : vector<1xf32>
    %151 = vector.multi_reduction <add>, %150, %cst_48 [1] : vector<1x8xf32> to vector<1xf32>
    %152 = vector.shape_cast %151 : vector<1xf32> to vector<1x1xf32>
    %cst_49 = arith.constant dense<0xFF800000> : vector<1xf32>
    %153 = vector.multi_reduction <maximumf>, %149, %cst_49 [0] : vector<8x1xf32> to vector<1xf32>
    %154 = vector.shape_cast %153 : vector<1xf32> to vector<1x1xf32>
    %155 = arith.maximumf %154, %152 : vector<1x1xf32>
    %156 = vector.broadcast %155 : vector<1x1xf32> to vector<8x1xf32>
    %157 = arith.subf %149, %156 : vector<8x1xf32>
    %158 = math.exp %157 : vector<8x1xf32>
    %159 = arith.subf %152, %155 : vector<1x1xf32>
    %160 = math.exp %159 : vector<1x1xf32>
    %cst_50 = arith.constant dense<0.000000e+00> : vector<1xf32>
    %161 = vector.multi_reduction <add>, %158, %cst_50 [0] : vector<8x1xf32> to vector<1xf32>
    %162 = vector.shape_cast %161 : vector<1xf32> to vector<1x1xf32>
    %163 = arith.addf %162, %160 : vector<1x1xf32>
    %164 = vector.broadcast %158 : vector<8x1xf32> to vector<8x8xf32>
    %165 = arith.mulf %164, %145 : vector<8x8xf32>
    %cst_51 = arith.constant dense<0.000000e+00> : vector<8xf32>
    %166 = vector.multi_reduction <add>, %165, %cst_51 [0] : vector<8x8xf32> to vector<8xf32>
    %167 = vector.shape_cast %166 : vector<8xf32> to vector<1x8xf32>
    %168 = vector.broadcast %160 : vector<1x1xf32> to vector<1x8xf32>
    %169 = arith.mulf %168, %137 : vector<1x8xf32>
    %170 = arith.addf %167, %169 : vector<1x8xf32>
    %171 = vector.broadcast %163 : vector<1x1xf32> to vector<1x8xf32>
    %172 = arith.divf %170, %171 : vector<1x8xf32>
    %173 = arith.truncf %172 : vector<1x8xf32> to vector<1x8xbf16>
    %c0_52 = arith.constant 0 : index
    %c0_53 = arith.constant 0 : index
    %c8_54 = arith.constant 8 : index
    %174 = vector.load %arg2[%c0_52, %c0_53, %c8_54] : memref<1x9x16xbf16, #tpu.memory_space<vmem>>, vector<1x1x8xbf16>
    %175 = vector.shape_cast %174 : vector<1x1x8xbf16> to vector<1x8xbf16>
    %176 = vector.shape_cast %173 : vector<1x8xbf16> to vector<1x1x8xbf16>
    tpu.vector_store %arg2[%c0_52, %c0_53, %c8_54], %176 {strides = array<i32>} : memref<1x9x16xbf16, #tpu.memory_space<vmem>>, vector<1x1x8xbf16>,
    %177 = arith.extf %139 : vector<8x8xbf16> to vector<8x8xf32>
    %178 = vector.extract_strided_slice %177 {offsets = [0, 0], sizes = [4, 8], strides = [1, 1]} : vector<8x8xf32> to vector<4x8xf32>
    %179 = vector.extract_strided_slice %144 {offsets = [0, 0], sizes = [4, 8], strides = [1, 1]} : vector<8x8xf32> to vector<4x8xf32>
    %180 = arith.mulf %178, %179 : vector<4x8xf32>
    %cst_55 = arith.constant dense<0.000000e+00> : vector<4xf32>
    %181 = vector.multi_reduction <add>, %180, %cst_55 [1] : vector<4x8xf32> to vector<4xf32>
    %182 = vector.shape_cast %181 : vector<4xf32> to vector<4x1xf32>
    %183 = vector.extract_strided_slice %144 {offsets = [4, 0], sizes = [4, 8], strides = [1, 1]} : vector<8x8xf32> to vector<4x8xf32>
    %184 = arith.mulf %178, %183 : vector<4x8xf32>
    %cst_56 = arith.constant dense<0.000000e+00> : vector<4xf32>
    %185 = vector.multi_reduction <add>, %184, %cst_56 [1] : vector<4x8xf32> to vector<4xf32>
    %186 = vector.shape_cast %185 : vector<4xf32> to vector<4x1xf32>
    %187 = vector.broadcast %134 : vector<1x8xf32> to vector<4x8xf32>
    %188 = arith.mulf %178, %187 : vector<4x8xf32>
    %cst_57 = arith.constant dense<0.000000e+00> : vector<4xf32>
    %189 = vector.multi_reduction <add>, %188, %cst_57 [1] : vector<4x8xf32> to vector<4xf32>
    %190 = vector.shape_cast %189 : vector<4xf32> to vector<4x1xf32>
    %191 = arith.maximumf %190, %182 : vector<4x1xf32>
    %192 = arith.maximumf %191, %186 : vector<4x1xf32>
    %193 = arith.subf %182, %192 : vector<4x1xf32>
    %194 = math.exp %193 : vector<4x1xf32>
    %195 = arith.subf %186, %192 : vector<4x1xf32>
    %196 = math.exp %195 : vector<4x1xf32>
    %197 = arith.subf %190, %192 : vector<4x1xf32>
    %198 = math.exp %197 : vector<4x1xf32>
    %199 = arith.addf %198, %194 : vector<4x1xf32>
    %200 = arith.addf %199, %196 : vector<4x1xf32>
    %201 = vector.broadcast %198 : vector<4x1xf32> to vector<4x8xf32>
    %202 = vector.broadcast %137 : vector<1x8xf32> to vector<4x8xf32>
    %203 = arith.mulf %201, %202 : vector<4x8xf32>
    %204 = vector.extract_strided_slice %145 {offsets = [0, 0], sizes = [4, 8], strides = [1, 1]} : vector<8x8xf32> to vector<4x8xf32>
    %205 = vector.broadcast %194 : vector<4x1xf32> to vector<4x8xf32>
    %206 = arith.mulf %205, %204 : vector<4x8xf32>
    %207 = arith.addf %203, %206 : vector<4x8xf32>
    %208 = vector.extract_strided_slice %145 {offsets = [4, 0], sizes = [4, 8], strides = [1, 1]} : vector<8x8xf32> to vector<4x8xf32>
    %209 = vector.broadcast %196 : vector<4x1xf32> to vector<4x8xf32>
    %210 = arith.mulf %209, %208 : vector<4x8xf32>
    %211 = arith.addf %207, %210 : vector<4x8xf32>
    %212 = vector.broadcast %200 : vector<4x1xf32> to vector<4x8xf32>
    %213 = arith.divf %211, %212 : vector<4x8xf32>
    %214 = arith.truncf %213 : vector<4x8xf32> to vector<4x8xbf16>
    %c0_58 = arith.constant 0 : index
    %c1_59 = arith.constant 1 : index
    %c8_60 = arith.constant 8 : index
    %215 = vector.load %arg2[%c0_58, %c1_59, %c8_60] : memref<1x9x16xbf16, #tpu.memory_space<vmem>>, vector<1x4x8xbf16>
    %216 = vector.shape_cast %215 : vector<1x4x8xbf16> to vector<4x8xbf16>
    %217 = vector.shape_cast %214 : vector<4x8xbf16> to vector<1x4x8xbf16>
    tpu.vector_store %arg2[%c0_58, %c1_59, %c8_60], %217 {strides = array<i32>} : memref<1x9x16xbf16, #tpu.memory_space<vmem>>, vector<1x4x8xbf16>,
    %218 = vector.extract_strided_slice %177 {offsets = [4, 0], sizes = [4, 8], strides = [1, 1]} : vector<8x8xf32> to vector<4x8xf32>
    %219 = vector.extract_strided_slice %144 {offsets = [0, 0], sizes = [4, 8], strides = [1, 1]} : vector<8x8xf32> to vector<4x8xf32>
    %220 = arith.mulf %218, %219 : vector<4x8xf32>
    %cst_61 = arith.constant dense<0.000000e+00> : vector<4xf32>
    %221 = vector.multi_reduction <add>, %220, %cst_61 [1] : vector<4x8xf32> to vector<4xf32>
    %222 = vector.shape_cast %221 : vector<4xf32> to vector<4x1xf32>
    %223 = vector.extract_strided_slice %144 {offsets = [4, 0], sizes = [4, 8], strides = [1, 1]} : vector<8x8xf32> to vector<4x8xf32>
    %224 = arith.mulf %218, %223 : vector<4x8xf32>
    %cst_62 = arith.constant dense<0.000000e+00> : vector<4xf32>
    %225 = vector.multi_reduction <add>, %224, %cst_62 [1] : vector<4x8xf32> to vector<4xf32>
    %226 = vector.shape_cast %225 : vector<4xf32> to vector<4x1xf32>
    %227 = vector.broadcast %134 : vector<1x8xf32> to vector<4x8xf32>
    %228 = arith.mulf %218, %227 : vector<4x8xf32>
    %cst_63 = arith.constant dense<0.000000e+00> : vector<4xf32>
    %229 = vector.multi_reduction <add>, %228, %cst_63 [1] : vector<4x8xf32> to vector<4xf32>
    %230 = vector.shape_cast %229 : vector<4xf32> to vector<4x1xf32>
    %231 = arith.maximumf %230, %222 : vector<4x1xf32>
    %232 = arith.maximumf %231, %226 : vector<4x1xf32>
    %233 = arith.subf %222, %232 : vector<4x1xf32>
    %234 = math.exp %233 : vector<4x1xf32>
    %235 = arith.subf %226, %232 : vector<4x1xf32>
    %236 = math.exp %235 : vector<4x1xf32>
    %237 = arith.subf %230, %232 : vector<4x1xf32>
    %238 = math.exp %237 : vector<4x1xf32>
    %239 = arith.addf %238, %234 : vector<4x1xf32>
    %240 = arith.addf %239, %236 : vector<4x1xf32>
    %241 = vector.broadcast %238 : vector<4x1xf32> to vector<4x8xf32>
    %242 = vector.broadcast %137 : vector<1x8xf32> to vector<4x8xf32>
    %243 = arith.mulf %241, %242 : vector<4x8xf32>
    %244 = vector.extract_strided_slice %145 {offsets = [0, 0], sizes = [4, 8], strides = [1, 1]} : vector<8x8xf32> to vector<4x8xf32>
    %245 = vector.broadcast %234 : vector<4x1xf32> to vector<4x8xf32>
    %246 = arith.mulf %245, %244 : vector<4x8xf32>
    %247 = arith.addf %243, %246 : vector<4x8xf32>
    %248 = vector.extract_strided_slice %145 {offsets = [4, 0], sizes = [4, 8], strides = [1, 1]} : vector<8x8xf32> to vector<4x8xf32>
    %249 = vector.broadcast %236 : vector<4x1xf32> to vector<4x8xf32>
    %250 = arith.mulf %249, %248 : vector<4x8xf32>
    %251 = arith.addf %247, %250 : vector<4x8xf32>
    %252 = vector.broadcast %240 : vector<4x1xf32> to vector<4x8xf32>
    %253 = arith.divf %251, %252 : vector<4x8xf32>
    %254 = arith.truncf %253 : vector<4x8xf32> to vector<4x8xbf16>
    %c0_64 = arith.constant 0 : index
    %c5_65 = arith.constant 5 : index
    %c8_66 = arith.constant 8 : index
    %255 = vector.load %arg2[%c0_64, %c5_65, %c8_66] : memref<1x9x16xbf16, #tpu.memory_space<vmem>>, vector<1x4x8xbf16>
    %256 = vector.shape_cast %255 : vector<1x4x8xbf16> to vector<4x8xbf16>
    %257 = vector.shape_cast %254 : vector<4x8xbf16> to vector<1x4x8xbf16>
    tpu.vector_store %arg2[%c0_64, %c5_65, %c8_66], %257 {strides = array<i32>} : memref<1x9x16xbf16, #tpu.memory_space<vmem>>, vector<1x4x8xbf16>,
    return
  }
  func.func @transform_0(%arg0: i32) -> (i32, i32, i32) {
    %c0_i32 = arith.constant 0 : i32
    %c0_i32_0 = arith.constant 0 : i32
    %c0_i32_1 = arith.constant 0 : i32
    return %arg0, %c0_i32, %c0_i32_0 : i32, i32, i32
  }
  func.func @transform_1(%arg0: i32) -> (i32, i32, i32) {
    %c0_i32 = arith.constant 0 : i32
    %c0_i32_0 = arith.constant 0 : i32
    %c0_i32_1 = arith.constant 0 : i32
    return %arg0, %c0_i32, %c0_i32_0 : i32, i32, i32
  }
}

module attributes {stable_mosaic.version = 11 : i64} {
  func.func @_matmul_kernel(%arg0: i32, %arg1: i32, %arg2: i32, %arg3: memref<32x32xbf16, #tpu.memory_space<vmem>>, %arg4: memref<1x32xbf16, #tpu.memory_space<vmem>>, %arg5: memref<1x32xbf16, #tpu.memory_space<vmem>>, %arg6: memref<32x128xbf16, #tpu.memory_space<vmem>>, %arg7: memref<32x128xbf16, #tpu.memory_space<vmem>>, %arg8: memref<32x128xf32, #tpu.memory_space<vmem>>, %arg9: memref<32x32xbf16, #tpu.memory_space<vmem>>) attributes {dimension_semantics = [#tpu.dimension_semantics<parallel>, #tpu.dimension_semantics<arbitrary>, #tpu.dimension_semantics<arbitrary>], iteration_bounds = array<i64: 1, 1, 1>, scalar_prefetch = 0 : i64, scratch_operands = 2 : i64, tpu.core_type = #tpu.core_type<tc>, window_params = [{transform_indices = @transform_0, window_bounds = array<i64: 32, 32>}, {transform_indices = @transform_1, window_bounds = array<i64: 1, 32>}, {transform_indices = @transform_2, window_bounds = array<i64: 1, 32>}, {transform_indices = @transform_3, window_bounds = array<i64: 32, 128>}, {transform_indices = @transform_4, window_bounds = array<i64: 32, 128>}]} {
    %c0_i32 = arith.constant 0 : i32
    %0 = arith.cmpi eq, %arg2, %c0_i32 : i32
    %1 = arith.extui %0 : i1 to i32
    %c0_i32_0 = arith.constant 0 : i32
    %2 = arith.cmpi ne, %1, %c0_i32_0 : i32
    scf.if %2 {
      %cst_12 = arith.constant 0.000000e+00 : f32
      %15 = vector.broadcast %cst_12 : f32 to vector<32x128xf32>
      %c0_13 = arith.constant 0 : index
      %c0_14 = arith.constant 0 : index
      %16 = vector.load %arg8[%c0_13, %c0_14] : memref<32x128xf32, #tpu.memory_space<vmem>>, vector<32x128xf32>
      tpu.vector_store %arg8[%c0_13, %c0_14], %15 {strides = array<i32>} : memref<32x128xf32, #tpu.memory_space<vmem>>, vector<32x128xf32>,
    } else {
    }
    %c0_i32_1 = arith.constant 0 : i32
    %3 = arith.cmpi eq, %arg1, %c0_i32_1 : i32
    %4 = arith.extui %3 : i1 to i32
    %c0_i32_2 = arith.constant 0 : i32
    %5 = arith.cmpi ne, %4, %c0_i32_2 : i32
    scf.if %5 {
      %c0_12 = arith.constant 0 : index
      %c0_13 = arith.constant 0 : index
      %15 = vector.load %arg3[%c0_12, %c0_13] : memref<32x32xbf16, #tpu.memory_space<vmem>>, vector<32x32xbf16>
      %16 = arith.extf %15 : vector<32x32xbf16> to vector<32x32xf32>
      %cst_14 = arith.constant dense<0.000000e+00> : vector<32xf32>
      %17 = vector.multi_reduction <add>, %16, %cst_14 [1] : vector<32x32xf32> to vector<32xf32>
      %18 = vector.shape_cast %17 : vector<32xf32> to vector<32x1xf32>
      %cst_15 = arith.constant 3.200000e+01 : f32
      %19 = vector.broadcast %cst_15 : f32 to vector<32x1xf32>
      %20 = arith.divf %18, %19 : vector<32x1xf32>
      %21 = vector.broadcast %20 : vector<32x1xf32> to vector<32x32xf32>
      %22 = arith.subf %16, %21 : vector<32x32xf32>
      %23 = arith.mulf %22, %22 : vector<32x32xf32>
      %cst_16 = arith.constant dense<0.000000e+00> : vector<32xf32>
      %24 = vector.multi_reduction <add>, %23, %cst_16 [1] : vector<32x32xf32> to vector<32xf32>
      %25 = vector.shape_cast %24 : vector<32xf32> to vector<32x1xf32>
      %cst_17 = arith.constant 3.200000e+01 : f32
      %26 = vector.broadcast %cst_17 : f32 to vector<32x1xf32>
      %27 = arith.divf %25, %26 : vector<32x1xf32>
      %28 = vector.broadcast %20 : vector<32x1xf32> to vector<32x32xf32>
      %29 = arith.subf %16, %28 : vector<32x32xf32>
      %cst_18 = arith.constant 9.99999974E-6 : f32
      %30 = vector.broadcast %cst_18 : f32 to vector<32x1xf32>
      %31 = arith.addf %27, %30 : vector<32x1xf32>
      %32 = math.rsqrt %31 : vector<32x1xf32>
      %33 = vector.broadcast %32 : vector<32x1xf32> to vector<32x32xf32>
      %34 = arith.mulf %29, %33 : vector<32x32xf32>
      %c0_19 = arith.constant 0 : index
      %c0_20 = arith.constant 0 : index
      %35 = vector.load %arg4[%c0_19, %c0_20] : memref<1x32xbf16, #tpu.memory_space<vmem>>, vector<1x32xbf16>
      %36 = arith.extf %35 : vector<1x32xbf16> to vector<1x32xf32>
      %37 = vector.broadcast %36 : vector<1x32xf32> to vector<32x32xf32>
      %38 = arith.mulf %34, %37 : vector<32x32xf32>
      %c0_21 = arith.constant 0 : index
      %c0_22 = arith.constant 0 : index
      %39 = vector.load %arg5[%c0_21, %c0_22] : memref<1x32xbf16, #tpu.memory_space<vmem>>, vector<1x32xbf16>
      %40 = arith.extf %39 : vector<1x32xbf16> to vector<1x32xf32>
      %41 = vector.broadcast %40 : vector<1x32xf32> to vector<32x32xf32>
      %42 = arith.addf %38, %41 : vector<32x32xf32>
      %43 = arith.truncf %42 : vector<32x32xf32> to vector<32x32xbf16>
      %c0_23 = arith.constant 0 : index
      %c0_24 = arith.constant 0 : index
      %44 = vector.load %arg9[%c0_23, %c0_24] : memref<32x32xbf16, #tpu.memory_space<vmem>>, vector<32x32xbf16>
      tpu.vector_store %arg9[%c0_23, %c0_24], %43 {strides = array<i32>} : memref<32x32xbf16, #tpu.memory_space<vmem>>, vector<32x32xbf16>,
    } else {
    }
    %c0 = arith.constant 0 : index
    %c0_3 = arith.constant 0 : index
    %6 = vector.load %arg9[%c0, %c0_3] : memref<32x32xbf16, #tpu.memory_space<vmem>>, vector<32x32xbf16>
    %c0_4 = arith.constant 0 : index
    %c0_5 = arith.constant 0 : index
    %7 = vector.load %arg8[%c0_4, %c0_5] : memref<32x128xf32, #tpu.memory_space<vmem>>, vector<32x128xf32>
    %c0_6 = arith.constant 0 : index
    %c0_7 = arith.constant 0 : index
    %8 = vector.load %arg6[%c0_6, %c0_7] : memref<32x128xbf16, #tpu.memory_space<vmem>>, vector<32x128xbf16>
    %cst = arith.constant dense<0.000000e+00> : vector<32x128xf32>
    %9 = tpu.matmul %6, %8, %cst {dimension_numbers = #tpu.dot_dimension_numbers<[1], [0], [0], [1], [0, 0, 1, 1], [], []>} : vector<32x32xbf16>, vector<32x128xbf16>, vector<32x128xf32> -> vector<32x128xf32>
    %10 = arith.addf %7, %9 : vector<32x128xf32>
    %c0_8 = arith.constant 0 : index
    %c0_9 = arith.constant 0 : index
    %11 = vector.load %arg8[%c0_8, %c0_9] : memref<32x128xf32, #tpu.memory_space<vmem>>, vector<32x128xf32>
    tpu.vector_store %arg8[%c0_8, %c0_9], %10 {strides = array<i32>} : memref<32x128xf32, #tpu.memory_space<vmem>>, vector<32x128xf32>,
    %c0_i32_10 = arith.constant 0 : i32
    %12 = arith.cmpi eq, %arg2, %c0_i32_10 : i32
    %13 = arith.extui %12 : i1 to i32
    %c0_i32_11 = arith.constant 0 : i32
    %14 = arith.cmpi ne, %13, %c0_i32_11 : i32
    scf.if %14 {
      %c0_12 = arith.constant 0 : index
      %c0_13 = arith.constant 0 : index
      %15 = vector.load %arg8[%c0_12, %c0_13] : memref<32x128xf32, #tpu.memory_space<vmem>>, vector<32x128xf32>
      %16 = arith.truncf %15 : vector<32x128xf32> to vector<32x128xbf16>
      %c0_14 = arith.constant 0 : index
      %c0_15 = arith.constant 0 : index
      %17 = vector.load %arg7[%c0_14, %c0_15] : memref<32x128xbf16, #tpu.memory_space<vmem>>, vector<32x128xbf16>
      tpu.vector_store %arg7[%c0_14, %c0_15], %16 {strides = array<i32>} : memref<32x128xbf16, #tpu.memory_space<vmem>>, vector<32x128xbf16>,
    } else {
    }
    return
  }
  func.func @transform_0(%arg0: i32, %arg1: i32, %arg2: i32) -> (i32, i32) {
    %c0_i32 = arith.constant 0 : i32
    return %arg0, %arg2 : i32, i32
  }
  func.func @transform_1(%arg0: i32, %arg1: i32, %arg2: i32) -> (i32, i32) {
    %c0_i32 = arith.constant 0 : i32
    %c0_i32_0 = arith.constant 0 : i32
    return %c0_i32, %arg2 : i32, i32
  }
  func.func @transform_2(%arg0: i32, %arg1: i32, %arg2: i32) -> (i32, i32) {
    %c0_i32 = arith.constant 0 : i32
    %c0_i32_0 = arith.constant 0 : i32
    return %c0_i32, %arg2 : i32, i32
  }
  func.func @transform_3(%arg0: i32, %arg1: i32, %arg2: i32) -> (i32, i32) {
    %c0_i32 = arith.constant 0 : i32
    return %arg2, %arg1 : i32, i32
  }
  func.func @transform_4(%arg0: i32, %arg1: i32, %arg2: i32) -> (i32, i32) {
    %c0_i32 = arith.constant 0 : i32
    return %arg0, %arg1 : i32, i32
  }
}

module attributes {stable_mosaic.version = 11 : i64} {
  func.func @_matmul_kernel(%arg0: i32, %arg1: i32, %arg2: i32, %arg3: memref<32x16xbf16, #tpu.memory_space<vmem>>, %arg4: memref<16x128xbf16, #tpu.memory_space<vmem>>, %arg5: memref<1x128xbf16, #tpu.memory_space<vmem>>, %arg6: memref<32x128xbf16, #tpu.memory_space<vmem>>, %arg7: memref<32x128xbf16, #tpu.memory_space<vmem>>, %arg8: memref<32x128xf32, #tpu.memory_space<vmem>>) attributes {dimension_semantics = [#tpu.dimension_semantics<parallel>, #tpu.dimension_semantics<parallel>, #tpu.dimension_semantics<arbitrary>], iteration_bounds = array<i64: 1, 1, 1>, scalar_prefetch = 0 : i64, scratch_operands = 1 : i64, tpu.core_type = #tpu.core_type<tc>, window_params = [{transform_indices = @transform_0, window_bounds = array<i64: 32, 16>}, {transform_indices = @transform_1, window_bounds = array<i64: 16, 128>}, {transform_indices = @transform_2, window_bounds = array<i64: 1, 128>}, {transform_indices = @transform_3, window_bounds = array<i64: 32, 128>}, {transform_indices = @transform_4, window_bounds = array<i64: 32, 128>}]} {
    %c0_i32 = arith.constant 0 : i32
    %0 = arith.cmpi eq, %arg2, %c0_i32 : i32
    %1 = arith.extui %0 : i1 to i32
    %c0_i32_0 = arith.constant 0 : i32
    %2 = arith.cmpi ne, %1, %c0_i32_0 : i32
    scf.if %2 {
      %cst_10 = arith.constant 0.000000e+00 : f32
      %12 = vector.broadcast %cst_10 : f32 to vector<32x128xf32>
      %c0_11 = arith.constant 0 : index
      %c0_12 = arith.constant 0 : index
      %13 = vector.load %arg8[%c0_11, %c0_12] : memref<32x128xf32, #tpu.memory_space<vmem>>, vector<32x128xf32>
      tpu.vector_store %arg8[%c0_11, %c0_12], %12 {strides = array<i32>} : memref<32x128xf32, #tpu.memory_space<vmem>>, vector<32x128xf32>,
    } else {
    }
    %c0 = arith.constant 0 : index
    %c0_1 = arith.constant 0 : index
    %3 = vector.load %arg3[%c0, %c0_1] : memref<32x16xbf16, #tpu.memory_space<vmem>>, vector<32x16xbf16>
    %c0_2 = arith.constant 0 : index
    %c0_3 = arith.constant 0 : index
    %4 = vector.load %arg8[%c0_2, %c0_3] : memref<32x128xf32, #tpu.memory_space<vmem>>, vector<32x128xf32>
    %c0_4 = arith.constant 0 : index
    %c0_5 = arith.constant 0 : index
    %5 = vector.load %arg4[%c0_4, %c0_5] : memref<16x128xbf16, #tpu.memory_space<vmem>>, vector<16x128xbf16>
    %cst = arith.constant dense<0.000000e+00> : vector<32x128xf32>
    %6 = tpu.matmul %3, %5, %cst {dimension_numbers = #tpu.dot_dimension_numbers<[1], [0], [0], [1], [0, 0, 1, 1], [], []>} : vector<32x16xbf16>, vector<16x128xbf16>, vector<32x128xf32> -> vector<32x128xf32>
    %7 = arith.addf %4, %6 : vector<32x128xf32>
    %c0_6 = arith.constant 0 : index
    %c0_7 = arith.constant 0 : index
    %8 = vector.load %arg8[%c0_6, %c0_7] : memref<32x128xf32, #tpu.memory_space<vmem>>, vector<32x128xf32>
    tpu.vector_store %arg8[%c0_6, %c0_7], %7 {strides = array<i32>} : memref<32x128xf32, #tpu.memory_space<vmem>>, vector<32x128xf32>,
    %c0_i32_8 = arith.constant 0 : i32
    %9 = arith.cmpi eq, %arg2, %c0_i32_8 : i32
    %10 = arith.extui %9 : i1 to i32
    %c0_i32_9 = arith.constant 0 : i32
    %11 = arith.cmpi ne, %10, %c0_i32_9 : i32
    scf.if %11 {
      %c0_10 = arith.constant 0 : index
      %c0_11 = arith.constant 0 : index
      %12 = vector.load %arg8[%c0_10, %c0_11] : memref<32x128xf32, #tpu.memory_space<vmem>>, vector<32x128xf32>
      %c0_12 = arith.constant 0 : index
      %c0_13 = arith.constant 0 : index
      %13 = vector.load %arg5[%c0_12, %c0_13] : memref<1x128xbf16, #tpu.memory_space<vmem>>, vector<1x128xbf16>
      %14 = arith.extf %13 : vector<1x128xbf16> to vector<1x128xf32>
      %15 = vector.broadcast %14 : vector<1x128xf32> to vector<32x128xf32>
      %16 = arith.addf %12, %15 : vector<32x128xf32>
      %c0_14 = arith.constant 0 : index
      %c0_15 = arith.constant 0 : index
      %17 = vector.load %arg6[%c0_14, %c0_15] : memref<32x128xbf16, #tpu.memory_space<vmem>>, vector<32x128xbf16>
      %18 = arith.extf %17 : vector<32x128xbf16> to vector<32x128xf32>
      %19 = arith.addf %16, %18 : vector<32x128xf32>
      %20 = arith.truncf %19 : vector<32x128xf32> to vector<32x128xbf16>
      %c0_16 = arith.constant 0 : index
      %c0_17 = arith.constant 0 : index
      %21 = vector.load %arg7[%c0_16, %c0_17] : memref<32x128xbf16, #tpu.memory_space<vmem>>, vector<32x128xbf16>
      tpu.vector_store %arg7[%c0_16, %c0_17], %20 {strides = array<i32>} : memref<32x128xbf16, #tpu.memory_space<vmem>>, vector<32x128xbf16>,
    } else {
    }
    return
  }
  func.func @transform_0(%arg0: i32, %arg1: i32, %arg2: i32) -> (i32, i32) {
    %c0_i32 = arith.constant 0 : i32
    return %arg0, %arg2 : i32, i32
  }
  func.func @transform_1(%arg0: i32, %arg1: i32, %arg2: i32) -> (i32, i32) {
    %c0_i32 = arith.constant 0 : i32
    return %arg2, %arg1 : i32, i32
  }
  func.func @transform_2(%arg0: i32, %arg1: i32, %arg2: i32) -> (i32, i32) {
    %c0_i32 = arith.constant 0 : i32
    %c0_i32_0 = arith.constant 0 : i32
    return %c0_i32, %arg1 : i32, i32
  }
  func.func @transform_3(%arg0: i32, %arg1: i32, %arg2: i32) -> (i32, i32) {
    %c0_i32 = arith.constant 0 : i32
    return %arg0, %arg1 : i32, i32
  }
  func.func @transform_4(%arg0: i32, %arg1: i32, %arg2: i32) -> (i32, i32) {
    %c0_i32 = arith.constant 0 : i32
    return %arg0, %arg1 : i32, i32
  }
}

module attributes {stable_mosaic.version = 11 : i64} {
  func.func @_ln_geglu_kernel(%arg0: i32, %arg1: i32, %arg2: memref<32x32xbf16, #tpu.memory_space<vmem>>, %arg3: memref<1x32xbf16, #tpu.memory_space<vmem>>, %arg4: memref<1x32xbf16, #tpu.memory_space<vmem>>, %arg5: memref<32x128xbf16, #tpu.memory_space<vmem>>, %arg6: memref<1x128xbf16, #tpu.memory_space<vmem>>, %arg7: memref<32x128xbf16, #tpu.memory_space<vmem>>, %arg8: memref<1x128xbf16, #tpu.memory_space<vmem>>, %arg9: memref<32x128xbf16, #tpu.memory_space<vmem>>, %arg10: memref<32x32xbf16, #tpu.memory_space<vmem>>) attributes {dimension_semantics = [#tpu.dimension_semantics<parallel>, #tpu.dimension_semantics<arbitrary>], iteration_bounds = array<i64: 1, 1>, scalar_prefetch = 0 : i64, scratch_operands = 1 : i64, tpu.core_type = #tpu.core_type<tc>, window_params = [{transform_indices = @transform_0, window_bounds = array<i64: 32, 32>}, {pipeline_mode = #tpu.pipeline_mode<synchronous>, transform_indices = @transform_1, window_bounds = array<i64: 1, 32>}, {pipeline_mode = #tpu.pipeline_mode<synchronous>, transform_indices = @transform_2, window_bounds = array<i64: 1, 32>}, {transform_indices = @transform_3, window_bounds = array<i64: 32, 128>}, {transform_indices = @transform_4, window_bounds = array<i64: 1, 128>}, {transform_indices = @transform_5, window_bounds = array<i64: 32, 128>}, {transform_indices = @transform_6, window_bounds = array<i64: 1, 128>}, {transform_indices = @transform_7, window_bounds = array<i64: 32, 128>}]} {
    %c0_i32 = arith.constant 0 : i32
    %0 = arith.cmpi eq, %arg1, %c0_i32 : i32
    %1 = arith.extui %0 : i1 to i32
    %c0_i32_0 = arith.constant 0 : i32
    %2 = arith.cmpi ne, %1, %c0_i32_0 : i32
    scf.if %2 {
      %c0_17 = arith.constant 0 : index
      %c0_18 = arith.constant 0 : index
      %32 = vector.load %arg2[%c0_17, %c0_18] : memref<32x32xbf16, #tpu.memory_space<vmem>>, vector<32x32xbf16>
      %33 = arith.extf %32 : vector<32x32xbf16> to vector<32x32xf32>
      %cst_19 = arith.constant dense<0.000000e+00> : vector<32xf32>
      %34 = vector.multi_reduction <add>, %33, %cst_19 [1] : vector<32x32xf32> to vector<32xf32>
      %35 = vector.shape_cast %34 : vector<32xf32> to vector<32x1xf32>
      %cst_20 = arith.constant 3.200000e+01 : f32
      %36 = vector.broadcast %cst_20 : f32 to vector<32x1xf32>
      %37 = arith.divf %35, %36 : vector<32x1xf32>
      %38 = vector.broadcast %37 : vector<32x1xf32> to vector<32x32xf32>
      %39 = arith.subf %33, %38 : vector<32x32xf32>
      %40 = arith.mulf %39, %39 : vector<32x32xf32>
      %cst_21 = arith.constant dense<0.000000e+00> : vector<32xf32>
      %41 = vector.multi_reduction <add>, %40, %cst_21 [1] : vector<32x32xf32> to vector<32xf32>
      %42 = vector.shape_cast %41 : vector<32xf32> to vector<32x1xf32>
      %cst_22 = arith.constant 3.200000e+01 : f32
      %43 = vector.broadcast %cst_22 : f32 to vector<32x1xf32>
      %44 = arith.divf %42, %43 : vector<32x1xf32>
      %45 = vector.broadcast %37 : vector<32x1xf32> to vector<32x32xf32>
      %46 = arith.subf %33, %45 : vector<32x32xf32>
      %cst_23 = arith.constant 9.99999974E-6 : f32
      %47 = vector.broadcast %cst_23 : f32 to vector<32x1xf32>
      %48 = arith.addf %44, %47 : vector<32x1xf32>
      %49 = math.rsqrt %48 : vector<32x1xf32>
      %50 = vector.broadcast %49 : vector<32x1xf32> to vector<32x32xf32>
      %51 = arith.mulf %46, %50 : vector<32x32xf32>
      %c0_24 = arith.constant 0 : index
      %c0_25 = arith.constant 0 : index
      %52 = vector.load %arg3[%c0_24, %c0_25] : memref<1x32xbf16, #tpu.memory_space<vmem>>, vector<1x32xbf16>
      %53 = arith.extf %52 : vector<1x32xbf16> to vector<1x32xf32>
      %54 = vector.broadcast %53 : vector<1x32xf32> to vector<32x32xf32>
      %55 = arith.mulf %51, %54 : vector<32x32xf32>
      %c0_26 = arith.constant 0 : index
      %c0_27 = arith.constant 0 : index
      %56 = vector.load %arg4[%c0_26, %c0_27] : memref<1x32xbf16, #tpu.memory_space<vmem>>, vector<1x32xbf16>
      %57 = arith.extf %56 : vector<1x32xbf16> to vector<1x32xf32>
      %58 = vector.broadcast %57 : vector<1x32xf32> to vector<32x32xf32>
      %59 = arith.addf %55, %58 : vector<32x32xf32>
      %60 = arith.truncf %59 : vector<32x32xf32> to vector<32x32xbf16>
      %c0_28 = arith.constant 0 : index
      %c0_29 = arith.constant 0 : index
      %61 = vector.load %arg10[%c0_28, %c0_29] : memref<32x32xbf16, #tpu.memory_space<vmem>>, vector<32x32xbf16>
      tpu.vector_store %arg10[%c0_28, %c0_29], %60 {strides = array<i32>} : memref<32x32xbf16, #tpu.memory_space<vmem>>, vector<32x32xbf16>,
    } else {
    }
    %c0 = arith.constant 0 : index
    %c0_1 = arith.constant 0 : index
    %3 = vector.load %arg10[%c0, %c0_1] : memref<32x32xbf16, #tpu.memory_space<vmem>>, vector<32x32xbf16>
    %c0_2 = arith.constant 0 : index
    %c0_3 = arith.constant 0 : index
    %4 = vector.load %arg5[%c0_2, %c0_3] : memref<32x128xbf16, #tpu.memory_space<vmem>>, vector<32x128xbf16>
    %cst = arith.constant dense<0.000000e+00> : vector<32x128xf32>
    %5 = tpu.matmul %3, %4, %cst {dimension_numbers = #tpu.dot_dimension_numbers<[1], [0], [0], [1], [0, 0, 1, 1], [], []>} : vector<32x32xbf16>, vector<32x128xbf16>, vector<32x128xf32> -> vector<32x128xf32>
    %c0_4 = arith.constant 0 : index
    %c0_5 = arith.constant 0 : index
    %6 = vector.load %arg6[%c0_4, %c0_5] : memref<1x128xbf16, #tpu.memory_space<vmem>>, vector<1x128xbf16>
    %7 = arith.extf %6 : vector<1x128xbf16> to vector<1x128xf32>
    %8 = vector.broadcast %7 : vector<1x128xf32> to vector<32x128xf32>
    %9 = arith.addf %5, %8 : vector<32x128xf32>
    %c0_6 = arith.constant 0 : index
    %c0_7 = arith.constant 0 : index
    %10 = vector.load %arg7[%c0_6, %c0_7] : memref<32x128xbf16, #tpu.memory_space<vmem>>, vector<32x128xbf16>
    %cst_8 = arith.constant dense<0.000000e+00> : vector<32x128xf32>
    %11 = tpu.matmul %3, %10, %cst_8 {dimension_numbers = #tpu.dot_dimension_numbers<[1], [0], [0], [1], [0, 0, 1, 1], [], []>} : vector<32x32xbf16>, vector<32x128xbf16>, vector<32x128xf32> -> vector<32x128xf32>
    %c0_9 = arith.constant 0 : index
    %c0_10 = arith.constant 0 : index
    %12 = vector.load %arg8[%c0_9, %c0_10] : memref<1x128xbf16, #tpu.memory_space<vmem>>, vector<1x128xbf16>
    %13 = arith.extf %12 : vector<1x128xbf16> to vector<1x128xf32>
    %14 = vector.broadcast %13 : vector<1x128xf32> to vector<32x128xf32>
    %15 = arith.addf %11, %14 : vector<32x128xf32>
    %cst_11 = arith.constant 5.000000e-01 : f32
    %16 = vector.broadcast %cst_11 : f32 to vector<32x128xf32>
    %17 = arith.mulf %16, %15 : vector<32x128xf32>
    %cst_12 = arith.constant 4.471500e-02 : f32
    %18 = vector.broadcast %cst_12 : f32 to vector<32x128xf32>
    %19 = arith.mulf %18, %15 : vector<32x128xf32>
    %20 = arith.mulf %19, %15 : vector<32x128xf32>
    %21 = arith.mulf %20, %15 : vector<32x128xf32>
    %22 = arith.addf %15, %21 : vector<32x128xf32>
    %cst_13 = arith.constant 0.797884583 : f32
    %23 = vector.broadcast %cst_13 : f32 to vector<32x128xf32>
    %24 = arith.mulf %23, %22 : vector<32x128xf32>
    %25 = math.tanh %24 : vector<32x128xf32>
    %cst_14 = arith.constant 1.000000e+00 : f32
    %26 = vector.broadcast %cst_14 : f32 to vector<32x128xf32>
    %27 = arith.addf %26, %25 : vector<32x128xf32>
    %28 = arith.mulf %17, %27 : vector<32x128xf32>
    %29 = arith.mulf %9, %28 : vector<32x128xf32>
    %30 = arith.truncf %29 : vector<32x128xf32> to vector<32x128xbf16>
    %c0_15 = arith.constant 0 : index
    %c0_16 = arith.constant 0 : index
    %31 = vector.load %arg9[%c0_15, %c0_16] : memref<32x128xbf16, #tpu.memory_space<vmem>>, vector<32x128xbf16>
    tpu.vector_store %arg9[%c0_15, %c0_16], %30 {strides = array<i32>} : memref<32x128xbf16, #tpu.memory_space<vmem>>, vector<32x128xbf16>,
    return
  }
  func.func @transform_0(%arg0: i32, %arg1: i32) -> (i32, i32) {
    %c0_i32 = arith.constant 0 : i32
    %c0_i32_0 = arith.constant 0 : i32
    return %arg0, %c0_i32 : i32, i32
  }
  func.func @transform_1(%arg0: i32, %arg1: i32) -> (i32, i32) {
    %c0_i32 = arith.constant 0 : i32
    %c0_i32_0 = arith.constant 0 : i32
    %c0_i32_1 = arith.constant 0 : i32
    return %c0_i32, %c0_i32_0 : i32, i32
  }
  func.func @transform_2(%arg0: i32, %arg1: i32) -> (i32, i32) {
    %c0_i32 = arith.constant 0 : i32
    %c0_i32_0 = arith.constant 0 : i32
    %c0_i32_1 = arith.constant 0 : i32
    return %c0_i32, %c0_i32_0 : i32, i32
  }
  func.func @transform_3(%arg0: i32, %arg1: i32) -> (i32, i32) {
    %c0_i32 = arith.constant 0 : i32
    %c0_i32_0 = arith.constant 0 : i32
    return %c0_i32, %arg1 : i32, i32
  }
  func.func @transform_4(%arg0: i32, %arg1: i32) -> (i32, i32) {
    %c0_i32 = arith.constant 0 : i32
    %c0_i32_0 = arith.constant 0 : i32
    return %c0_i32, %arg1 : i32, i32
  }
  func.func @transform_5(%arg0: i32, %arg1: i32) -> (i32, i32) {
    %c0_i32 = arith.constant 0 : i32
    %c0_i32_0 = arith.constant 0 : i32
    return %c0_i32, %arg1 : i32, i32
  }
  func.func @transform_6(%arg0: i32, %arg1: i32) -> (i32, i32) {
    %c0_i32 = arith.constant 0 : i32
    %c0_i32_0 = arith.constant 0 : i32
    return %c0_i32, %arg1 : i32, i32
  }
  func.func @transform_7(%arg0: i32, %arg1: i32) -> (i32, i32) {
    %c0_i32 = arith.constant 0 : i32
    return %arg0, %arg1 : i32, i32
  }
}

module attributes {stable_mosaic.version = 11 : i64} {
  func.func @_attention_kernel(%arg0: i32, %arg1: memref<1x9x48xbf16, #tpu.memory_space<vmem>>, %arg2: memref<1x9x16xbf16, #tpu.memory_space<vmem>>) attributes {dimension_semantics = [#tpu.dimension_semantics<parallel>], iteration_bounds = array<i64: 2>, scalar_prefetch = 0 : i64, scratch_operands = 0 : i64, tpu.core_type = #tpu.core_type<tc>, window_params = [{transform_indices = @transform_0, window_bounds = array<i64: 1, 9, 48>}, {transform_indices = @transform_1, window_bounds = array<i64: 1, 9, 16>}]} {
    %c0 = arith.constant 0 : index
    %c0_0 = arith.constant 0 : index
    %c0_1 = arith.constant 0 : index
    %0 = vector.load %arg1[%c0, %c0_0, %c0_1] : memref<1x9x48xbf16, #tpu.memory_space<vmem>>, vector<1x1x8xbf16>
    %1 = vector.shape_cast %0 : vector<1x1x8xbf16> to vector<1x8xbf16>
    %2 = arith.extf %1 : vector<1x8xbf16> to vector<1x8xf32>
    %c0_2 = arith.constant 0 : index
    %c0_3 = arith.constant 0 : index
    %c16 = arith.constant 16 : index
    %3 = vector.load %arg1[%c0_2, %c0_3, %c16] : memref<1x9x48xbf16, #tpu.memory_space<vmem>>, vector<1x1x8xbf16>
    %4 = vector.shape_cast %3 : vector<1x1x8xbf16> to vector<1x8xbf16>
    %5 = arith.extf %4 : vector<1x8xbf16> to vector<1x8xf32>
    %c0_4 = arith.constant 0 : index
    %c0_5 = arith.constant 0 : index
    %c32 = arith.constant 32 : index
    %6 = vector.load %arg1[%c0_4, %c0_5, %c32] : memref<1x9x48xbf16, #tpu.memory_space<vmem>>, vector<1x1x8xbf16>
    %7 = vector.shape_cast %6 : vector<1x1x8xbf16> to vector<1x8xbf16>
    %8 = arith.extf %7 : vector<1x8xbf16> to vector<1x8xf32>
    %c0_6 = arith.constant 0 : index
    %c1 = arith.constant 1 : index
    %c0_7 = arith.constant 0 : index
    %9 = vector.load %arg1[%c0_6, %c1, %c0_7] : memref<1x9x48xbf16, #tpu.memory_space<vmem>>, vector<1x8x8xbf16>
    %10 = vector.shape_cast %9 : vector<1x8x8xbf16> to vector<8x8xbf16>
    %c0_8 = arith.constant 0 : index
    %c1_9 = arith.constant 1 : index
    %c16_10 = arith.constant 16 : index
    %11 = vector.load %arg1[%c0_8, %c1_9, %c16_10] : memref<1x9x48xbf16, #tpu.memory_space<vmem>>, vector<1x8x8xbf16>
    %12 = vector.shape_cast %11 : vector<1x8x8xbf16> to vector<8x8xbf16>
    %c0_11 = arith.constant 0 : index
    %c1_12 = arith.constant 1 : index
    %c32_13 = arith.constant 32 : index
    %13 = vector.load %arg1[%c0_11, %c1_12, %c32_13] : memref<1x9x48xbf16, #tpu.memory_space<vmem>>, vector<1x8x8xbf16>
    %14 = vector.shape_cast %13 : vector<1x8x8xbf16> to vector<8x8xbf16>
    %15 = arith.extf %12 : vector<8x8xbf16> to vector<8x8xf32>
    %16 = arith.extf %14 : vector<8x8xbf16> to vector<8x8xf32>
    %17 = vector.broadcast %2 : vector<1x8xf32> to vector<8x8xf32>
    %18 = arith.mulf %15, %17 : vector<8x8xf32>
    %cst = arith.constant dense<0.000000e+00> : vector<8xf32>
    %19 = vector.multi_reduction <add>, %18, %cst [1] : vector<8x8xf32> to vector<8xf32>
    %20 = vector.shape_cast %19 : vector<8xf32> to vector<8x1xf32>
    %21 = arith.mulf %2, %5 : vector<1x8xf32>
    %cst_14 = arith.constant dense<0.000000e+00> : vector<1xf32>
    %22 = vector.multi_reduction <add>, %21, %cst_14 [1] : vector<1x8xf32> to vector<1xf32>
    %23 = vector.shape_cast %22 : vector<1xf32> to vector<1x1xf32>
    %cst_15 = arith.constant dense<0xFF800000> : vector<1xf32>
    %24 = vector.multi_reduction <maximumf>, %20, %cst_15 [0] : vector<8x1xf32> to vector<1xf32>
    %25 = vector.shape_cast %24 : vector<1xf32> to vector<1x1xf32>
    %26 = arith.maximumf %25, %23 : vector<1x1xf32>
    %27 = vector.broadcast %26 : vector<1x1xf32> to vector<8x1xf32>
    %28 = arith.subf %20, %27 : vector<8x1xf32>
    %29 = math.exp %28 : vector<8x1xf32>
    %30 = arith.subf %23, %26 : vector<1x1xf32>
    %31 = math.exp %30 : vector<1x1xf32>
    %cst_16 = arith.constant dense<0.000000e+00> : vector<1xf32>
    %32 = vector.multi_reduction <add>, %29, %cst_16 [0] : vector<8x1xf32> to vector<1xf32>
    %33 = vector.shape_cast %32 : vector<1xf32> to vector<1x1xf32>
    %34 = arith.addf %33, %31 : vector<1x1xf32>
    %35 = vector.broadcast %29 : vector<8x1xf32> to vector<8x8xf32>
    %36 = arith.mulf %35, %16 : vector<8x8xf32>
    %cst_17 = arith.constant dense<0.000000e+00> : vector<8xf32>
    %37 = vector.multi_reduction <add>, %36, %cst_17 [0] : vector<8x8xf32> to vector<8xf32>
    %38 = vector.shape_cast %37 : vector<8xf32> to vector<1x8xf32>
    %39 = vector.broadcast %31 : vector<1x1xf32> to vector<1x8xf32>
    %40 = arith.mulf %39, %8 : vector<1x8xf32>
    %41 = arith.addf %38, %40 : vector<1x8xf32>
    %42 = vector.broadcast %34 : vector<1x1xf32> to vector<1x8xf32>
    %43 = arith.divf %41, %42 : vector<1x8xf32>
    %44 = arith.truncf %43 : vector<1x8xf32> to vector<1x8xbf16>
    %c0_18 = arith.constant 0 : index
    %c0_19 = arith.constant 0 : index
    %c0_20 = arith.constant 0 : index
    %45 = vector.load %arg2[%c0_18, %c0_19, %c0_20] : memref<1x9x16xbf16, #tpu.memory_space<vmem>>, vector<1x1x8xbf16>
    %46 = vector.shape_cast %45 : vector<1x1x8xbf16> to vector<1x8xbf16>
    %47 = vector.shape_cast %44 : vector<1x8xbf16> to vector<1x1x8xbf16>
    tpu.vector_store %arg2[%c0_18, %c0_19, %c0_20], %47 {strides = array<i32>} : memref<1x9x16xbf16, #tpu.memory_space<vmem>>, vector<1x1x8xbf16>,
    %48 = vector.extract_strided_slice %10 {offsets = [0, 0], sizes = [4, 8], strides = [1, 1]} : vector<8x8xbf16> to vector<4x8xbf16>
    %49 = vector.extract_strided_slice %12 {offsets = [0, 0], sizes = [4, 8], strides = [1, 1]} : vector<8x8xbf16> to vector<4x8xbf16>
    %50 = vector.extract_strided_slice %14 {offsets = [0, 0], sizes = [4, 8], strides = [1, 1]} : vector<8x8xbf16> to vector<4x8xbf16>
    "tpu.trace_start"() <{level = 10 : i32, message = "id,jd->ij"}> : () -> ()
    %cst_21 = arith.constant dense<0.000000e+00> : vector<4x4xf32>
    %51 = tpu.matmul %48, %49, %cst_21 {dimension_numbers = #tpu.dot_dimension_numbers<[1], [1], [0], [0], [0, 0, 1, 0], [], []>} : vector<4x8xbf16>, vector<4x8xbf16>, vector<4x4xf32> -> vector<4x4xf32>
    "tpu.trace_stop"() : () -> ()
    %52 = arith.extf %48 : vector<4x8xbf16> to vector<4x8xf32>
    %53 = vector.broadcast %5 : vector<1x8xf32> to vector<4x8xf32>
    %54 = arith.mulf %52, %53 : vector<4x8xf32>
    %cst_22 = arith.constant dense<0.000000e+00> : vector<4xf32>
    %55 = vector.multi_reduction <add>, %54, %cst_22 [1] : vector<4x8xf32> to vector<4xf32>
    %56 = vector.shape_cast %55 : vector<4xf32> to vector<4x1xf32>
    %cst_23 = arith.constant dense<0xFF800000> : vector<4xf32>
    %57 = vector.multi_reduction <maximumf>, %51, %cst_23 [1] : vector<4x4xf32> to vector<4xf32>
    %58 = vector.shape_cast %57 : vector<4xf32> to vector<4x1xf32>
    %59 = arith.maximumf %58, %56 : vector<4x1xf32>
    %60 = vector.broadcast %59 : vector<4x1xf32> to vector<4x4xf32>
    %61 = arith.subf %51, %60 : vector<4x4xf32>
    %62 = math.exp %61 : vector<4x4xf32>
    %63 = arith.subf %56, %59 : vector<4x1xf32>
    %64 = math.exp %63 : vector<4x1xf32>
    %cst_24 = arith.constant dense<0.000000e+00> : vector<4xf32>
    %65 = vector.multi_reduction <add>, %62, %cst_24 [1] : vector<4x4xf32> to vector<4xf32>
    %66 = vector.shape_cast %65 : vector<4xf32> to vector<4x1xf32>
    %67 = arith.addf %66, %64 : vector<4x1xf32>
    %68 = arith.truncf %62 : vector<4x4xf32> to vector<4x4xbf16>
    "tpu.trace_start"() <{level = 10 : i32, message = "ij,jd->id"}> : () -> ()
    %cst_25 = arith.constant dense<0.000000e+00> : vector<4x8xf32>
    %69 = tpu.matmul %68, %50, %cst_25 {dimension_numbers = #tpu.dot_dimension_numbers<[1], [0], [0], [1], [0, 0, 1, 1], [], []>} : vector<4x4xbf16>, vector<4x8xbf16>, vector<4x8xf32> -> vector<4x8xf32>
    "tpu.trace_stop"() : () -> ()
    %70 = vector.broadcast %64 : vector<4x1xf32> to vector<4x8xf32>
    %71 = vector.broadcast %8 : vector<1x8xf32> to vector<4x8xf32>
    %72 = arith.mulf %70, %71 : vector<4x8xf32>
    %73 = arith.addf %69, %72 : vector<4x8xf32>
    %74 = vector.broadcast %67 : vector<4x1xf32> to vector<4x8xf32>
    %75 = arith.divf %73, %74 : vector<4x8xf32>
    %76 = arith.truncf %75 : vector<4x8xf32> to vector<4x8xbf16>
    %c0_26 = arith.constant 0 : index
    %c1_27 = arith.constant 1 : index
    %c0_28 = arith.constant 0 : index
    %77 = vector.load %arg2[%c0_26, %c1_27, %c0_28] : memref<1x9x16xbf16, #tpu.memory_space<vmem>>, vector<1x4x8xbf16>
    %78 = vector.shape_cast %77 : vector<1x4x8xbf16> to vector<4x8xbf16>
    %79 = vector.shape_cast %76 : vector<4x8xbf16> to vector<1x4x8xbf16>
    tpu.vector_store %arg2[%c0_26, %c1_27, %c0_28], %79 {strides = array<i32>} : memref<1x9x16xbf16, #tpu.memory_space<vmem>>, vector<1x4x8xbf16>,
    %80 = vector.extract_strided_slice %10 {offsets = [4, 0], sizes = [4, 8], strides = [1, 1]} : vector<8x8xbf16> to vector<4x8xbf16>
    %81 = vector.extract_strided_slice %12 {offsets = [4, 0], sizes = [4, 8], strides = [1, 1]} : vector<8x8xbf16> to vector<4x8xbf16>
    %82 = vector.extract_strided_slice %14 {offsets = [4, 0], sizes = [4, 8], strides = [1, 1]} : vector<8x8xbf16> to vector<4x8xbf16>
    "tpu.trace_start"() <{level = 10 : i32, message = "id,jd->ij"}> : () -> ()
    %cst_29 = arith.constant dense<0.000000e+00> : vector<4x4xf32>
    %83 = tpu.matmul %80, %81, %cst_29 {dimension_numbers = #tpu.dot_dimension_numbers<[1], [1], [0], [0], [0, 0, 1, 0], [], []>} : vector<4x8xbf16>, vector<4x8xbf16>, vector<4x4xf32> -> vector<4x4xf32>
    "tpu.trace_stop"() : () -> ()
    %84 = arith.extf %80 : vector<4x8xbf16> to vector<4x8xf32>
    %85 = vector.broadcast %5 : vector<1x8xf32> to vector<4x8xf32>
    %86 = arith.mulf %84, %85 : vector<4x8xf32>
    %cst_30 = arith.constant dense<0.000000e+00> : vector<4xf32>
    %87 = vector.multi_reduction <add>, %86, %cst_30 [1] : vector<4x8xf32> to vector<4xf32>
    %88 = vector.shape_cast %87 : vector<4xf32> to vector<4x1xf32>
    %cst_31 = arith.constant dense<0xFF800000> : vector<4xf32>
    %89 = vector.multi_reduction <maximumf>, %83, %cst_31 [1] : vector<4x4xf32> to vector<4xf32>
    %90 = vector.shape_cast %89 : vector<4xf32> to vector<4x1xf32>
    %91 = arith.maximumf %90, %88 : vector<4x1xf32>
    %92 = vector.broadcast %91 : vector<4x1xf32> to vector<4x4xf32>
    %93 = arith.subf %83, %92 : vector<4x4xf32>
    %94 = math.exp %93 : vector<4x4xf32>
    %95 = arith.subf %88, %91 : vector<4x1xf32>
    %96 = math.exp %95 : vector<4x1xf32>
    %cst_32 = arith.constant dense<0.000000e+00> : vector<4xf32>
    %97 = vector.multi_reduction <add>, %94, %cst_32 [1] : vector<4x4xf32> to vector<4xf32>
    %98 = vector.shape_cast %97 : vector<4xf32> to vector<4x1xf32>
    %99 = arith.addf %98, %96 : vector<4x1xf32>
    %100 = arith.truncf %94 : vector<4x4xf32> to vector<4x4xbf16>
    "tpu.trace_start"() <{level = 10 : i32, message = "ij,jd->id"}> : () -> ()
    %cst_33 = arith.constant dense<0.000000e+00> : vector<4x8xf32>
    %101 = tpu.matmul %100, %82, %cst_33 {dimension_numbers = #tpu.dot_dimension_numbers<[1], [0], [0], [1], [0, 0, 1, 1], [], []>} : vector<4x4xbf16>, vector<4x8xbf16>, vector<4x8xf32> -> vector<4x8xf32>
    "tpu.trace_stop"() : () -> ()
    %102 = vector.broadcast %96 : vector<4x1xf32> to vector<4x8xf32>
    %103 = vector.broadcast %8 : vector<1x8xf32> to vector<4x8xf32>
    %104 = arith.mulf %102, %103 : vector<4x8xf32>
    %105 = arith.addf %101, %104 : vector<4x8xf32>
    %106 = vector.broadcast %99 : vector<4x1xf32> to vector<4x8xf32>
    %107 = arith.divf %105, %106 : vector<4x8xf32>
    %108 = arith.truncf %107 : vector<4x8xf32> to vector<4x8xbf16>
    %c0_34 = arith.constant 0 : index
    %c5 = arith.constant 5 : index
    %c0_35 = arith.constant 0 : index
    %109 = vector.load %arg2[%c0_34, %c5, %c0_35] : memref<1x9x16xbf16, #tpu.memory_space<vmem>>, vector<1x4x8xbf16>
    %110 = vector.shape_cast %109 : vector<1x4x8xbf16> to vector<4x8xbf16>
    %111 = vector.shape_cast %108 : vector<4x8xbf16> to vector<1x4x8xbf16>
    tpu.vector_store %arg2[%c0_34, %c5, %c0_35], %111 {strides = array<i32>} : memref<1x9x16xbf16, #tpu.memory_space<vmem>>, vector<1x4x8xbf16>,
    %c0_36 = arith.constant 0 : index
    %c0_37 = arith.constant 0 : index
    %c8 = arith.constant 8 : index
    %112 = vector.load %arg1[%c0_36, %c0_37, %c8] : memref<1x9x48xbf16, #tpu.memory_space<vmem>>, vector<1x1x8xbf16>
    %113 = vector.shape_cast %112 : vector<1x1x8xbf16> to vector<1x8xbf16>
    %114 = arith.extf %113 : vector<1x8xbf16> to vector<1x8xf32>
    %c0_38 = arith.constant 0 : index
    %c0_39 = arith.constant 0 : index
    %c24 = arith.constant 24 : index
    %115 = vector.load %arg1[%c0_38, %c0_39, %c24] : memref<1x9x48xbf16, #tpu.memory_space<vmem>>, vector<1x1x8xbf16>
    %116 = vector.shape_cast %115 : vector<1x1x8xbf16> to vector<1x8xbf16>
    %117 = arith.extf %116 : vector<1x8xbf16> to vector<1x8xf32>
    %c0_40 = arith.constant 0 : index
    %c0_41 = arith.constant 0 : index
    %c40 = arith.constant 40 : index
    %118 = vector.load %arg1[%c0_40, %c0_41, %c40] : memref<1x9x48xbf16, #tpu.memory_space<vmem>>, vector<1x1x8xbf16>
    %119 = vector.shape_cast %118 : vector<1x1x8xbf16> to vector<1x8xbf16>
    %120 = arith.extf %119 : vector<1x8xbf16> to vector<1x8xf32>
    %c0_42 = arith.constant 0 : index
    %c1_43 = arith.constant 1 : index
    %c8_44 = arith.constant 8 : index
    %121 = vector.load %arg1[%c0_42, %c1_43, %c8_44] : memref<1x9x48xbf16, #tpu.memory_space<vmem>>, vector<1x8x8xbf16>
    %122 = vector.shape_cast %121 : vector<1x8x8xbf16> to vector<8x8xbf16>
    %c0_45 = arith.constant 0 : index
    %c1_46 = arith.constant 1 : index
    %c24_47 = arith.constant 24 : index
    %123 = vector.load %arg1[%c0_45, %c1_46, %c24_47] : memref<1x9x48xbf16, #tpu.memory_space<vmem>>, vector<1x8x8xbf16>
    %124 = vector.shape_cast %123 : vector<1x8x8xbf16> to vector<8x8xbf16>
    %c0_48 = arith.constant 0 : index
    %c1_49 = arith.constant 1 : index
    %c40_50 = arith.constant 40 : index
    %125 = vector.load %arg1[%c0_48, %c1_49, %c40_50] : memref<1x9x48xbf16, #tpu.memory_space<vmem>>, vector<1x8x8xbf16>
    %126 = vector.shape_cast %125 : vector<1x8x8xbf16> to vector<8x8xbf16>
    %127 = arith.extf %124 : vector<8x8xbf16> to vector<8x8xf32>
    %128 = arith.extf %126 : vector<8x8xbf16> to vector<8x8xf32>
    %129 = vector.broadcast %114 : vector<1x8xf32> to vector<8x8xf32>
    %130 = arith.mulf %127, %129 : vector<8x8xf32>
    %cst_51 = arith.constant dense<0.000000e+00> : vector<8xf32>
    %131 = vector.multi_reduction <add>, %130, %cst_51 [1] : vector<8x8xf32> to vector<8xf32>
    %132 = vector.shape_cast %131 : vector<8xf32> to vector<8x1xf32>
    %133 = arith.mulf %114, %117 : vector<1x8xf32>
    %cst_52 = arith.constant dense<0.000000e+00> : vector<1xf32>
    %134 = vector.multi_reduction <add>, %133, %cst_52 [1] : vector<1x8xf32> to vector<1xf32>
    %135 = vector.shape_cast %134 : vector<1xf32> to vector<1x1xf32>
    %cst_53 = arith.constant dense<0xFF800000> : vector<1xf32>
    %136 = vector.multi_reduction <maximumf>, %132, %cst_53 [0] : vector<8x1xf32> to vector<1xf32>
    %137 = vector.shape_cast %136 : vector<1xf32> to vector<1x1xf32>
    %138 = arith.maximumf %137, %135 : vector<1x1xf32>
    %139 = vector.broadcast %138 : vector<1x1xf32> to vector<8x1xf32>
    %140 = arith.subf %132, %139 : vector<8x1xf32>
    %141 = math.exp %140 : vector<8x1xf32>
    %142 = arith.subf %135, %138 : vector<1x1xf32>
    %143 = math.exp %142 : vector<1x1xf32>
    %cst_54 = arith.constant dense<0.000000e+00> : vector<1xf32>
    %144 = vector.multi_reduction <add>, %141, %cst_54 [0] : vector<8x1xf32> to vector<1xf32>
    %145 = vector.shape_cast %144 : vector<1xf32> to vector<1x1xf32>
    %146 = arith.addf %145, %143 : vector<1x1xf32>
    %147 = vector.broadcast %141 : vector<8x1xf32> to vector<8x8xf32>
    %148 = arith.mulf %147, %128 : vector<8x8xf32>
    %cst_55 = arith.constant dense<0.000000e+00> : vector<8xf32>
    %149 = vector.multi_reduction <add>, %148, %cst_55 [0] : vector<8x8xf32> to vector<8xf32>
    %150 = vector.shape_cast %149 : vector<8xf32> to vector<1x8xf32>
    %151 = vector.broadcast %143 : vector<1x1xf32> to vector<1x8xf32>
    %152 = arith.mulf %151, %120 : vector<1x8xf32>
    %153 = arith.addf %150, %152 : vector<1x8xf32>
    %154 = vector.broadcast %146 : vector<1x1xf32> to vector<1x8xf32>
    %155 = arith.divf %153, %154 : vector<1x8xf32>
    %156 = arith.truncf %155 : vector<1x8xf32> to vector<1x8xbf16>
    %c0_56 = arith.constant 0 : index
    %c0_57 = arith.constant 0 : index
    %c8_58 = arith.constant 8 : index
    %157 = vector.load %arg2[%c0_56, %c0_57, %c8_58] : memref<1x9x16xbf16, #tpu.memory_space<vmem>>, vector<1x1x8xbf16>
    %158 = vector.shape_cast %157 : vector<1x1x8xbf16> to vector<1x8xbf16>
    %159 = vector.shape_cast %156 : vector<1x8xbf16> to vector<1x1x8xbf16>
    tpu.vector_store %arg2[%c0_56, %c0_57, %c8_58], %159 {strides = array<i32>} : memref<1x9x16xbf16, #tpu.memory_space<vmem>>, vector<1x1x8xbf16>,
    %160 = vector.extract_strided_slice %122 {offsets = [0, 0], sizes = [4, 8], strides = [1, 1]} : vector<8x8xbf16> to vector<4x8xbf16>
    %161 = vector.extract_strided_slice %124 {offsets = [0, 0], sizes = [4, 8], strides = [1, 1]} : vector<8x8xbf16> to vector<4x8xbf16>
    %162 = vector.extract_strided_slice %126 {offsets = [0, 0], sizes = [4, 8], strides = [1, 1]} : vector<8x8xbf16> to vector<4x8xbf16>
    "tpu.trace_start"() <{level = 10 : i32, message = "id,jd->ij"}> : () -> ()
    %cst_59 = arith.constant dense<0.000000e+00> : vector<4x4xf32>
    %163 = tpu.matmul %160, %161, %cst_59 {dimension_numbers = #tpu.dot_dimension_numbers<[1], [1], [0], [0], [0, 0, 1, 0], [], []>} : vector<4x8xbf16>, vector<4x8xbf16>, vector<4x4xf32> -> vector<4x4xf32>
    "tpu.trace_stop"() : () -> ()
    %164 = arith.extf %160 : vector<4x8xbf16> to vector<4x8xf32>
    %165 = vector.broadcast %117 : vector<1x8xf32> to vector<4x8xf32>
    %166 = arith.mulf %164, %165 : vector<4x8xf32>
    %cst_60 = arith.constant dense<0.000000e+00> : vector<4xf32>
    %167 = vector.multi_reduction <add>, %166, %cst_60 [1] : vector<4x8xf32> to vector<4xf32>
    %168 = vector.shape_cast %167 : vector<4xf32> to vector<4x1xf32>
    %cst_61 = arith.constant dense<0xFF800000> : vector<4xf32>
    %169 = vector.multi_reduction <maximumf>, %163, %cst_61 [1] : vector<4x4xf32> to vector<4xf32>
    %170 = vector.shape_cast %169 : vector<4xf32> to vector<4x1xf32>
    %171 = arith.maximumf %170, %168 : vector<4x1xf32>
    %172 = vector.broadcast %171 : vector<4x1xf32> to vector<4x4xf32>
    %173 = arith.subf %163, %172 : vector<4x4xf32>
    %174 = math.exp %173 : vector<4x4xf32>
    %175 = arith.subf %168, %171 : vector<4x1xf32>
    %176 = math.exp %175 : vector<4x1xf32>
    %cst_62 = arith.constant dense<0.000000e+00> : vector<4xf32>
    %177 = vector.multi_reduction <add>, %174, %cst_62 [1] : vector<4x4xf32> to vector<4xf32>
    %178 = vector.shape_cast %177 : vector<4xf32> to vector<4x1xf32>
    %179 = arith.addf %178, %176 : vector<4x1xf32>
    %180 = arith.truncf %174 : vector<4x4xf32> to vector<4x4xbf16>
    "tpu.trace_start"() <{level = 10 : i32, message = "ij,jd->id"}> : () -> ()
    %cst_63 = arith.constant dense<0.000000e+00> : vector<4x8xf32>
    %181 = tpu.matmul %180, %162, %cst_63 {dimension_numbers = #tpu.dot_dimension_numbers<[1], [0], [0], [1], [0, 0, 1, 1], [], []>} : vector<4x4xbf16>, vector<4x8xbf16>, vector<4x8xf32> -> vector<4x8xf32>
    "tpu.trace_stop"() : () -> ()
    %182 = vector.broadcast %176 : vector<4x1xf32> to vector<4x8xf32>
    %183 = vector.broadcast %120 : vector<1x8xf32> to vector<4x8xf32>
    %184 = arith.mulf %182, %183 : vector<4x8xf32>
    %185 = arith.addf %181, %184 : vector<4x8xf32>
    %186 = vector.broadcast %179 : vector<4x1xf32> to vector<4x8xf32>
    %187 = arith.divf %185, %186 : vector<4x8xf32>
    %188 = arith.truncf %187 : vector<4x8xf32> to vector<4x8xbf16>
    %c0_64 = arith.constant 0 : index
    %c1_65 = arith.constant 1 : index
    %c8_66 = arith.constant 8 : index
    %189 = vector.load %arg2[%c0_64, %c1_65, %c8_66] : memref<1x9x16xbf16, #tpu.memory_space<vmem>>, vector<1x4x8xbf16>
    %190 = vector.shape_cast %189 : vector<1x4x8xbf16> to vector<4x8xbf16>
    %191 = vector.shape_cast %188 : vector<4x8xbf16> to vector<1x4x8xbf16>
    tpu.vector_store %arg2[%c0_64, %c1_65, %c8_66], %191 {strides = array<i32>} : memref<1x9x16xbf16, #tpu.memory_space<vmem>>, vector<1x4x8xbf16>,
    %192 = vector.extract_strided_slice %122 {offsets = [4, 0], sizes = [4, 8], strides = [1, 1]} : vector<8x8xbf16> to vector<4x8xbf16>
    %193 = vector.extract_strided_slice %124 {offsets = [4, 0], sizes = [4, 8], strides = [1, 1]} : vector<8x8xbf16> to vector<4x8xbf16>
    %194 = vector.extract_strided_slice %126 {offsets = [4, 0], sizes = [4, 8], strides = [1, 1]} : vector<8x8xbf16> to vector<4x8xbf16>
    "tpu.trace_start"() <{level = 10 : i32, message = "id,jd->ij"}> : () -> ()
    %cst_67 = arith.constant dense<0.000000e+00> : vector<4x4xf32>
    %195 = tpu.matmul %192, %193, %cst_67 {dimension_numbers = #tpu.dot_dimension_numbers<[1], [1], [0], [0], [0, 0, 1, 0], [], []>} : vector<4x8xbf16>, vector<4x8xbf16>, vector<4x4xf32> -> vector<4x4xf32>
    "tpu.trace_stop"() : () -> ()
    %196 = arith.extf %192 : vector<4x8xbf16> to vector<4x8xf32>
    %197 = vector.broadcast %117 : vector<1x8xf32> to vector<4x8xf32>
    %198 = arith.mulf %196, %197 : vector<4x8xf32>
    %cst_68 = arith.constant dense<0.000000e+00> : vector<4xf32>
    %199 = vector.multi_reduction <add>, %198, %cst_68 [1] : vector<4x8xf32> to vector<4xf32>
    %200 = vector.shape_cast %199 : vector<4xf32> to vector<4x1xf32>
    %cst_69 = arith.constant dense<0xFF800000> : vector<4xf32>
    %201 = vector.multi_reduction <maximumf>, %195, %cst_69 [1] : vector<4x4xf32> to vector<4xf32>
    %202 = vector.shape_cast %201 : vector<4xf32> to vector<4x1xf32>
    %203 = arith.maximumf %202, %200 : vector<4x1xf32>
    %204 = vector.broadcast %203 : vector<4x1xf32> to vector<4x4xf32>
    %205 = arith.subf %195, %204 : vector<4x4xf32>
    %206 = math.exp %205 : vector<4x4xf32>
    %207 = arith.subf %200, %203 : vector<4x1xf32>
    %208 = math.exp %207 : vector<4x1xf32>
    %cst_70 = arith.constant dense<0.000000e+00> : vector<4xf32>
    %209 = vector.multi_reduction <add>, %206, %cst_70 [1] : vector<4x4xf32> to vector<4xf32>
    %210 = vector.shape_cast %209 : vector<4xf32> to vector<4x1xf32>
    %211 = arith.addf %210, %208 : vector<4x1xf32>
    %212 = arith.truncf %206 : vector<4x4xf32> to vector<4x4xbf16>
    "tpu.trace_start"() <{level = 10 : i32, message = "ij,jd->id"}> : () -> ()
    %cst_71 = arith.constant dense<0.000000e+00> : vector<4x8xf32>
    %213 = tpu.matmul %212, %194, %cst_71 {dimension_numbers = #tpu.dot_dimension_numbers<[1], [0], [0], [1], [0, 0, 1, 1], [], []>} : vector<4x4xbf16>, vector<4x8xbf16>, vector<4x8xf32> -> vector<4x8xf32>
    "tpu.trace_stop"() : () -> ()
    %214 = vector.broadcast %208 : vector<4x1xf32> to vector<4x8xf32>
    %215 = vector.broadcast %120 : vector<1x8xf32> to vector<4x8xf32>
    %216 = arith.mulf %214, %215 : vector<4x8xf32>
    %217 = arith.addf %213, %216 : vector<4x8xf32>
    %218 = vector.broadcast %211 : vector<4x1xf32> to vector<4x8xf32>
    %219 = arith.divf %217, %218 : vector<4x8xf32>
    %220 = arith.truncf %219 : vector<4x8xf32> to vector<4x8xbf16>
    %c0_72 = arith.constant 0 : index
    %c5_73 = arith.constant 5 : index
    %c8_74 = arith.constant 8 : index
    %221 = vector.load %arg2[%c0_72, %c5_73, %c8_74] : memref<1x9x16xbf16, #tpu.memory_space<vmem>>, vector<1x4x8xbf16>
    %222 = vector.shape_cast %221 : vector<1x4x8xbf16> to vector<4x8xbf16>
    %223 = vector.shape_cast %220 : vector<4x8xbf16> to vector<1x4x8xbf16>
    tpu.vector_store %arg2[%c0_72, %c5_73, %c8_74], %223 {strides = array<i32>} : memref<1x9x16xbf16, #tpu.memory_space<vmem>>, vector<1x4x8xbf16>,
    return
  }
  func.func @transform_0(%arg0: i32) -> (i32, i32, i32) {
    %c0_i32 = arith.constant 0 : i32
    %c0_i32_0 = arith.constant 0 : i32
    %c0_i32_1 = arith.constant 0 : i32
    return %arg0, %c0_i32, %c0_i32_0 : i32, i32, i32
  }
  func.func @transform_1(%arg0: i32) -> (i32, i32, i32) {
    %c0_i32 = arith.constant 0 : i32
    %c0_i32_0 = arith.constant 0 : i32
    %c0_i32_1 = arith.constant 0 : i32
    return %arg0, %c0_i32, %c0_i32_0 : i32, i32, i32
  }
}

module attributes {stable_mosaic.version = 11 : i64} {
  func.func @_matmul_kernel(%arg0: i32, %arg1: i32, %arg2: i32, %arg3: memref<32x128xbf16, #tpu.memory_space<vmem>>, %arg4: memref<128x128xbf16, #tpu.memory_space<vmem>>, %arg5: memref<1x128xbf16, #tpu.memory_space<vmem>>, %arg6: memref<32x128xbf16, #tpu.memory_space<vmem>>, %arg7: memref<32x128xbf16, #tpu.memory_space<vmem>>, %arg8: memref<32x128xf32, #tpu.memory_space<vmem>>) attributes {dimension_semantics = [#tpu.dimension_semantics<parallel>, #tpu.dimension_semantics<parallel>, #tpu.dimension_semantics<arbitrary>], iteration_bounds = array<i64: 1, 1, 1>, scalar_prefetch = 0 : i64, scratch_operands = 1 : i64, tpu.core_type = #tpu.core_type<tc>, window_params = [{transform_indices = @transform_0, window_bounds = array<i64: 32, 128>}, {transform_indices = @transform_1, window_bounds = array<i64: 128, 128>}, {transform_indices = @transform_2, window_bounds = array<i64: 1, 128>}, {transform_indices = @transform_3, window_bounds = array<i64: 32, 128>}, {transform_indices = @transform_4, window_bounds = array<i64: 32, 128>}]} {
    %c0_i32 = arith.constant 0 : i32
    %0 = arith.cmpi eq, %arg2, %c0_i32 : i32
    %1 = arith.extui %0 : i1 to i32
    %c0_i32_0 = arith.constant 0 : i32
    %2 = arith.cmpi ne, %1, %c0_i32_0 : i32
    scf.if %2 {
      %cst_10 = arith.constant 0.000000e+00 : f32
      %12 = vector.broadcast %cst_10 : f32 to vector<32x128xf32>
      %c0_11 = arith.constant 0 : index
      %c0_12 = arith.constant 0 : index
      %13 = vector.load %arg8[%c0_11, %c0_12] : memref<32x128xf32, #tpu.memory_space<vmem>>, vector<32x128xf32>
      tpu.vector_store %arg8[%c0_11, %c0_12], %12 {strides = array<i32>} : memref<32x128xf32, #tpu.memory_space<vmem>>, vector<32x128xf32>,
    } else {
    }
    %c0 = arith.constant 0 : index
    %c0_1 = arith.constant 0 : index
    %3 = vector.load %arg3[%c0, %c0_1] : memref<32x128xbf16, #tpu.memory_space<vmem>>, vector<32x128xbf16>
    %c0_2 = arith.constant 0 : index
    %c0_3 = arith.constant 0 : index
    %4 = vector.load %arg8[%c0_2, %c0_3] : memref<32x128xf32, #tpu.memory_space<vmem>>, vector<32x128xf32>
    %c0_4 = arith.constant 0 : index
    %c0_5 = arith.constant 0 : index
    %5 = vector.load %arg4[%c0_4, %c0_5] : memref<128x128xbf16, #tpu.memory_space<vmem>>, vector<128x128xbf16>
    %cst = arith.constant dense<0.000000e+00> : vector<32x128xf32>
    %6 = tpu.matmul %3, %5, %cst {dimension_numbers = #tpu.dot_dimension_numbers<[1], [0], [0], [1], [0, 0, 1, 1], [], []>} : vector<32x128xbf16>, vector<128x128xbf16>, vector<32x128xf32> -> vector<32x128xf32>
    %7 = arith.addf %4, %6 : vector<32x128xf32>
    %c0_6 = arith.constant 0 : index
    %c0_7 = arith.constant 0 : index
    %8 = vector.load %arg8[%c0_6, %c0_7] : memref<32x128xf32, #tpu.memory_space<vmem>>, vector<32x128xf32>
    tpu.vector_store %arg8[%c0_6, %c0_7], %7 {strides = array<i32>} : memref<32x128xf32, #tpu.memory_space<vmem>>, vector<32x128xf32>,
    %c0_i32_8 = arith.constant 0 : i32
    %9 = arith.cmpi eq, %arg2, %c0_i32_8 : i32
    %10 = arith.extui %9 : i1 to i32
    %c0_i32_9 = arith.constant 0 : i32
    %11 = arith.cmpi ne, %10, %c0_i32_9 : i32
    scf.if %11 {
      %c0_10 = arith.constant 0 : index
      %c0_11 = arith.constant 0 : index
      %12 = vector.load %arg8[%c0_10, %c0_11] : memref<32x128xf32, #tpu.memory_space<vmem>>, vector<32x128xf32>
      %c0_12 = arith.constant 0 : index
      %c0_13 = arith.constant 0 : index
      %13 = vector.load %arg5[%c0_12, %c0_13] : memref<1x128xbf16, #tpu.memory_space<vmem>>, vector<1x128xbf16>
      %14 = arith.extf %13 : vector<1x128xbf16> to vector<1x128xf32>
      %15 = vector.broadcast %14 : vector<1x128xf32> to vector<32x128xf32>
      %16 = arith.addf %12, %15 : vector<32x128xf32>
      %c0_14 = arith.constant 0 : index
      %c0_15 = arith.constant 0 : index
      %17 = vector.load %arg6[%c0_14, %c0_15] : memref<32x128xbf16, #tpu.memory_space<vmem>>, vector<32x128xbf16>
      %18 = arith.extf %17 : vector<32x128xbf16> to vector<32x128xf32>
      %19 = arith.addf %16, %18 : vector<32x128xf32>
      %20 = arith.truncf %19 : vector<32x128xf32> to vector<32x128xbf16>
      %c0_16 = arith.constant 0 : index
      %c0_17 = arith.constant 0 : index
      %21 = vector.load %arg7[%c0_16, %c0_17] : memref<32x128xbf16, #tpu.memory_space<vmem>>, vector<32x128xbf16>
      tpu.vector_store %arg7[%c0_16, %c0_17], %20 {strides = array<i32>} : memref<32x128xbf16, #tpu.memory_space<vmem>>, vector<32x128xbf16>,
    } else {
    }
    return
  }
  func.func @transform_0(%arg0: i32, %arg1: i32, %arg2: i32) -> (i32, i32) {
    %c0_i32 = arith.constant 0 : i32
    return %arg0, %arg2 : i32, i32
  }
  func.func @transform_1(%arg0: i32, %arg1: i32, %arg2: i32) -> (i32, i32) {
    %c0_i32 = arith.constant 0 : i32
    return %arg2, %arg1 : i32, i32
  }
  func.func @transform_2(%arg0: i32, %arg1: i32, %arg2: i32) -> (i32, i32) {
    %c0_i32 = arith.constant 0 : i32
    %c0_i32_0 = arith.constant 0 : i32
    return %c0_i32, %arg1 : i32, i32
  }
  func.func @transform_3(%arg0: i32, %arg1: i32, %arg2: i32) -> (i32, i32) {
    %c0_i32 = arith.constant 0 : i32
    return %arg0, %arg1 : i32, i32
  }
  func.func @transform_4(%arg0: i32, %arg1: i32, %arg2: i32) -> (i32, i32) {
    %c0_i32 = arith.constant 0 : i32
    return %arg0, %arg1 : i32, i32
  }
}

module attributes {stable_mosaic.version = 11 : i64} {
  func.func @_matmul_kernel(%arg0: i32, %arg1: i32, %arg2: i32, %arg3: memref<32x32xbf16, #tpu.memory_space<vmem>>, %arg4: memref<1x32xbf16, #tpu.memory_space<vmem>>, %arg5: memref<1x32xbf16, #tpu.memory_space<vmem>>, %arg6: memref<32x128xbf16, #tpu.memory_space<vmem>>, %arg7: memref<1x128xbf16, #tpu.memory_space<vmem>>, %arg8: memref<32x128xbf16, #tpu.memory_space<vmem>>, %arg9: memref<32x128xf32, #tpu.memory_space<vmem>>, %arg10: memref<32x32xbf16, #tpu.memory_space<vmem>>) attributes {dimension_semantics = [#tpu.dimension_semantics<parallel>, #tpu.dimension_semantics<arbitrary>, #tpu.dimension_semantics<arbitrary>], iteration_bounds = array<i64: 1, 1, 1>, scalar_prefetch = 0 : i64, scratch_operands = 2 : i64, tpu.core_type = #tpu.core_type<tc>, window_params = [{transform_indices = @transform_0, window_bounds = array<i64: 32, 32>}, {transform_indices = @transform_1, window_bounds = array<i64: 1, 32>}, {transform_indices = @transform_2, window_bounds = array<i64: 1, 32>}, {transform_indices = @transform_3, window_bounds = array<i64: 32, 128>}, {transform_indices = @transform_4, window_bounds = array<i64: 1, 128>}, {transform_indices = @transform_5, window_bounds = array<i64: 32, 128>}]} {
    %c0_i32 = arith.constant 0 : i32
    %0 = arith.cmpi eq, %arg2, %c0_i32 : i32
    %1 = arith.extui %0 : i1 to i32
    %c0_i32_0 = arith.constant 0 : i32
    %2 = arith.cmpi ne, %1, %c0_i32_0 : i32
    scf.if %2 {
      %cst_12 = arith.constant 0.000000e+00 : f32
      %15 = vector.broadcast %cst_12 : f32 to vector<32x128xf32>
      %c0_13 = arith.constant 0 : index
      %c0_14 = arith.constant 0 : index
      %16 = vector.load %arg9[%c0_13, %c0_14] : memref<32x128xf32, #tpu.memory_space<vmem>>, vector<32x128xf32>
      tpu.vector_store %arg9[%c0_13, %c0_14], %15 {strides = array<i32>} : memref<32x128xf32, #tpu.memory_space<vmem>>, vector<32x128xf32>,
    } else {
    }
    %c0_i32_1 = arith.constant 0 : i32
    %3 = arith.cmpi eq, %arg1, %c0_i32_1 : i32
    %4 = arith.extui %3 : i1 to i32
    %c0_i32_2 = arith.constant 0 : i32
    %5 = arith.cmpi ne, %4, %c0_i32_2 : i32
    scf.if %5 {
      %c0_12 = arith.constant 0 : index
      %c0_13 = arith.constant 0 : index
      %15 = vector.load %arg3[%c0_12, %c0_13] : memref<32x32xbf16, #tpu.memory_space<vmem>>, vector<32x32xbf16>
      %16 = arith.extf %15 : vector<32x32xbf16> to vector<32x32xf32>
      %cst_14 = arith.constant dense<0.000000e+00> : vector<32xf32>
      %17 = vector.multi_reduction <add>, %16, %cst_14 [1] : vector<32x32xf32> to vector<32xf32>
      %18 = vector.shape_cast %17 : vector<32xf32> to vector<32x1xf32>
      %cst_15 = arith.constant 3.200000e+01 : f32
      %19 = vector.broadcast %cst_15 : f32 to vector<32x1xf32>
      %20 = arith.divf %18, %19 : vector<32x1xf32>
      %21 = vector.broadcast %20 : vector<32x1xf32> to vector<32x32xf32>
      %22 = arith.subf %16, %21 : vector<32x32xf32>
      %23 = arith.mulf %22, %22 : vector<32x32xf32>
      %cst_16 = arith.constant dense<0.000000e+00> : vector<32xf32>
      %24 = vector.multi_reduction <add>, %23, %cst_16 [1] : vector<32x32xf32> to vector<32xf32>
      %25 = vector.shape_cast %24 : vector<32xf32> to vector<32x1xf32>
      %cst_17 = arith.constant 3.200000e+01 : f32
      %26 = vector.broadcast %cst_17 : f32 to vector<32x1xf32>
      %27 = arith.divf %25, %26 : vector<32x1xf32>
      %28 = vector.broadcast %20 : vector<32x1xf32> to vector<32x32xf32>
      %29 = arith.subf %16, %28 : vector<32x32xf32>
      %cst_18 = arith.constant 9.99999974E-6 : f32
      %30 = vector.broadcast %cst_18 : f32 to vector<32x1xf32>
      %31 = arith.addf %27, %30 : vector<32x1xf32>
      %32 = math.rsqrt %31 : vector<32x1xf32>
      %33 = vector.broadcast %32 : vector<32x1xf32> to vector<32x32xf32>
      %34 = arith.mulf %29, %33 : vector<32x32xf32>
      %c0_19 = arith.constant 0 : index
      %c0_20 = arith.constant 0 : index
      %35 = vector.load %arg4[%c0_19, %c0_20] : memref<1x32xbf16, #tpu.memory_space<vmem>>, vector<1x32xbf16>
      %36 = arith.extf %35 : vector<1x32xbf16> to vector<1x32xf32>
      %37 = vector.broadcast %36 : vector<1x32xf32> to vector<32x32xf32>
      %38 = arith.mulf %34, %37 : vector<32x32xf32>
      %c0_21 = arith.constant 0 : index
      %c0_22 = arith.constant 0 : index
      %39 = vector.load %arg5[%c0_21, %c0_22] : memref<1x32xbf16, #tpu.memory_space<vmem>>, vector<1x32xbf16>
      %40 = arith.extf %39 : vector<1x32xbf16> to vector<1x32xf32>
      %41 = vector.broadcast %40 : vector<1x32xf32> to vector<32x32xf32>
      %42 = arith.addf %38, %41 : vector<32x32xf32>
      %43 = arith.truncf %42 : vector<32x32xf32> to vector<32x32xbf16>
      %c0_23 = arith.constant 0 : index
      %c0_24 = arith.constant 0 : index
      %44 = vector.load %arg10[%c0_23, %c0_24] : memref<32x32xbf16, #tpu.memory_space<vmem>>, vector<32x32xbf16>
      tpu.vector_store %arg10[%c0_23, %c0_24], %43 {strides = array<i32>} : memref<32x32xbf16, #tpu.memory_space<vmem>>, vector<32x32xbf16>,
    } else {
    }
    %c0 = arith.constant 0 : index
    %c0_3 = arith.constant 0 : index
    %6 = vector.load %arg10[%c0, %c0_3] : memref<32x32xbf16, #tpu.memory_space<vmem>>, vector<32x32xbf16>
    %c0_4 = arith.constant 0 : index
    %c0_5 = arith.constant 0 : index
    %7 = vector.load %arg9[%c0_4, %c0_5] : memref<32x128xf32, #tpu.memory_space<vmem>>, vector<32x128xf32>
    %c0_6 = arith.constant 0 : index
    %c0_7 = arith.constant 0 : index
    %8 = vector.load %arg6[%c0_6, %c0_7] : memref<32x128xbf16, #tpu.memory_space<vmem>>, vector<32x128xbf16>
    %cst = arith.constant dense<0.000000e+00> : vector<32x128xf32>
    %9 = tpu.matmul %6, %8, %cst {dimension_numbers = #tpu.dot_dimension_numbers<[1], [0], [0], [1], [0, 0, 1, 1], [], []>} : vector<32x32xbf16>, vector<32x128xbf16>, vector<32x128xf32> -> vector<32x128xf32>
    %10 = arith.addf %7, %9 : vector<32x128xf32>
    %c0_8 = arith.constant 0 : index
    %c0_9 = arith.constant 0 : index
    %11 = vector.load %arg9[%c0_8, %c0_9] : memref<32x128xf32, #tpu.memory_space<vmem>>, vector<32x128xf32>
    tpu.vector_store %arg9[%c0_8, %c0_9], %10 {strides = array<i32>} : memref<32x128xf32, #tpu.memory_space<vmem>>, vector<32x128xf32>,
    %c0_i32_10 = arith.constant 0 : i32
    %12 = arith.cmpi eq, %arg2, %c0_i32_10 : i32
    %13 = arith.extui %12 : i1 to i32
    %c0_i32_11 = arith.constant 0 : i32
    %14 = arith.cmpi ne, %13, %c0_i32_11 : i32
    scf.if %14 {
      %c0_12 = arith.constant 0 : index
      %c0_13 = arith.constant 0 : index
      %15 = vector.load %arg9[%c0_12, %c0_13] : memref<32x128xf32, #tpu.memory_space<vmem>>, vector<32x128xf32>
      %c0_14 = arith.constant 0 : index
      %c0_15 = arith.constant 0 : index
      %16 = vector.load %arg7[%c0_14, %c0_15] : memref<1x128xbf16, #tpu.memory_space<vmem>>, vector<1x128xbf16>
      %17 = arith.extf %16 : vector<1x128xbf16> to vector<1x128xf32>
      %18 = vector.broadcast %17 : vector<1x128xf32> to vector<32x128xf32>
      %19 = arith.addf %15, %18 : vector<32x128xf32>
      %20 = arith.truncf %19 : vector<32x128xf32> to vector<32x128xbf16>
      %c0_16 = arith.constant 0 : index
      %c0_17 = arith.constant 0 : index
      %21 = vector.load %arg8[%c0_16, %c0_17] : memref<32x128xbf16, #tpu.memory_space<vmem>>, vector<32x128xbf16>
      tpu.vector_store %arg8[%c0_16, %c0_17], %20 {strides = array<i32>} : memref<32x128xbf16, #tpu.memory_space<vmem>>, vector<32x128xbf16>,
    } else {
    }
    return
  }
  func.func @transform_0(%arg0: i32, %arg1: i32, %arg2: i32) -> (i32, i32) {
    %c0_i32 = arith.constant 0 : i32
    return %arg0, %arg2 : i32, i32
  }
  func.func @transform_1(%arg0: i32, %arg1: i32, %arg2: i32) -> (i32, i32) {
    %c0_i32 = arith.constant 0 : i32
    %c0_i32_0 = arith.constant 0 : i32
    return %c0_i32, %arg2 : i32, i32
  }
  func.func @transform_2(%arg0: i32, %arg1: i32, %arg2: i32) -> (i32, i32) {
    %c0_i32 = arith.constant 0 : i32
    %c0_i32_0 = arith.constant 0 : i32
    return %c0_i32, %arg2 : i32, i32
  }
  func.func @transform_3(%arg0: i32, %arg1: i32, %arg2: i32) -> (i32, i32) {
    %c0_i32 = arith.constant 0 : i32
    return %arg2, %arg1 : i32, i32
  }
  func.func @transform_4(%arg0: i32, %arg1: i32, %arg2: i32) -> (i32, i32) {
    %c0_i32 = arith.constant 0 : i32
    %c0_i32_0 = arith.constant 0 : i32
    return %c0_i32, %arg1 : i32, i32
  }
  func.func @transform_5(%arg0: i32, %arg1: i32, %arg2: i32) -> (i32, i32) {
    %c0_i32 = arith.constant 0 : i32
    return %arg0, %arg1 : i32, i32
  }
}

</mosaic_0001>

<bundles_post_ra>
// kernel: timesformer_forward.18
= control target key start
LH: loop header
LB: loop body
LE: loop exit
PB: predicated region body
PF: predicated region fallthrough
CT: control target
= control target key end

     0   :  { %vm73_vm0 = vcmask 523264   ;;  %v146_v6 = vlaneseq  ;;  %s322_s0 = inlined_call_operand.vmem [shape: bf16[16,64], index: 0, kind: input, shape index: {}]   ;;  %s323_s1 = inlined_call_operand.vmem [shape: bf16[64,32], index: 1, kind: input, shape index: {}]   ;;  %s324_s2 = inlined_call_operand.vmem [shape: bf16[1,32], index: 2, kind: input, shape index: {}]   ;;  %s325_s3 = inlined_call_operand.vmem [shape: bf16[16,32], index: 3, kind: output, shape index: {}]  }
   0x1   :  { %v272_v0 = vld [vmem:[%s323_s1 + $0x18] sm:$0xff]   ;;  %v273_v1 = vld [vmem:[%s323_s1 + $0x10] sm:$0xff]   ;;  %v274_v2 = vld [vmem:[%s323_s1 + $0x8] sm:$0xff]  }
   0x2   :  { %260 = vmatprep.subr.bf16.mxu0 %v272_v0  ;;  %v276_v3 = vld [vmem:[%s322_s0] sm:$0xff]   ;;  %v277_v5 = vld [vmem:[%s322_s0 + $0x8] sm:$0xff]   ;;  %v147_v7 = vshrl.u32 %v146_v6, 7 }
   0x3   :  { %261 = vmatpush3.bf16.msra.mxu0 %v272_v0  ;;  %268 = vmatprep.mubr.msk.bf16.mxu0 %vm73_vm0, %v276_v3  ;;  %v275_v4 = vld [vmem:[%s323_s1] sm:$0xff]  }
   0x4   :  { %262 = vmatprep.subr.bf16.mxu0 %v273_v1  ;;  %v144_v8 = vld [vmem:[%s324_s2] sm:$0x1]  ;;  %v148_v10 = vsub.s32 0, %v147_v7 }
   0x5   :  { %v145_v9 = vunpack.c.l.bf16 %v144_v8 }
   0x7   :  { %263 = vmatpush3.bf16.msra.mxu0 %v273_v1  ;;  %v149_v12 = vrot.slane %v145_v9, %v148_v10 }
   0x8   :  { %264 = vmatprep.subr.bf16.mxu0 %v274_v2 }
   0xb   :  { %265 = vmatpush3.bf16.msra.mxu0 %v274_v2 }
   0xc   :  { %266 = vmatprep.subr.bf16.mxu0 %v275_v4 }
   0xf   :  { %267 = vmatpush3.bf16.msra.mxu0 %v275_v4 }
  0x12   :  { %269 = vmatmul.mubr.msk.bf16.vlgmr.msra.gmra.mxu0 %vm73_vm0, %v277_v5 }
  0xd2   :  { %v270_v11 = vpop.f32.mrf.mxu0 }
  0xd4   :  { %v114_v13 = vpop.f32.mrf.mxu0 }
  0xd5   :  { %v150_v16 = vadd.f32 %v149_v12, %v114_v13 }
  0xd6   :  { %v271_v14 = vpop.f32.mrf.mxu0 }
  0xd8   :  { %v117_v15 = vpop.f32.mrf.mxu0 }
  0xd9   :  { %v151_v17 = vadd.f32 %v149_v12, %v117_v15 }
  0xdb   :  { %v246_v18 = vpack.c.bf16 %v151_v17, %v150_v16 }
  0xdd   :  { %247 = vst [vmem:[#allocation3] sm:$0xff] %v246_v18  }
  0xe4   :  { %v192_v19 = vld [vmem:[#allocation3] sm:$0xff]  }
  0xe5   :  { %193 = vst [vmem:[%s325_s3] sm:$0xff] %v192_v19  }

// kernel: timesformer_forward.21
= control target key start
LH: loop header
LB: loop body
LE: loop exit
PB: predicated region body
PF: predicated region fallthrough
CT: control target
= control target key end

     0   :  { %vm52_vm0 = vcmask 130048   ;;  %v125_v3 = vlaneseq  ;;  %s316_s0 = inlined_call_operand.vmem [shape: bf16[18,16], index: 0, kind: input, shape index: {}]   ;;  %s317_s1 = inlined_call_operand.vmem [shape: bf16[16,32], index: 1, kind: input, shape index: {}]   ;;  %s318_s2 = inlined_call_operand.vmem [shape: bf16[1,32], index: 2, kind: input, shape index: {}]   ;;  %s319_s3 = inlined_call_operand.vmem [shape: bf16[18,32], index: 3, kind: input, shape index: {}]   ;;  %s320_s4 = inlined_call_operand.vmem [shape: bf16[18,32], index: 4, kind: output, shape index: {}]  }
   0x1   :  { %v264_v0 = vld [vmem:[%s317_s1] sm:$0xff]   ;;  %v266_v2 = vld [vmem:[%s316_s0 + $0x8] sm:$0xff]  }
   0x2   :  { %v265_v1 = vld [vmem:[%s316_s0] sm:$0xff]   ;;  %258 = vmatprep.subr.bf16.mxu0 %v264_v0  ;;  %v126_v4 = vshrl.u32 %v125_v3, 7  ;;  %v253_v10 = vld [vmem:[%s319_s3 + $0x8] sm:$0xff]  }
   0x3   :  { %259 = vmatpush3.bf16.msra.mxu0 %v264_v0  ;;  %260 = vmatprep.mubr.msk.bf16.mxu0 %vm52_vm0, %v265_v1  ;;  %v123_v5 = vld [vmem:[%s318_s2] sm:$0x1]  ;;  %v241_v14 = vunpack.c.l.bf16 %v253_v10  ;;  %v242_v15 = vunpack.c.h.bf16 %v253_v10 }
   0x4   :  { %v124_v6 = vunpack.c.l.bf16 %v123_v5  ;;  %v127_v7 = vsub.s32 0, %v126_v4  ;;  %v236_v12 = vld [vmem:[%s319_s3] sm:$0xff]  }
   0x5   :  { %v237_v18 = vunpack.c.l.bf16 %v236_v12  ;;  %v238_v20 = vunpack.c.h.bf16 %v236_v12 }
   0x6   :  { %261 = vmatmul.mubr.msk.bf16.vlgmr.msra.gmra.mxu0 %vm52_vm0, %v266_v2  ;;  %v128_v8 = vrot.slane %v124_v6, %v127_v7 }
  0xc6   :  { %v262_v9 = vpop.f32.mrf.mxu0 }
  0xc7   :  { %v131_v13 = vadd.f32 %v262_v9, %v128_v8 }
  0xc8   :  { %v93_v11 = vpop.f32.mrf.mxu0 }
  0xc9   :  { %v129_v17 = vadd.f32 %v128_v8, %v93_v11  ;;  %v143_v22 = vadd.f32 %v241_v14, %v131_v13 }
  0xca   :  { %v263_v16 = vpop.f32.mrf.mxu0 }
  0xcb   :  { %v132_v19 = vadd.f32 %v263_v16, %v128_v8  ;;  %v141_v25 = vadd.f32 %v237_v18, %v129_v17 }
  0xcc   :  { %v96_v21 = vpop.f32.mrf.mxu0 }
  0xcd   :  { %v144_v23 = vadd.f32 %v242_v15, %v132_v19  ;;  %v130_v24 = vadd.f32 %v128_v8, %v96_v21 }
  0xcf   :  { %v251_v26 = vpack.c.bf16 %v144_v23, %v143_v22  ;;  %v142_v27 = vadd.f32 %v238_v20, %v130_v24 }
  0xd1   :  { %254 = vst [vmem:[#allocation3 + $0x8] sm:$0xff] %v251_v26   ;;  %v246_v28 = vpack.c.bf16 %v142_v27, %v141_v25 }
  0xd3   :  { %247 = vst [vmem:[#allocation3] sm:$0xff] %v246_v28  }
  0xd8   :  { %v187_v29 = vld [vmem:[#allocation3 + $0x8] sm:$0xf] }
  0xd9   :  { %188 = vst [vmem:[%s320_s4 + $0x8] sm:$0xf] %v187_v29 }
  0xda   :  { %v183_v30 = vld [vmem:[#allocation3] sm:$0xff]  }
  0xdb   :  { %184 = vst [vmem:[%s320_s4] sm:$0xff] %v183_v30  }

// kernel: timesformer_forward.19
= control target key start
LH: loop header
LB: loop body
LE: loop exit
PB: predicated region body
PF: predicated region fallthrough
CT: control target
= control target key end

     0   :  { %vm38_vm0 = vcmask 261120   ;;  %v94_v37 = vlaneseq  ;;  %vm128_vm1 = vcmask 257024   ;;  %s444_s0 = inlined_call_operand.vmem [shape: bf16[18,32], index: 0, kind: input, shape index: {}]   ;;  %s445_s1 = inlined_call_operand.vmem [shape: bf16[1,32], index: 1, kind: input, shape index: {}]   ;;  %s446_s2 = inlined_call_operand.vmem [shape: bf16[1,32], index: 2, kind: input, shape index: {}]   ;;  %s447_s3 = inlined_call_operand.vmem [shape: bf16[32,48], index: 3, kind: input, shape index: {}]   ;;  %s448_s4 = inlined_call_operand.vmem [shape: bf16[18,48], index: 4, kind: output, shape index: {}]  }
   0x1   :  { %v338_v0 = vld [vmem:[%s444_s0] sm:$0xff]   ;;  %v355_v1 = vld [vmem:[%s444_s0 + $0x8] sm:$0xff]  }
   0x2   :  { %v339_v2 = vunpack.c.l.bf16 %v338_v0  ;;  %v343_v3 = vunpack.c.l.bf16 %v355_v1  ;;  %v340_v4 = vunpack.c.h.bf16 %v338_v0  ;;  %v344_v5 = vunpack.c.h.bf16 %v355_v1  ;;  %v369_v30 = vld [vmem:[%s447_s3 + $0x8] sm:$0xff]   ;;  %v370_v31 = vld [vmem:[%s447_s3] sm:$0xff]  }
   0x3   :  { %361 = vmatprep.subr.bf16.mxu0 %v369_v30  ;;  %v95_v43 = vshrl.u32 %v94_v37, 7  ;;  %v92_v45 = vld [vmem:[%s445_s1] sm:$0x1] }
   0x4   :  { %v39_v6 = vsel %vm38_vm0, %v339_v2, 0.0  ;;  %v45_v7 = vsel %vm38_vm0, %v343_v3, 0.0  ;;  %v42_v8 = vsel %vm38_vm0, %v340_v4, 0.0  ;;  %v48_v9 = vsel %vm38_vm0, %v344_v5, 0.0  ;;  %362 = vmatpush3.bf16.msra.mxu0 %v369_v30  ;;  %v102_v47 = vld [vmem:[%s446_s2] sm:$0x1] }
   0x5   :  { %40 = vadd.xlane.f32.xlu0 %v39_v6  ;;  %46 = vadd.xlane.f32.xlu1 %v45_v7  ;;  %v93_v48 = vunpack.c.l.bf16 %v92_v45  ;;  %v96_v49 = vsub.s32 0, %v95_v43  ;;  %v103_v50 = vunpack.c.l.bf16 %v102_v47 }
   0x6   :  { %363 = vmatprep.subr.bf16.mxu0 %v370_v31 }
   0x7   :  { %v97_v51 = vrot.slane %v93_v48, %v96_v49  ;;  %v107_v53 = vrot.slane %v103_v50, %v96_v49 }
   0x8   :  { %364 = vmatpush3.bf16.msra.mxu0 %v370_v31 }
   0x9   :  { %43 = vadd.xlane.f32.xlu0 %v42_v8  ;;  %49 = vadd.xlane.f32.xlu1 %v48_v9 }
  0x8e   :  { %v41_v10 = vpop.xlane.xlu0 %40  ;;  %v47_v11 = vpop.xlane.xlu1 %46 }
  0x8f   :  { %v52_v12 = vmul.f32 0.03125, %v41_v10  ;;  %v54_v13 = vmul.f32 0.03125, %v47_v11 }
  0x91   :  { %v56_v14 = vsub.f32 %v339_v2, %v52_v12  ;;  %v58_v15 = vsub.f32 %v343_v3, %v54_v13 }
  0x92   :  { %v44_v16 = vpop.xlane.xlu0 %43  ;;  %v50_v17 = vpop.xlane.xlu1 %49 }
  0x93   :  { %v53_v18 = vmul.f32 0.03125, %v44_v16  ;;  %v55_v19 = vmul.f32 0.03125, %v50_v17  ;;  %v60_v20 = vmul.f32 %v56_v14, %v56_v14  ;;  %v62_v21 = vmul.f32 %v58_v15, %v58_v15 }
  0x95   :  { %v57_v22 = vsub.f32 %v340_v4, %v53_v18  ;;  %v59_v23 = vsub.f32 %v344_v5, %v55_v19  ;;  %v64_v24 = vsel %vm38_vm0, %v60_v20, 0.0  ;;  %v70_v25 = vsel %vm38_vm0, %v62_v21, 0.0 }
  0x96   :  { %65 = vadd.xlane.f32.xlu0 %v64_v24 }
  0x97   :  { %v61_v26 = vmul.f32 %v57_v22, %v57_v22  ;;  %v63_v27 = vmul.f32 %v59_v23, %v59_v23 }
  0x99   :  { %v67_v28 = vsel %vm38_vm0, %v61_v26, 0.0  ;;  %v73_v29 = vsel %vm38_vm0, %v63_v27, 0.0 }
  0x9a   :  { %71 = vadd.xlane.f32.xlu0 %v70_v25  ;;  %68 = vadd.xlane.f32.xlu1 %v67_v28 }
  0x9e   :  { %74 = vadd.xlane.f32.xlu1 %v73_v29 }
 0x11f   :  { %v66_v32 = vpop.xlane.xlu0 %65 }
 0x120   :  { %v76_v33 = vmul.f32 0.03125, %v66_v32 }
 0x122   :  { %v80_v34 = vadd.f32 1e-05, %v76_v33 }
 0x123   :  { %v69_v35 = vpop.xlane.xlu1 %68  ;;  %v72_v36 = vpop.xlane.xlu0 %71 }
 0x124   :  { %373 = vrsqrt.f32 %v80_v34  ;;  %v77_v38 = vmul.f32 0.03125, %v69_v35  ;;  %v78_v39 = vmul.f32 0.03125, %v72_v36 }
 0x126   :  { %v81_v40 = vadd.f32 1e-05, %v77_v38  ;;  %v82_v41 = vadd.f32 1e-05, %v78_v39 }
 0x127   :  { %v75_v42 = vpop.xlane.xlu1 %74 }
 0x128   :  { %375 = vrsqrt.f32 %v81_v40  ;;  %v79_v44 = vmul.f32 0.03125, %v75_v42 }
 0x129   :  { %377 = vrsqrt.f32 %v82_v41 }
 0x12a   :  { %v83_v46 = vadd.f32 1e-05, %v79_v44 }
 0x12c   :  { %379 = vrsqrt.f32 %v83_v46 }
 0x131   :  { %v374_v52 = vpop.eup %373 }
 0x132   :  { %v88_v54 = vmul.f32 %v374_v52, %v56_v14 }
 0x134   :  { %v98_v55 = vmul.f32 %v97_v51, %v88_v54 }
 0x135   :  { %v376_v56 = vpop.eup %375 }
 0x136   :  { %v378_v57 = vpop.eup %377  ;;  %v108_v58 = vadd.f32 %v107_v53, %v98_v55  ;;  %v89_v59 = vmul.f32 %v376_v56, %v57_v22 }
 0x137   :  { %v90_v60 = vmul.f32 %v378_v57, %v58_v15 }
 0x138   :  { %v329_v61 = vpack.c.bf16 %v108_v58, %v108_v58  ;;  %v99_v62 = vmul.f32 %v97_v51, %v89_v59 }
 0x139   :  { %v380_v63 = vpop.eup %379  ;;  %v100_v0 = vmul.f32 %v97_v51, %v90_v60 }
 0x13a   :  { %129 = vst.msk [vmem:[#allocation3] sm:$0xf] %vm128_vm1, %v329_v61  ;;  %v109_v1 = vadd.f32 %v107_v53, %v99_v62  ;;  %v91_v2 = vmul.f32 %v380_v63, %v59_v23 }
 0x13b   :  { %v110_v3 = vadd.f32 %v107_v53, %v100_v0 }
 0x13c   :  { %v330_v4 = vpack.c.bf16 %v109_v1, %v109_v1  ;;  %v101_v5 = vmul.f32 %v97_v51, %v91_v2 }
 0x13d   :  { %v331_v6 = vpack.c.bf16 %v110_v3, %v110_v3 }
 0x13e   :  { %130 = vst.msk [vmem:[#allocation3 + $0x4] sm:$0xf] %vm128_vm1, %v330_v4  ;;  %v111_v7 = vadd.f32 %v107_v53, %v101_v5 }
 0x13f   :  { %131 = vst.msk [vmem:[#allocation3 + $0x8] sm:$0xf] %vm128_vm1, %v331_v6 }
 0x140   :  { %v332_v8 = vpack.c.bf16 %v111_v7, %v111_v7 }
 0x142   :  { %132 = vst.msk [vmem:[#allocation3 + $0xc] sm:$0xf] %vm128_vm1, %v332_v8 }
 0x145   :  { %v371_v9 = vld [vmem:[#allocation3] sm:$0xff]  }
 0x146   :  { %365 = vmatprep.mubr.msk.bf16.mxu0 %vm38_vm0, %v371_v9 }
 0x149   :  { %v372_v10 = vld [vmem:[#allocation3 + $0x8] sm:$0xff]  }
 0x14a   :  { %366 = vmatmul.mubr.msk.bf16.vlgmr.msra.gmra.mxu0 %vm38_vm0, %v372_v10 }
 0x20a   :  { %v367_v11 = vpop.f32.mrf.mxu0 }
 0x20c   :  { %v208_v12 = vpop.f32.mrf.mxu0 }
 0x20e   :  { %v368_v13 = vpop.f32.mrf.mxu0 }
 0x20f   :  { %v353_v14 = vpack.c.bf16 %v368_v13, %v367_v11 }
 0x210   :  { %v211_v15 = vpop.f32.mrf.mxu0 }
 0x211   :  { %356 = vst [vmem:[#allocation4 + $0x8] sm:$0xff] %v353_v14   ;;  %v348_v16 = vpack.c.bf16 %v211_v15, %v208_v12 }
 0x213   :  { %349 = vst [vmem:[#allocation4] sm:$0xff] %v348_v16  }
 0x218   :  { %v280_v17 = vld [vmem:[#allocation4 + $0x8] sm:$0xf] }
 0x219   :  { %281 = vst [vmem:[%s448_s4 + $0x8] sm:$0xf] %v280_v17 }
 0x21a   :  { %v276_v18 = vld [vmem:[#allocation4] sm:$0xff]  }
 0x21b   :  { %277 = vst [vmem:[%s448_s4] sm:$0xff] %v276_v18  }

// kernel: timesformer_forward.20
= control target key start
LH: loop header
LB: loop body
LE: loop exit
PB: predicated region body
PF: predicated region fallthrough
CT: control target
= control target key end

     0   :  { %s930_s6 = smov 0   ;;  %s1260_s0 = inlined_call_operand.vmem [shape: bf16[2,9,48], index: 0, kind: input, shape index: {}]   ;;  %s1261_s1 = inlined_call_operand.vmem [shape: bf16[2,9,16], index: 1, kind: output, shape index: {}]  }
   0x1 LB: > { %s755_s7 = sadd.s32 4294967295, %s910_s6   ;;  %p759_p0 = scmp.ge.s32.totalorder %s910_s6, 1  ;;  %s910_s6 = sphi %s930_s6, %s11_s6  }
   0x2   : > { %p87_p1 = scmp.lt.s32.totalorder %s910_s6, 3 }
   0x4   : > { %p88_p2 = pnand %p759_p0, %p87_p1 }
   0x5   : > { %p107_p3 = scmp.lt.s32.totalorder (!%p88_p2), %s755_s7, 1  ;;  %s912_s12 = smov (!%p88_p2), 16  }
   0x6   : > { %91 = sbr.rel (%p88_p2) target bundleno = 956 (0x3bc), region = 24  ;;  %s913_s13 = smov (!%p88_p2), 112  }
   0x7   : > { %s914_s14 = smov (!%p88_p2), 96   ;;  %s915_s15 = smov (!%p88_p2), 120  }
   0x8   : > { %s916_s16 = smov (!%p88_p2), 104   ;;  %s917_s17 = smov (!%p88_p2), 88  }
   0x9   : > { %s918_s18 = smov (!%p88_p2), 32   ;;  %s919_s19 = smov (!%p88_p2), 40  }
   0xb   : > { %v123_v0 = vlaneseq  ;;  %s1267_s7 = smov (!%p107_p3, %s755_s7), 1  ;;  %vm239_vm0 = vcmask 1043456   ;;  %vm234_vm1 = vcmask 61441   ;;  %vm302_vm2 = vcmask 64517  }
   0xc   : > { %s774_s8 = sshll.u32 %s1267_s7, 3  ;;  %vm145_vm3 = vcmask 57344   ;;  %vm141_vm4 = vcmask 64513   ;;  %vm157_vm5 = vcmask 1047553   ;;  %vm159_vm6 = vcmask 1040384  }
   0xd   : > { %v124_v1 = vshrl.u32 %v123_v0, 7  ;;  %s111_s11 = scalar_lea.vmem %s1260_s0, %s774_s8  ;;  %vm184_vm7 = vcmask 1046528   ;;  %vm204_vm8 = vcmask 326912   ;;  %vm484_vm9 = vcmask 392512   ;;  %s1201_s22 = scalar_lea.vmem %s1261_s1, %s774_s8 }
   0xe   : > { %v117_v3 = vld [vmem:[%s111_s11] sm:$0x1]  ;;  %v401_v9 = vld [vmem:[%s111_s11 + $0x4] sm:$0x1]  ;;  %vm224_vm10 = vsmask.f32 256 }
   0xf   : > { %v946_v2 = vsub.s32 0, %v124_v1  ;;  %v119_v4 = vld [vmem:[%s111_s11] sm:$0xf]  ;;  %v948_v6 = vunpack.c.l.bf16 %v117_v3  ;;  %v120_v10 = vld [vmem:[%s111_s11 + $0x4] sm:$0x1]  ;;  %v965_v16 = vunpack.c.l.bf16 %v401_v9  ;;  %vm1207_vm11 = vmand %vm145_vm3, %vm224_vm10  ;;  %vm291_vm12 = vcmask 59392  }
  0x10   : > { %v398_v5 = vld [vmem:[%s111_s11] sm:$0x1]  ;;  %v950_v7 = vunpack.c.l.bf16 %v119_v4  ;;  %v954_v12 = vunpack.c.l.bf16 %v120_v10  ;;  %vm292_vm13 = vsmask.f32 2306  ;;  %vm503_vm15 = vcmask 122944  }
  0x11   : > { %v952_v8 = vunpack.c.l.bf16 %v398_v5  ;;  %v400_v11 = vld [vmem:[%s111_s11] sm:$0xf]  ;;  %v958_v13 = vrot.slane %v948_v6, %v946_v2  ;;  %v522_v24 = vrot.slane %v965_v16, 4  ;;  %vm293_vm14 = vmand %vm291_vm12, %vm292_vm13 }
  0x12   : > { %v240_v15 = vrot.slane %v950_v7, 4  ;;  %v241_v17 = vrot.slane %v954_v12, 4  ;;  %v968_v18 = vunpack.c.l.bf16 %v400_v11  ;;  %v805_v22 = vpack.i.bf16 %v950_v7, %v948_v6 }
  0x13   : > { %v962_v14 = vrot.slane %v952_v8, %v946_v2  ;;  %v830_v28 = vpack.i.bf16 %v952_v8, %v965_v16 }
  0x14   : > { %v242_v20 = vsel %vm239_vm0, %v240_v15, %v241_v17  ;;  %v977_v23 = vrot.slane %v968_v18, 4  ;;  %v835_v30 = vpack.i.bf16 %v954_v12, %v240_v15 }
  0x15   : > { %v800_v19 = vpack.i.bf16 %v962_v14, %v958_v13  ;;  %v810_v21 = vpack.i.bf16 %v958_v13, %v242_v20  ;;  %v820_v25 = vpack.i.bf16 %v962_v14, %v968_v18  ;;  %v815_v26 = vpack.i.bf16 %v240_v15, %v242_v20 }
  0x16   : > { %v986_v27 = vsel %vm239_vm0, %v977_v23, %v522_v24  ;;  %vm389_vm0 = vcmask 60418  }
  0x17   : > { %801 = vrot.lane.b32.xlu0 %v800_v19, %s912_s12  ;;  %811 = vrot.lane.b32.xlu1 %v810_v21, %s913_s13  ;;  %v825_v29 = vpack.i.bf16 %v977_v23, %v986_v27 }
  0x1b   : > { %806 = vrot.lane.b32.xlu0 %v805_v22, %s913_s13  ;;  %821 = vrot.lane.b32.xlu1 %v820_v25, %s913_s13 }
  0x1f   : > { %816 = vrot.lane.b32.xlu0 %v815_v26, %s914_s14  ;;  %831 = vrot.lane.b32.xlu1 %v830_v28, %s913_s13 }
  0x23   : > { %826 = vrot.lane.b32.xlu0 %v825_v29, %s913_s13 }
  0x27   : > { %836 = vrot.lane.b32.xlu0 %v835_v30, %s913_s13 }
  0x89   : > { %v802_v31 = vpop.permute.xlu0 %801  ;;  %v998_v32 = vpop.permute.xlu1 %811 }
  0x8a   : > { %v803_v41 = vunpack.i.l.bf16 %v802_v31  ;;  %v814_v49 = vunpack.i.h.bf16 %v998_v32  ;;  %v804_v57 = vunpack.i.h.bf16 %v802_v31  ;;  %v813_v24 = vunpack.i.l.bf16 %v998_v32 }
  0x8c   : > { %v131_v42 = vmul.f32 %v803_v41, %v950_v7  ;;  %v132_v51 = vmul.f32 %v803_v41, %v954_v12  ;;  %v253_v52 = vmul.f32 %v814_v49, %v950_v7  ;;  %v413_v61 = vmul.f32 %v804_v57, %v965_v16 }
  0x8d   : > { %v807_v33 = vpop.permute.xlu0 %806  ;;  %v1000_v35 = vpop.permute.xlu1 %821  ;;  %v412_v4 = vmul.f32 %v804_v57, %v968_v18  ;;  %v319_v19 = vmul.f32 %v814_v49, %v954_v12  ;;  %v246_v25 = vmul.f32 %v813_v24, %v950_v7 }
  0x8e   : > { %v809_v34 = vunpack.i.h.bf16 %v807_v33  ;;  %v823_v36 = vunpack.i.l.bf16 %v1000_v35  ;;  %v808_v43 = vunpack.i.l.bf16 %v807_v33  ;;  %v254_v54 = vsel %vm234_vm1, %v253_v52, 0.0 }
  0x8f   : > { %v824_v56 = vunpack.i.h.bf16 %v1000_v35  ;;  %v323_v20 = vsel %vm145_vm3, %v319_v19, 0.0  ;;  %v247_v26 = vsel %vm234_vm1, %v246_v25, 0.0  ;;  %v320_v41 = vsel %vm302_vm2, %v253_v52, 0.0 }
  0x90   : > { %v233_v37 = vmul.f32 %v809_v34, %v950_v7  ;;  %v512_v38 = vmul.f32 %v823_v36, %v968_v18  ;;  %v153_v44 = vmul.f32 %v808_v43, %v948_v6 }
  0x91   : > { %v1012_v46 = vpop.permute.xlu0 %816  ;;  %v538_v58 = vmul.f32 %v824_v56, %v968_v18  ;;  %v832_v60 = vpop.permute.xlu1 %831  ;;  %v618_v28 = vmul.f32 %v824_v56, %v965_v16 }
  0x92   : > { %v235_v39 = vsel %vm234_vm1, %v233_v37, 0.0  ;;  %514 = vrot.lane.b32.xlu1 %v512_v38, %s915_s15  ;;  %v313_v40 = vsel %vm302_vm2, %v233_v37, 0.0  ;;  %v154_v45 = vsel %vm145_vm3, %v153_v44, 0.0  ;;  %v833_v0 = vunpack.i.l.bf16 %v832_v60 }
  0x93   : > { %236 = vadd.xlane.f32.xlu0 %v235_v39  ;;  %v834_v29 = vunpack.i.h.bf16 %v832_v60 }
  0x94   : > { %v607_v3 = vmul.f32 %v833_v0, %v965_v16 }
  0x95   : > { %v827_v47 = vpop.permute.xlu0 %826  ;;  %v432_v30 = vmul.f32 %v834_v29, %v952_v8 }
  0x96   : > { %v829_v62 = vunpack.i.h.bf16 %v827_v47  ;;  %v828_v9 = vunpack.i.l.bf16 %v827_v47 }
  0x97   : > { %314 = vadd.xlane.f32.xlu0 %v313_v40 }
  0x98   : > { %v589_v1 = vmul.f32 %v829_v62, %v965_v16  ;;  %v588_v5 = vmul.f32 %v829_v62, %v968_v18  ;;  %v527_v10 = vmul.f32 %v828_v9, %v968_v18 }
  0x99   : > { %v837_v48 = vpop.permute.xlu0 %836 }
  0x9a   : > { %v838_v50 = vunpack.i.l.bf16 %v837_v48  ;;  %v839_v11 = vunpack.i.h.bf16 %v837_v48 }
  0x9c   : > { %v301_v53 = vmul.f32 %v838_v50, %v954_v12  ;;  %v300_v59 = vmul.f32 %v838_v50, %v950_v7  ;;  %v312_v15 = vmul.f32 %v839_v11, %v954_v12 }
  0x9e   : > { %v306_v55 = vsel %vm145_vm3, %v301_v53, 0.0  ;;  %v303_v63 = vsel %vm302_vm2, %v300_v59, 0.0  ;;  %v316_v17 = vsel %vm145_vm3, %v312_v15, 0.0 }
  0xad   : > { %135 = vrot.lane.b32.xlu0 %v131_v42, %s913_s13 }
  0xb6   : > { %155 = vadd.xlane.f32.xlu1 %v154_v45 }
  0xc7   : > { %137 = vrot.lane.b32.xlu1 %v132_v51, %s913_s13 }
  0xcc   : > { %255 = vadd.xlane.f32.xlu0 %v254_v54 }
  0xd0   : > { %307 = vadd.xlane.f32.xlu0 %v306_v55 }
  0xe6   : > { %540 = vrot.lane.b32.xlu0 %v538_v58, %s915_s15 }
  0xea   : > { %418 = vrot.lane.b32.xlu0 %v413_v61, %s916_s16 }
  0xeb   : > { %304 = vadd.xlane.f32.xlu1 %v303_v63 }
  0xee   : > { %594 = vrot.lane.b32.xlu0 %v589_v1, %s915_s15 }
  0xf2   : > { %609 = vrot.lane.b32.xlu0 %v607_v3, %s915_s15 }
  0xfc   : > { %416 = vrot.lane.b32.xlu1 %v412_v4, %s916_s16 }
 0x100   : > { %592 = vrot.lane.b32.xlu1 %v588_v5, %s915_s15 }
 0x104   : > { %529 = vrot.lane.b32.xlu1 %v527_v10, %s915_s15  ;;  %v515_v21 = vpop.permute.xlu1 %514 }
 0x105   : > { %v517_v22 = vsel %vm234_vm1, %v515_v21, 0.0  ;;  %v612_v56 = vsel %vm302_vm2, %v515_v21, 0.0 }
 0x111   : > { %317 = vadd.xlane.f32.xlu0 %v316_v17 }
 0x115   : > { %324 = vadd.xlane.f32.xlu0 %v323_v20 }
 0x119   : > { %518 = vadd.xlane.f32.xlu0 %v517_v22 }
 0x11c   : > { %v237_v33 = vpop.xlane.xlu0 %236 }
 0x120   : > { %v1051_v35 = vpop.xlane.xlu0 %314 }
 0x124   : > { %v136_v36 = vpop.permute.xlu0 %135 }
 0x125   : > { %v142_v44 = vsel %vm141_vm4, %v136_v36, 0.0 }
 0x128   : > { %248 = vadd.xlane.f32.xlu1 %v247_v26 }
 0x139   : > { %620 = vrot.lane.b32.xlu1 %v618_v28, %s915_s15 }
 0x13d   : > { %434 = vrot.lane.b32.xlu1 %v432_v30, %s915_s15 }
 0x13f   : > { %v1048_v31 = vpop.xlane.xlu1 %155 }
 0x143   : > { %v138_v34 = vpop.permute.xlu1 %137 }
 0x144   : > { %v146_v32 = vsel %vm145_vm3, %v138_v34, 0.0 }
 0x145   : > { %147 = vadd.xlane.f32.xlu0 %v146_v32 }
 0x155   : > { %v256_v37 = vpop.xlane.xlu0 %255 }
 0x156   : > { %v257_v5 = vmax.f32 %v256_v37, %v237_v33 }
 0x159   : > { %v308_v38 = vpop.xlane.xlu0 %307 }
 0x15d   : > { %v541_v39 = vpop.permute.xlu0 %540 }
 0x15e   : > { %v543_v47 = vsel %vm234_vm1, %v541_v39, 0.0  ;;  %v623_v54 = vsel %vm302_vm2, %v541_v39, 0.0 }
 0x161   : > { %v419_v40 = vpop.permute.xlu0 %418  ;;  %321 = vadd.xlane.f32.xlu1 %v320_v41  ;;  %v818_v41 = vunpack.i.l.bf16 %v1012_v46 }
 0x162   : > { %v425_v42 = vsel %vm145_vm3, %v419_v40, 0.0 }
 0x163   : > { %426 = vadd.xlane.f32.xlu0 %v425_v42 }
 0x165   : > { %v595_v43 = vpop.permute.xlu0 %594  ;;  %143 = vadd.xlane.f32.xlu1 %v142_v44 }
 0x166   : > { %v601_v45 = vsel %vm145_vm3, %v595_v43, 0.0  ;;  %v819_v43 = vunpack.i.h.bf16 %v1012_v46 }
 0x167   : > { %602 = vadd.xlane.f32.xlu0 %v601_v45 }
 0x169   : > { %544 = vadd.xlane.f32.xlu1 %v543_v47  ;;  %v610_v57 = vpop.permute.xlu0 %609 }
 0x16a   : > { %v615_v32 = vsel %vm145_vm3, %v610_v57, 0.0 }
 0x174   : > { %v1057_v48 = vpop.xlane.xlu1 %304 }
 0x178   : > { %v417_v49 = vpop.permute.xlu1 %416 }
 0x179   : > { %v422_v50 = vsel %vm141_vm4, %v417_v49, 0.0  ;;  %vm580_vm4 = vcmask 124992  }
 0x17a   : > { %423 = vadd.xlane.f32.xlu1 %v422_v50 }
 0x17c   : > { %v593_v51 = vpop.permute.xlu1 %592 }
 0x17d   : > { %v598_v52 = vsel %vm302_vm2, %v593_v51, 0.0  ;;  %vm1230_vm2 = vmand %vm503_vm15, %vm224_vm10 }
 0x17e   : > { %599 = vadd.xlane.f32.xlu1 %v598_v52 }
 0x180   : > { %v530_v53 = vpop.permute.xlu1 %529 }
 0x181   : > { %v532_v55 = vsel %vm234_vm1, %v530_v53, 0.0  ;;  %vm390_vm1 = vsmask.f32 7946 }
 0x182   : > { %624 = vadd.xlane.f32.xlu1 %v623_v54  ;;  %533 = vadd.xlane.f32.xlu0 %v532_v55 }
 0x186   : > { %613 = vadd.xlane.f32.xlu1 %v612_v56 }
 0x19a   : > { %v318_v58 = vpop.xlane.xlu0 %317 }
 0x19e   : > { %v325_v59 = vpop.xlane.xlu0 %324 }
 0x19f   : > { %v327_v60 = vmax.f32 %v325_v59, %v308_v38 }
 0x1a1   : > { %v329_v61 = vmax.f32 %v327_v60, %v318_v58 }
 0x1a2   : > { %v519_v46 = vpop.xlane.xlu0 %518 }
 0x1a3   : > { %v331_v62 = vsub.f32 %v308_v38, %v329_v61  ;;  %v337_v63 = vsub.f32 %v318_v58, %v329_v61  ;;  %v343_v0 = vsub.f32 %v325_v59, %v329_v61 }
 0x1a5   : > { %v334_v1 = vmul.f32 1.442695, %v331_v62  ;;  %v346_v3 = vmul.f32 1.442695, %v343_v0  ;;  %v340_v4 = vmul.f32 1.442695, %v337_v63 }
 0x1a7   : > { %840 = vpow2.f32 %v334_v1 }
 0x1a8   : > { %842 = vpow2.f32 %v346_v3 }
 0x1a9   : > { %844 = vpow2.f32 %v340_v4 }
 0x1b1   : > { %v249_v9 = vpop.xlane.xlu1 %248 }
 0x1b2   : > { %v258_v11 = vmax.f32 %v257_v5, %v249_v9 }
 0x1b4   : > { %v841_v10 = vpop.eup %840  ;;  %v259_v17 = vsub.f32 %v237_v33, %v258_v11  ;;  %v262_v19 = vsub.f32 %v249_v9, %v258_v11  ;;  %v265_v20 = vsub.f32 %v256_v37, %v258_v11 }
 0x1b5   : > { %v1063_v15 = vpop.eup %842  ;;  %v621_v22 = vpop.permute.xlu1 %620  ;;  %v358_v44 = vmul.f32 %v841_v10, %v819_v43 }
 0x1b6   : > { %v349_v21 = vadd.f32 %v1063_v15, %v841_v10  ;;  %v1066_v24 = vpop.eup %844  ;;  %v260_v25 = vmul.f32 1.442695, %v259_v17  ;;  %v266_v26 = vmul.f32 1.442695, %v265_v20  ;;  %v626_v29 = vsel %vm145_vm3, %v621_v22, 0.0 }
 0x1b7   : > { %v263_v30 = vmul.f32 1.442695, %v262_v19  ;;  %627 = vadd.xlane.f32.xlu0 %v626_v29 }
 0x1b8   : > { %v1069_v28 = vadd.f32 %v1066_v24, %v349_v21  ;;  %846 = vpow2.f32 %v260_v25 }
 0x1b9   : > { %v435_v34 = vpop.permute.xlu1 %434  ;;  %848 = vpow2.f32 %v266_v26 }
 0x1ba   : > { %v437_v33 = vsel %vm145_vm3, %v435_v34, 0.0  ;;  %850 = vpow2.f32 %v263_v30  ;;  %vm391_vm3 = vmand %vm389_vm0, %vm390_vm1 }
 0x1bb   : > { %438 = vadd.xlane.f32.xlu1 %v437_v33  ;;  %616 = vadd.xlane.f32.xlu0 %v615_v32 }
 0x1c5   : > { %v1074_v36 = vpop.eup %846 }
 0x1c6   : > { %v1076_v37 = vpop.eup %848 }
 0x1c7   : > { %v268_v38 = vadd.f32 %v1076_v37, %v1074_v36  ;;  %v851_v39 = vpop.eup %850 }
 0x1c8   : > { %v276_v42 = vmul.f32 %v851_v39, %v818_v41 }
 0x1c9   : > { %v1080_v40 = vadd.f32 %v851_v39, %v268_v38 }
 0x1cc   : > { %657 = vrot.lane.b32.xlu1 %v977_v23, %s917_s17 }
 0x1ce   : > { %v1092_v55 = vpop.xlane.xlu0 %147 }
 0x1cf   : > { %v160_v4 = vsel %vm159_vm6, %v1092_v55, -inf }
 0x1d1   : > { %278 = vrot.lane.b32.xlu0 %v276_v42, %s918_s18 }
 0x1d5   : > { %562 = vrot.lane.b32.xlu0 %v986_v27, %s917_s17 }
 0x1d9   : > { %363 = vrot.lane.b32.xlu0 %v358_v44, %s918_s18 }
 0x1ea   : > { %v322_v45 = vpop.xlane.xlu1 %321 }
 0x1eb   : > { %v326_v47 = vmax.f32 %v322_v45, %v1057_v48 }
 0x1ec   : > { %v1094_v58 = vpop.xlane.xlu0 %426 }
 0x1ed   : > { %v328_v49 = vmax.f32 %v326_v47, %v1051_v35 }
 0x1ee   : > { %v1090_v27 = vpop.xlane.xlu1 %143 }
 0x1ef   : > { %v330_v50 = vsub.f32 %v1057_v48, %v328_v49  ;;  %v336_v23 = vsub.f32 %v1051_v35, %v328_v49  ;;  %v342_v51 = vsub.f32 %v322_v45, %v328_v49  ;;  %v158_v1 = vsel %vm157_vm5, %v1090_v27, -inf }
 0x1f0   : > { %v1106_v63 = vpop.xlane.xlu0 %602  ;;  %v161_v10 = vmax.f32 %v158_v1, %v160_v4 }
 0x1f1   : > { %v332_v52 = vmul.f32 1.442695, %v330_v50  ;;  %v344_v53 = vmul.f32 1.442695, %v342_v51  ;;  %v338_v54 = vmul.f32 1.442695, %v336_v23 }
 0x1f2   : > { %v545_v56 = vpop.xlane.xlu1 %544  ;;  %v162_v25 = vrot.slane %v161_v10, 4 }
 0x1f3   : > { %852 = vpow2.f32 %v332_v52  ;;  %v546_v3 = vmax.f32 %v545_v56, %v519_v46 }
 0x1f4   : > { %854 = vpow2.f32 %v344_v53  ;;  %v163_v39 = vmax.f32 %v161_v10, %v162_v25 }
 0x1f5   : > { %856 = vpow2.f32 %v338_v54 }
 0x1f6   : > { %v164_v44 = vrot.slane %v163_v39, 2 }
 0x1f8   : > { %v165_v45 = vmax.f32 %v163_v39, %v164_v44 }
 0x1fa   : > { %v166_v49 = vrot.slane %v165_v45, 1 }
 0x200   : > { %v853_v57 = vpop.eup %852 }
 0x201   : > { %v357_v59 = vmul.f32 %v853_v57, %v819_v43  ;;  %v1096_v48 = vpop.eup %854 }
 0x202   : > { %v348_v35 = vadd.f32 %v1096_v48, %v853_v57  ;;  %v1101_v61 = vpop.eup %856 }
 0x203   : > { %361 = vrot.lane.b32.xlu1 %v357_v59, %s918_s18  ;;  %v1099_v60 = vpop.xlane.xlu1 %423 }
 0x204   : > { %v1104_v62 = vadd.f32 %v1101_v61, %v348_v35 }
 0x207   : > { %v600_v0 = vpop.xlane.xlu1 %599 }
 0x20b   : > { %v625_v5 = vpop.xlane.xlu1 %624  ;;  %v534_v9 = vpop.xlane.xlu0 %533 }
 0x20c   : > { %v547_v11 = vmax.f32 %v546_v3, %v534_v9  ;;  %v629_v17 = vmax.f32 %v625_v5, %v600_v0  ;;  %v440_v3 = vsel %vm157_vm5, %v1099_v60, -inf  ;;  %vm581_vm5 = vmand %vm580_vm4, %vm292_vm13 }
 0x20e   : > { %v548_v19 = vsub.f32 %v519_v46, %v547_v11  ;;  %v551_v20 = vsub.f32 %v534_v9, %v547_v11  ;;  %v554_v21 = vsub.f32 %v545_v56, %v547_v11  ;;  %v167_v46 = vmax.f32 %v165_v45, %v166_v49 }
 0x20f   : > { %v614_v22 = vpop.xlane.xlu1 %613 }
 0x210   : > { %v549_v26 = vmul.f32 1.442695, %v548_v19  ;;  %v555_v29 = vmul.f32 1.442695, %v554_v21  ;;  %v631_v30 = vmax.f32 %v629_v17, %v614_v22  ;;  %v552_v34 = vmul.f32 1.442695, %v551_v20 }
 0x211   : > { %v1130_v1 = vmax.f32 %v167_v46, %v1048_v31 }
 0x212   : > { %858 = vpow2.f32 %v549_v26  ;;  %v633_v33 = vsub.f32 %v600_v0, %v631_v30  ;;  %v639_v32 = vsub.f32 %v614_v22, %v631_v30  ;;  %v645_v38 = vsub.f32 %v625_v5, %v631_v30 }
 0x213   : > { %860 = vpow2.f32 %v555_v29  ;;  %v441_v5 = vsel %vm159_vm6, %v1094_v58, -inf  ;;  %v172_v10 = vrot.slane %v1130_v1, %v946_v2  ;;  %vm692_vm6 = vcmask 126018  }
 0x214   : > { %v635_v41 = vmul.f32 1.442695, %v633_v33  ;;  %862 = vpow2.f32 %v552_v34  ;;  %v647_v42 = vmul.f32 1.442695, %v645_v38  ;;  %v641_v43 = vmul.f32 1.442695, %v639_v32 }
 0x215   : > { %v442_v9 = vmax.f32 %v440_v3, %v441_v5  ;;  %v173_v17 = vsub.f32 %v1090_v27, %v172_v10  ;;  %v174_v19 = vsub.f32 %v1092_v55, %v172_v10  ;;  %v270_v27 = vmul.f32 %v1076_v37, %v958_v13 }
 0x216   : > { %864 = vpow2.f32 %v635_v41  ;;  %v271_v55 = vmul.f32 %v1074_v36, %v950_v7 }
 0x217   : > { %866 = vpow2.f32 %v647_v42  ;;  %v443_v11 = vrot.slane %v442_v9, 4  ;;  %v175_v21 = vmul.f32 1.442695, %v173_v17  ;;  %v177_v22 = vmul.f32 1.442695, %v174_v19 }
 0x218   : > { %868 = vpow2.f32 %v641_v43  ;;  %v272_v49 = vadd.f32 %v271_v55, %v270_v27 }
 0x219   : > { %v444_v20 = vmax.f32 %v442_v9, %v443_v11  ;;  %870 = vpow2.f32 %v175_v21  ;;  %v370_v21 = vmul.f32 %v1066_v24, %v954_v12 }
 0x21a   : > { %872 = vpow2.f32 %v177_v22 }
 0x21b   : > { %v445_v25 = vrot.slane %v444_v20, 2  ;;  %874 = vrcp.f32 %v1080_v40 }
 0x21c   : > { %876 = vrcp.f32 %v1069_v28 }
 0x21d   : > { %v446_v26 = vmax.f32 %v444_v20, %v445_v25  ;;  %v179_v20 = vsub.f32 %v1048_v31, %v1130_v1 }
 0x21f   : > { %v859_v47 = vpop.eup %858  ;;  %v447_v29 = vrot.slane %v446_v26, 1 }
 0x220   : > { %v560_v50 = vmul.f32 %v859_v47, %v968_v18  ;;  %v861_v23 = vpop.eup %860 }
 0x221   : > { %v1113_v51 = vpop.eup %862  ;;  %v557_v52 = vadd.f32 %v861_v23, %v859_v47  ;;  %v559_v53 = vmul.f32 %v861_v23, %v962_v14  ;;  %v448_v33 = vmax.f32 %v446_v26, %v447_v29 }
 0x223   : > { %v1116_v54 = vpop.eup %864  ;;  %v1119_v56 = vadd.f32 %v1113_v51, %v557_v52  ;;  %v1121_v57 = vadd.f32 %v560_v50, %v559_v53 }
 0x224   : > { %v1123_v59 = vpop.eup %866 }
 0x225   : > { %v651_v35 = vadd.f32 %v1123_v59, %v1116_v54  ;;  %v1127_v0 = vpop.eup %868 }
 0x226   : > { %v871_v38 = vpop.eup %870 }
 0x227   : > { %v1135_v4 = vadd.f32 %v1127_v0, %v651_v35  ;;  %v873_v42 = vpop.eup %872  ;;  %v185_v50 = vrot.slane %v871_v38, 1 }
 0x228   : > { %v186_v23 = vrot.slane %v873_v42, 1  ;;  %v875_v35 = vpop.eup %874  ;;  %v197_v25 = vmul.f32 %v873_v42, %v954_v12 }
 0x229   : > { %v877_v26 = vpop.eup %876 }
 0x22a   : > { %v187_v9 = vsel %vm184_vm7, %v185_v50, %v186_v23  ;;  %v201_v55 = vrot.slane %v197_v25, 1 }
 0x22b   : > { %v189_v17 = vrot.slane %v187_v9, 4 }
 0x240   : > { %v628_v30 = vpop.xlane.xlu0 %627 }
 0x241   : > { %v630_v34 = vmax.f32 %v628_v30, %v1106_v63 }
 0x244   : > { %v439_v32 = vpop.xlane.xlu1 %438  ;;  %v617_v41 = vpop.xlane.xlu0 %616 }
 0x245   : > { %v449_v39 = vmax.f32 %v448_v33, %v439_v32  ;;  %v632_v43 = vmax.f32 %v630_v34, %v617_v41  ;;  %v180_v34 = vmul.f32 1.442695, %v179_v20 }
 0x247   : > { %v453_v44 = vrot.slane %v449_v39, %v946_v2  ;;  %v634_v40 = vsub.f32 %v1106_v63, %v632_v43  ;;  %v640_v45 = vsub.f32 %v617_v41, %v632_v43  ;;  %v646_v47 = vsub.f32 %v628_v30, %v632_v43 }
 0x248   : > { %v279_v52 = vpop.permute.xlu0 %278  ;;  %v190_v30 = vadd.f32 %v189_v17, %v187_v9  ;;  %v460_v33 = vsub.f32 %v439_v32, %v449_v39  ;;  %v658_v1 = vpop.permute.xlu1 %657 }
 0x249   : > { %v454_v37 = vsub.f32 %v1099_v60, %v453_v44  ;;  %v455_v36 = vsub.f32 %v1094_v58, %v453_v44  ;;  %v637_v53 = vmul.f32 1.442695, %v634_v40  ;;  %v281_v46 = vadd.f32 %v279_v52, %v272_v49 }
 0x24a   : > { %v649_v28 = vmul.f32 1.442695, %v646_v47  ;;  %v643_v10 = vmul.f32 1.442695, %v640_v45  ;;  %v353_v58 = vmul.f32 %v1063_v15, %v958_v13  ;;  %v191_v43 = vrot.slane %v190_v30, 2 }
 0x24b   : > { %v456_v3 = vmul.f32 1.442695, %v454_v37  ;;  %v458_v2 = vmul.f32 1.442695, %v455_v36  ;;  %878 = vpow2.f32 %v637_v53  ;;  %v283_v5 = vmul.f32 %v875_v35, %v281_v46 }
 0x24c   : > { %v563_v63 = vpop.permute.xlu0 %562  ;;  %v461_v24 = vmul.f32 1.442695, %v460_v33  ;;  %v660_v45 = vmul.f32 %v1116_v54, %v658_v1  ;;  %v192_v47 = vadd.f32 %v191_v43, %v190_v30 }
 0x24d   : > { %880 = vpow2.f32 %v456_v3  ;;  %v777_v11 = vpack.c.bf16 %v283_v5, %v283_v5  ;;  %v565_v60 = vmul.f32 %v1113_v51, %v563_v63  ;;  %v196_v51 = vmul.f32 %v871_v38, %v950_v7 }
 0x24e   : > { %882 = vpow2.f32 %v458_v2  ;;  %v193_v3 = vrot.slane %v192_v47, 1 }
 0x24f   : > { %884 = vpow2.f32 %v649_v28  ;;  %288 = vrot.lane.b32.xlu1 %v777_v11, %s914_s14  ;;  %567 = vrot.lane.b32.xlu0 %v565_v60, %s919_s19  ;;  %v200_v27 = vrot.slane %v196_v51, 1 }
 0x250   : > { %v364_v19 = vpop.permute.xlu0 %363  ;;  %886 = vpow2.f32 %v643_v10  ;;  %v194_v10 = vadd.f32 %v193_v3, %v192_v47 }
 0x251   : > { %v368_v22 = vadd.f32 %v364_v19, %v353_v58  ;;  %888 = vpow2.f32 %v180_v34  ;;  %v202_v42 = vsel %vm184_vm7, %v200_v27, %v201_v55  ;;  %v369_v55 = vmul.f32 %v1101_v61, %v950_v7 }
 0x252   : > { %890 = vpow2.f32 %v461_v24  ;;  %v205_v35 = vsel %vm204_vm8, %v202_v42, 0.0 }
 0x253   : > { %v372_v29 = vadd.f32 %v370_v21, %v368_v22  ;;  %v206_v5 = vrot.slane %v205_v35, 4  ;;  %892 = vrcp.f32 %v1104_v62 }
 0x255   : > { %v376_v15 = vmul.f32 %v877_v26, %v372_v29  ;;  %v207_v60 = vadd.f32 %v206_v5, %v205_v35  ;;  %v672_v35 = vmul.f32 %v1127_v0, %v968_v18 }
 0x257   : > { %v779_v41 = vpack.c.bf16 %v376_v15, %v376_v15  ;;  %v208_v22 = vrot.slane %v207_v60, 2  ;;  %v352_v15 = vmul.f32 %v1096_v48, %v958_v13 }
 0x258   : > { %v879_v31 = vpop.eup %878 }
 0x259   : > { %v1166_v40 = vmul.f32 %v879_v31, %v658_v1  ;;  %385 = vrot.lane.b32.xlu0 %v779_v41, %s914_s14  ;;  %v209_v29 = vadd.f32 %v208_v22, %v207_v60 }
 0x25a   : > { %v881_v44 = vpop.eup %880 }
 0x25b   : > { %v883_v12 = vpop.eup %882  ;;  %v465_v38 = vrot.slane %v881_v44, 1  ;;  %v476_v32 = vmul.f32 %v881_v44, %v968_v18  ;;  %v210_v34 = vrot.slane %v209_v29, 1 }
 0x25c   : > { %v466_v39 = vrot.slane %v883_v12, 1  ;;  %v477_v49 = vmul.f32 %v883_v12, %v965_v16  ;;  %v1173_v50 = vpop.eup %884 }
 0x25d   : > { %v480_v23 = vrot.slane %v476_v32, 1  ;;  %v652_v36 = vadd.f32 %v1173_v50, %v879_v31  ;;  %664 = vrot.lane.b32.xlu0 %v660_v45, %s919_s19  ;;  %v1178_v53 = vpop.eup %886  ;;  %v211_v43 = vadd.f32 %v210_v34, %v209_v29 }
 0x25e   : > { %v467_v37 = vsel %vm184_vm7, %v465_v38, %v466_v39  ;;  %v481_v52 = vrot.slane %v477_v49, 1  ;;  %v889_v17 = vpop.eup %888 }
 0x25f   : > { %v469_v46 = vrot.slane %v467_v37, 4  ;;  %v1181_v54 = vadd.f32 %v1178_v53, %v652_v36  ;;  %v195_v20 = vadd.f32 %v889_v17, %v194_v10  ;;  %v891_v25 = vpop.eup %890  ;;  %v212_v62 = vmul.f32 %v889_v17, %v948_v6  ;;  %v226_v10 = vld [vmem:[%s1201_s22] sm:$0x1] }
 0x260   : > { %v482_v2 = vsel %vm184_vm7, %v480_v23, %v481_v52  ;;  %v893_v1 = vpop.eup %892  ;;  %v492_v13 = vmul.f32 %v891_v25, %v952_v8  ;;  %vm693_vm7 = vmand %vm692_vm6, %vm390_vm1 }
 0x261   : > { %v470_v28 = vadd.f32 %v469_v46, %v467_v37  ;;  %v485_v9 = vsel %vm484_vm9, %v482_v2, 0.0  ;;  %894 = vrcp.f32 %v195_v20  ;;  %v213_v38 = vadd.f32 %v212_v62, %v211_v43 }
 0x262   : > { %v486_v58 = vrot.slane %v485_v9, 4 }
 0x263   : > { %v471_v63 = vrot.slane %v470_v28, 2 }
 0x264   : > { %v487_v51 = vadd.f32 %v486_v58, %v485_v9 }
 0x265   : > { %v472_v11 = vadd.f32 %v471_v63, %v470_v28 }
 0x266   : > { %v488_v30 = vrot.slane %v487_v51, 2 }
 0x267   : > { %v473_v19 = vrot.slane %v472_v11, 1 }
 0x268   : > { %v489_v33 = vadd.f32 %v488_v30, %v487_v51  ;;  %v673_v30 = vmul.f32 %v1178_v53, %v965_v16 }
 0x269   : > { %v474_v21 = vadd.f32 %v473_v19, %v472_v11 }
 0x26a   : > { %v490_v31 = vrot.slane %v489_v33, 1 }
 0x26b   : > { %v475_v26 = vadd.f32 %v891_v25, %v474_v21 }
 0x26c   : > { %v491_v42 = vadd.f32 %v490_v31, %v489_v33 }
 0x26d   : > { %896 = vrcp.f32 %v475_v26  ;;  %v656_v26 = vmul.f32 %v1173_v50, %v962_v14 }
 0x26e   : > { %v895_v24 = vpop.eup %894  ;;  %v493_v7 = vadd.f32 %v492_v13, %v491_v42  ;;  %898 = vrcp.f32 %v1119_v56 }
 0x26f   : > { %v215_v39 = vmul.f32 %v895_v24, %v213_v38  ;;  %900 = vrcp.f32 %v1135_v4  ;;  %v655_v4 = vmul.f32 %v1123_v59, %v962_v14 }
 0x270   : > { %902 = vrcp.f32 %v1181_v54 }
 0x271   : > { %v776_v61 = vpack.c.bf16 %v215_v39, %v215_v39 }
 0x275   : > { %v362_v27 = vpop.permute.xlu1 %361 }
 0x276   : > { %v367_v41 = vadd.f32 %v362_v27, %v352_v15 }
 0x278   : > { %v371_v44 = vadd.f32 %v369_v55, %v367_v41 }
 0x27a   : > { %v374_v12 = vmul.f32 %v893_v1, %v371_v44  ;;  %v897_v48 = vpop.eup %896 }
 0x27b   : > { %v495_v45 = vmul.f32 %v897_v48, %v493_v7  ;;  %v899_v23 = vpop.eup %898 }
 0x27c   : > { %v778_v32 = vpack.c.bf16 %v374_v12, %v374_v12  ;;  %v901_v28 = vpop.eup %900 }
 0x27d   : > { %v780_v47 = vpack.c.bf16 %v495_v45, %v495_v45  ;;  %v903_v33 = vpop.eup %902 }
 0x27e   : > { %383 = vrot.lane.b32.xlu1 %v778_v32, %s914_s14 }
 0x282   : > { %220 = vrot.lane.b32.xlu1 %v776_v61, %s914_s14 }
 0x286   : > { %500 = vrot.lane.b32.xlu1 %v780_v47, %s914_s14 }
 0x2c1   : > { %v568_v6 = vpop.permute.xlu0 %567  ;;  %v289_v9 = vpop.permute.xlu1 %288 }
 0x2c2   : > { %v570_v49 = vadd.f32 %v568_v6, %v1121_v57  ;;  %v395_v57 = vld [vmem:[%s1201_s22 + $0x4] sm:$0x1] }
 0x2c4   : > { %v572_v37 = vmul.f32 %v899_v23, %v570_v49 }
 0x2c6   : > { %v781_v8 = vpack.c.bf16 %v572_v37, %v572_v37 }
 0x2c8   : > { %577 = vrot.lane.b32.xlu1 %v781_v8, %s914_s14 }
 0x2cb   : > { %v386_v36 = vpop.permute.xlu0 %385 }
 0x2cc   : > { %v396_v52 = vsel %vm1207_vm11, %v386_v36, %v395_v57  ;;  %666 = vrot.lane.b32.xlu1 %v1166_v40, %s919_s19 }
 0x2cd   : > { %397 = vst [vmem:[%s1201_s22 + $0x4] sm:$0x1] %v396_v52 }
 0x2cf   : > { %v665_v46 = vpop.permute.xlu0 %664 }
 0x2d0   : > { %v670_v3 = vadd.f32 %v665_v46, %v655_v4 }
 0x2d2   : > { %v674_v2 = vadd.f32 %v672_v35, %v670_v3 }
 0x2d4   : > { %v677_v5 = vmul.f32 %v901_v28, %v674_v2  ;;  %v697_v50 = vld [vmem:[%s1201_s22 + $0x4] sm:$0x1] }
 0x2d6   : > { %v782_v63 = vpack.c.bf16 %v677_v5, %v677_v5 }
 0x2d8   : > { %686 = vrot.lane.b32.xlu0 %v782_v63, %s914_s14 }
 0x2f0   : > { %v384_v40 = vpop.permute.xlu1 %383 }
 0x2f4   : > { %v221_v11 = vpop.permute.xlu1 %220 }
 0x2f5   : > { %v227_v59 = vsel %vm1207_vm11, %v221_v11, %v226_v10 }
 0x2f6   : > { %228 = vst [vmem:[%s1201_s22] sm:$0x1] %v227_v59 }
 0x2f8   : > { %v501_v17 = vpop.permute.xlu1 %500 }
 0x2fd   : > { %v294_v18 = vld [vmem:[%s1201_s22] sm:$0x7] }
 0x2fe   : > { %v295_v0 = vsel %vm293_vm14, %v289_v9, %v294_v18 }
 0x2ff   : > { %296 = vst [vmem:[%s1201_s22] sm:$0x7] %v295_v0 }
 0x306   : > { %v505_v58 = vld [vmem:[%s1201_s22] sm:$0x1]  ;;  %v392_v19 = vld [vmem:[%s1201_s22] sm:$0xc] }
 0x307   : > { %v506_v20 = vsel %vm1230_vm2, %v501_v17, %v505_v58  ;;  %v393_v21 = vsel %vm391_vm3, %v384_v40, %v392_v19 }
 0x308   : > { %507 = vst [vmem:[%s1201_s22] sm:$0x1] %v506_v20  ;;  %394 = vst [vmem:[%s1201_s22] sm:$0xc] %v393_v21 }
 0x30f   : > { %v582_v22 = vld [vmem:[%s1201_s22] sm:$0x7] }
 0x33a   : > { %v578_v51 = vpop.permute.xlu1 %577 }
 0x33b   : > { %v583_v25 = vsel %vm581_vm5, %v578_v51, %v582_v22 }
 0x33c   : > { %584 = vst [vmem:[%s1201_s22] sm:$0x7] %v583_v25 }
 0x33e   : > { %v667_v29 = vpop.permute.xlu1 %666 }
 0x33f   : > { %v671_v34 = vadd.f32 %v667_v29, %v656_v26 }
 0x341   : > { %v675_v54 = vadd.f32 %v673_v30, %v671_v34 }
 0x343   : > { %v679_v15 = vmul.f32 %v903_v33, %v675_v54  ;;  %v694_v55 = vld [vmem:[%s1201_s22] sm:$0xc] }
 0x345   : > { %v783_v27 = vpack.c.bf16 %v679_v15, %v679_v15 }
 0x347   : > { %688 = vrot.lane.b32.xlu1 %v783_v27, %s914_s14 }
 0x34a   : > { %v687_v41 = vpop.permute.xlu0 %686 }
 0x34b   : > { %v695_v43 = vsel %vm693_vm7, %v687_v41, %v694_v55 }
 0x34c   : > { %696 = vst [vmem:[%s1201_s22] sm:$0xc] %v695_v43 }
 0x3b9   : > { %v689_v14 = vpop.permute.xlu1 %688 }
 0x3ba   : > { %v698_v16 = vsel %vm1230_vm2, %v689_v14, %v697_v50 }
 0x3bb   : > { %699 = vst [vmem:[%s1201_s22 + $0x4] sm:$0x1] %v698_v16 }
 0x3bc PF: > { %s11_s6 = sadd.s32 1, %s910_s6  }
 0x3bd   : > { %p8_p4 = scmp.ge.s32.totalorder %s11_s6, 4  }
 0x3bf   :  { %10 = sbr.rel (!%p8_p4) target bundleno = 1 (0x1), region = 54 }

// kernel: timesformer_forward.25
= control target key start
LH: loop header
LB: loop body
LE: loop exit
PB: predicated region body
PF: predicated region fallthrough
CT: control target
= control target key end

     0   :  { %vm39_vm0 = vcmask 261120   ;;  %v95_v39 = vlaneseq  ;;  %vm129_vm1 = vcmask 257024   ;;  %s614_s0 = inlined_call_operand.vmem [shape: bf16[18,32], index: 0, kind: input, shape index: {}]   ;;  %s615_s1 = inlined_call_operand.vmem [shape: bf16[1,32], index: 1, kind: input, shape index: {}]   ;;  %s616_s2 = inlined_call_operand.vmem [shape: bf16[1,32], index: 2, kind: input, shape index: {}]   ;;  %s617_s3 = inlined_call_operand.vmem [shape: bf16[32,128], index: 3, kind: input, shape index: {}]   ;;  %s618_s4 = inlined_call_operand.vmem [shape: bf16[1,128], index: 4, kind: input, shape index: {}]   ;;  %s619_s5 = inlined_call_operand.vmem [shape: bf16[32,128], index: 5, kind: input, shape index: {}]   ;;  %s620_s6 = inlined_call_operand.vmem [shape: bf16[1,128], index: 6, kind: input, shape index: {}]   ;;  %s621_s7 = inlined_call_operand.vmem [shape: bf16[18,128], index: 7, kind: output, shape index: {}]  }
   0x1   :  { %v441_v0 = vld [vmem:[%s614_s0] sm:$0xff]   ;;  %v458_v1 = vld [vmem:[%s614_s0 + $0x8] sm:$0xff]  }
   0x2   :  { %v442_v2 = vunpack.c.l.bf16 %v441_v0  ;;  %v446_v3 = vunpack.c.l.bf16 %v458_v1  ;;  %v443_v4 = vunpack.c.h.bf16 %v441_v0  ;;  %v447_v5 = vunpack.c.h.bf16 %v458_v1  ;;  %v484_v30 = vld [vmem:[%s617_s3 + $0x8] sm:$0xff]   ;;  %v486_v32 = vld [vmem:[%s617_s3] sm:$0xff]  }
   0x3   :  { %v485_v31 = vld [vmem:[%s619_s5 + $0x8] sm:$0xff]   ;;  %468 = vmatprep.subr.bf16.mxu0 %v484_v30  ;;  %v488_v33 = vld [vmem:[%s619_s5] sm:$0xff]   ;;  %v96_v45 = vshrl.u32 %v95_v39, 7 }
   0x4   :  { %v40_v6 = vsel %vm39_vm0, %v442_v2, 0.0  ;;  %v46_v7 = vsel %vm39_vm0, %v446_v3, 0.0  ;;  %v43_v8 = vsel %vm39_vm0, %v443_v4, 0.0  ;;  %v49_v9 = vsel %vm39_vm0, %v447_v5, 0.0  ;;  %476 = vmatprep.subr.bf16.mxu1 %v485_v31  ;;  %469 = vmatpush3.bf16.msra.mxu0 %v484_v30  ;;  %v93_v47 = vld [vmem:[%s615_s1] sm:$0x1] }
   0x5   :  { %41 = vadd.xlane.f32.xlu0 %v40_v6  ;;  %47 = vadd.xlane.f32.xlu1 %v46_v7  ;;  %v103_v49 = vld [vmem:[%s616_s2] sm:$0x1]  ;;  %v94_v50 = vunpack.c.l.bf16 %v93_v47  ;;  %v586_v51 = vsub.s32 0, %v96_v45 }
   0x6   :  { %477 = vmatpush3.bf16.msra.mxu1 %v485_v31  ;;  %470 = vmatprep.subr.bf16.mxu0 %v486_v32  ;;  %v104_v52 = vunpack.c.l.bf16 %v103_v49  ;;  %v142_v45 = vld [vmem:[%s618_s4] sm:$0x1] }
   0x7   :  { %478 = vmatprep.subr.bf16.mxu1 %v488_v33  ;;  %v98_v53 = vrot.slane %v94_v50, %v586_v51 }
   0x8   :  { %471 = vmatpush3.bf16.msra.mxu0 %v486_v32  ;;  %v108_v55 = vrot.slane %v104_v52, %v586_v51 }
   0x9   :  { %44 = vadd.xlane.f32.xlu0 %v43_v8  ;;  %50 = vadd.xlane.f32.xlu1 %v49_v9 }
   0xa   :  { %479 = vmatpush3.bf16.msra.mxu1 %v488_v33 }
  0x8e   :  { %v42_v10 = vpop.xlane.xlu0 %41  ;;  %v48_v11 = vpop.xlane.xlu1 %47 }
  0x8f   :  { %v53_v12 = vmul.f32 0.03125, %v42_v10  ;;  %v55_v13 = vmul.f32 0.03125, %v48_v11 }
  0x91   :  { %v57_v14 = vsub.f32 %v442_v2, %v53_v12  ;;  %v556_v15 = vsub.f32 %v446_v3, %v55_v13  ;;  %v230_v13 = vld [vmem:[%s620_s6] sm:$0x1] }
  0x92   :  { %v45_v16 = vpop.xlane.xlu0 %44  ;;  %v51_v17 = vpop.xlane.xlu1 %50 }
  0x93   :  { %v54_v18 = vmul.f32 0.03125, %v45_v16  ;;  %v56_v19 = vmul.f32 0.03125, %v51_v17  ;;  %v61_v20 = vmul.f32 %v57_v14, %v57_v14  ;;  %v63_v21 = vmul.f32 %v556_v15, %v556_v15 }
  0x95   :  { %v58_v22 = vsub.f32 %v443_v4, %v54_v18  ;;  %v560_v23 = vsub.f32 %v447_v5, %v56_v19  ;;  %v65_v24 = vsel %vm39_vm0, %v61_v20, 0.0  ;;  %v71_v25 = vsel %vm39_vm0, %v63_v21, 0.0 }
  0x96   :  { %66 = vadd.xlane.f32.xlu0 %v65_v24 }
  0x97   :  { %v62_v26 = vmul.f32 %v58_v22, %v58_v22  ;;  %v64_v27 = vmul.f32 %v560_v23, %v560_v23 }
  0x99   :  { %v68_v28 = vsel %vm39_vm0, %v62_v26, 0.0  ;;  %v74_v29 = vsel %vm39_vm0, %v64_v27, 0.0 }
  0x9a   :  { %72 = vadd.xlane.f32.xlu0 %v71_v25  ;;  %69 = vadd.xlane.f32.xlu1 %v68_v28 }
  0x9e   :  { %75 = vadd.xlane.f32.xlu1 %v74_v29 }
 0x11f   :  { %v67_v34 = vpop.xlane.xlu0 %66 }
 0x120   :  { %v77_v35 = vmul.f32 0.03125, %v67_v34 }
 0x122   :  { %v81_v36 = vadd.f32 1e-05, %v77_v35 }
 0x123   :  { %v70_v37 = vpop.xlane.xlu1 %69  ;;  %v73_v38 = vpop.xlane.xlu0 %72 }
 0x124   :  { %490 = vrsqrt.f32 %v81_v36  ;;  %v78_v40 = vmul.f32 0.03125, %v70_v37  ;;  %v79_v41 = vmul.f32 0.03125, %v73_v38 }
 0x126   :  { %v82_v42 = vadd.f32 1e-05, %v78_v40  ;;  %v83_v43 = vadd.f32 1e-05, %v79_v41 }
 0x127   :  { %v76_v44 = vpop.xlane.xlu1 %75 }
 0x128   :  { %492 = vrsqrt.f32 %v82_v42  ;;  %v80_v46 = vmul.f32 0.03125, %v76_v44 }
 0x129   :  { %494 = vrsqrt.f32 %v83_v43 }
 0x12a   :  { %v84_v48 = vadd.f32 1e-05, %v80_v46 }
 0x12c   :  { %496 = vrsqrt.f32 %v84_v48  ;;  %v143_v48 = vunpack.c.l.bf16 %v142_v45 }
 0x131   :  { %v491_v54 = vpop.eup %490 }
 0x132   :  { %v89_v56 = vmul.f32 %v491_v54, %v57_v14  ;;  %v231_v14 = vunpack.c.l.bf16 %v230_v13  ;;  %v147_v54 = vrot.slane %v143_v48, %v586_v51 }
 0x134   :  { %v99_v57 = vmul.f32 %v98_v53, %v89_v56 }
 0x135   :  { %v493_v58 = vpop.eup %492 }
 0x136   :  { %v495_v59 = vpop.eup %494  ;;  %v109_v60 = vadd.f32 %v108_v55, %v99_v57  ;;  %v90_v61 = vmul.f32 %v493_v58, %v58_v22 }
 0x137   :  { %v91_v62 = vmul.f32 %v495_v59, %v556_v15  ;;  %v235_v15 = vrot.slane %v231_v14, %v586_v51 }
 0x138   :  { %v432_v63 = vpack.c.bf16 %v109_v60, %v109_v60  ;;  %v100_v0 = vmul.f32 %v98_v53, %v90_v61 }
 0x139   :  { %v497_v1 = vpop.eup %496  ;;  %v101_v2 = vmul.f32 %v98_v53, %v91_v62 }
 0x13a   :  { %130 = vst.msk [vmem:[#allocation2] sm:$0xf] %vm129_vm1, %v432_v63  ;;  %v110_v3 = vadd.f32 %v108_v55, %v100_v0  ;;  %v92_v4 = vmul.f32 %v497_v1, %v560_v23 }
 0x13b   :  { %v111_v5 = vadd.f32 %v108_v55, %v101_v2 }
 0x13c   :  { %v433_v6 = vpack.c.bf16 %v110_v3, %v110_v3  ;;  %v102_v7 = vmul.f32 %v98_v53, %v92_v4 }
 0x13d   :  { %v434_v8 = vpack.c.bf16 %v111_v5, %v111_v5 }
 0x13e   :  { %131 = vst.msk [vmem:[#allocation2 + $0x4] sm:$0xf] %vm129_vm1, %v433_v6  ;;  %v112_v9 = vadd.f32 %v108_v55, %v102_v7 }
 0x13f   :  { %132 = vst.msk [vmem:[#allocation2 + $0x8] sm:$0xf] %vm129_vm1, %v434_v8 }
 0x140   :  { %v435_v10 = vpack.c.bf16 %v112_v9, %v112_v9 }
 0x142   :  { %133 = vst.msk [vmem:[#allocation2 + $0xc] sm:$0xf] %vm129_vm1, %v435_v10 }
 0x145   :  { %v487_v11 = vld [vmem:[#allocation2] sm:$0xff]  }
 0x146   :  { %472 = vmatprep.mubr.msk.bf16.mxu0 %vm39_vm0, %v487_v11  ;;  %480 = vmatprep.mubr.msk.bf16.mxu1 %vm39_vm0, %v487_v11 }
 0x149   :  { %v489_v12 = vld [vmem:[#allocation2 + $0x8] sm:$0xff]  }
 0x14a   :  { %473 = vmatmul.mubr.msk.bf16.vlgmr.msra.gmra.mxu0 %vm39_vm0, %v489_v12  ;;  %481 = vmatmul.mubr.msk.bf16.vlgmr.msra.gmra.mxu1 %vm39_vm0, %v489_v12 }
 0x20a   :  { %v482_v16 = vpop.f32.mrf.mxu1  ;;  %v474_v44 = vpop.f32.mrf.mxu0 }
 0x20b   :  { %v291_v17 = vadd.f32 %v482_v16, %v235_v15  ;;  %v220_v2 = vadd.f32 %v474_v44, %v147_v54 }
 0x20c   :  { %v282_v18 = vpop.f32.mrf.mxu1  ;;  %v211_v46 = vpop.f32.mrf.mxu0 }
 0x20d   :  { %v303_v19 = vmul.f32 0.044715, %v291_v17  ;;  %v283_v20 = vadd.f32 %v282_v18, %v235_v15  ;;  %v299_v55 = vmul.f32 0.5, %v291_v17  ;;  %v212_v5 = vadd.f32 %v211_v46, %v147_v54 }
 0x20e   :  { %v483_v21 = vpop.f32.mrf.mxu1  ;;  %v475_v52 = vpop.f32.mrf.mxu0 }
 0x20f   :  { %v307_v22 = vmul.f32 %v303_v19, %v291_v17  ;;  %v301_v23 = vmul.f32 0.044715, %v283_v20  ;;  %v294_v24 = vadd.f32 %v483_v21, %v235_v15  ;;  %v297_v57 = vmul.f32 0.5, %v283_v20 }
 0x210   :  { %v285_v25 = vpop.f32.mrf.mxu1  ;;  %v214_v62 = vpop.f32.mrf.mxu0  ;;  %v223_v3 = vadd.f32 %v475_v52, %v147_v54 }
 0x211   :  { %v311_v26 = vmul.f32 %v307_v22, %v291_v17  ;;  %v305_v27 = vmul.f32 %v301_v23, %v283_v20  ;;  %v286_v28 = vadd.f32 %v285_v25, %v235_v15  ;;  %v304_v29 = vmul.f32 0.044715, %v294_v24 }
 0x212   :  { %v300_v60 = vmul.f32 0.5, %v294_v24  ;;  %v215_v6 = vadd.f32 %v214_v62, %v147_v54 }
 0x213   :  { %v315_v30 = vadd.f32 %v311_v26, %v291_v17  ;;  %v309_v31 = vmul.f32 %v305_v27, %v283_v20  ;;  %v302_v32 = vmul.f32 0.044715, %v286_v28  ;;  %v308_v33 = vmul.f32 %v304_v29, %v294_v24 }
 0x214   :  { %v298_v0 = vmul.f32 0.5, %v286_v28 }
 0x215   :  { %v319_v34 = vmul.f32 0.7978846, %v315_v30  ;;  %v313_v35 = vadd.f32 %v309_v31, %v283_v20  ;;  %v306_v36 = vmul.f32 %v302_v32, %v286_v28  ;;  %v312_v37 = vmul.f32 %v308_v33, %v294_v24 }
 0x217   :  { %498 = vtanh.f32 %v319_v34  ;;  %v317_v38 = vmul.f32 0.7978846, %v313_v35  ;;  %v310_v39 = vmul.f32 %v306_v36, %v286_v28  ;;  %v316_v40 = vadd.f32 %v312_v37, %v294_v24 }
 0x219   :  { %500 = vtanh.f32 %v317_v38  ;;  %v314_v41 = vadd.f32 %v310_v39, %v286_v28  ;;  %v320_v42 = vmul.f32 0.7978846, %v316_v40 }
 0x21b   :  { %v318_v43 = vmul.f32 0.7978846, %v314_v41  ;;  %502 = vtanh.f32 %v320_v42 }
 0x21d   :  { %504 = vtanh.f32 %v318_v43 }
 0x224   :  { %v499_v47 = vpop.eup %498 }
 0x225   :  { %v327_v50 = vadd.f32 1.0, %v499_v47 }
 0x226   :  { %v501_v49 = vpop.eup %500 }
 0x227   :  { %v325_v53 = vadd.f32 1.0, %v501_v49  ;;  %v331_v59 = vmul.f32 %v327_v50, %v299_v55 }
 0x228   :  { %v503_v56 = vpop.eup %502 }
 0x229   :  { %v328_v61 = vadd.f32 1.0, %v503_v56  ;;  %v329_v63 = vmul.f32 %v325_v53, %v297_v57  ;;  %v335_v8 = vmul.f32 %v331_v59, %v220_v2 }
 0x22a   :  { %v505_v58 = vpop.eup %504 }
 0x22b   :  { %v326_v1 = vadd.f32 1.0, %v505_v58  ;;  %v332_v4 = vmul.f32 %v328_v61, %v300_v60  ;;  %v333_v51 = vmul.f32 %v329_v63, %v212_v5 }
 0x22d   :  { %v330_v7 = vmul.f32 %v326_v1, %v298_v0  ;;  %v336_v9 = vmul.f32 %v332_v4, %v223_v3 }
 0x22f   :  { %v334_v10 = vmul.f32 %v330_v7, %v215_v6  ;;  %v456_v11 = vpack.c.bf16 %v336_v9, %v335_v8 }
 0x231   :  { %v451_v12 = vpack.c.bf16 %v334_v10, %v333_v51  ;;  %459 = vst [vmem:[#allocation3 + $0x8] sm:$0xff] %v456_v11  }
 0x233   :  { %452 = vst [vmem:[#allocation3] sm:$0xff] %v451_v12  }
 0x238   :  { %v379_v13 = vld [vmem:[#allocation3 + $0x8] sm:$0xf] }
 0x239   :  { %380 = vst [vmem:[%s621_s7 + $0x8] sm:$0xf] %v379_v13 }
 0x23a   :  { %v375_v14 = vld [vmem:[#allocation3] sm:$0xff]  }
 0x23b   :  { %376 = vst [vmem:[%s621_s7] sm:$0xff] %v375_v14  }

// kernel: timesformer_forward.26
= control target key start
LH: loop header
LB: loop body
LE: loop exit
PB: predicated region body
PF: predicated region fallthrough
CT: control target
= control target key end

     0   :  { %v176_v10 = vlaneseq  ;;  %s421_s0 = inlined_call_operand.vmem [shape: bf16[18,128], index: 0, kind: input, shape index: {}]   ;;  %s422_s1 = inlined_call_operand.vmem [shape: bf16[128,32], index: 1, kind: input, shape index: {}]   ;;  %s423_s2 = inlined_call_operand.vmem [shape: bf16[1,32], index: 2, kind: input, shape index: {}]   ;;  %s424_s3 = inlined_call_operand.vmem [shape: bf16[18,32], index: 3, kind: input, shape index: {}]   ;;  %s425_s4 = inlined_call_operand.vmem [shape: bf16[18,32], index: 4, kind: output, shape index: {}]  }
   0x1   :  { %v341_v0 = vld [vmem:[%s422_s1 + $0x38] sm:$0xff]   ;;  %v342_v1 = vld [vmem:[%s422_s1 + $0x30] sm:$0xff]   ;;  %v343_v2 = vld [vmem:[%s422_s1 + $0x28] sm:$0xff]  }
   0x2   :  { %321 = vmatprep.subr.bf16.mxu0 %v341_v0  ;;  %v344_v3 = vld [vmem:[%s422_s1 + $0x20] sm:$0xff]   ;;  %v345_v5 = vld [vmem:[%s422_s1 + $0x18] sm:$0xff]   ;;  %v346_v6 = vld [vmem:[%s422_s1 + $0x10] sm:$0xff]   ;;  %v177_v11 = vshrl.u32 %v176_v10, 7 }
   0x3   :  { %322 = vmatpush3.bf16.msra.mxu0 %v341_v0  ;;  %v349_v4 = vld [vmem:[%s421_s0] sm:$0xff]   ;;  %v347_v7 = vld [vmem:[%s422_s1 + $0x8] sm:$0xff]  }
   0x4   :  { %323 = vmatprep.subr.bf16.mxu0 %v342_v1  ;;  %337 = vmatprep.mubr.bf16.mxu0 %v349_v4  ;;  %v348_v8 = vld [vmem:[%s422_s1] sm:$0xff]   ;;  %v350_v9 = vld [vmem:[%s421_s0 + $0x8] sm:$0xff]   ;;  %v178_v14 = vsub.s32 0, %v177_v11 }
   0x5   :  { %v174_v12 = vld [vmem:[%s423_s2] sm:$0x1]  ;;  %v309_v17 = vld [vmem:[%s424_s3 + $0x8] sm:$0xff]  }
   0x6   :  { %v175_v13 = vunpack.c.l.bf16 %v174_v12  ;;  %v292_v19 = vld [vmem:[%s424_s3] sm:$0xff]   ;;  %v297_v21 = vunpack.c.l.bf16 %v309_v17  ;;  %v298_v22 = vunpack.c.h.bf16 %v309_v17 }
   0x7   :  { %324 = vmatpush3.bf16.msra.mxu0 %v342_v1  ;;  %v293_v25 = vunpack.c.l.bf16 %v292_v19  ;;  %v294_v27 = vunpack.c.h.bf16 %v292_v19 }
   0x8   :  { %325 = vmatprep.subr.bf16.mxu0 %v343_v2  ;;  %v179_v15 = vrot.slane %v175_v13, %v178_v14 }
   0xb   :  { %326 = vmatpush3.bf16.msra.mxu0 %v343_v2 }
   0xc   :  { %327 = vmatprep.subr.bf16.mxu0 %v344_v3 }
   0xf   :  { %328 = vmatpush3.bf16.msra.mxu0 %v344_v3 }
  0x10   :  { %329 = vmatprep.subr.bf16.mxu0 %v345_v5 }
  0x13   :  { %330 = vmatpush3.bf16.msra.mxu0 %v345_v5 }
  0x14   :  { %331 = vmatprep.subr.bf16.mxu0 %v346_v6 }
  0x17   :  { %332 = vmatpush3.bf16.msra.mxu0 %v346_v6 }
  0x18   :  { %333 = vmatprep.subr.bf16.mxu0 %v347_v7 }
  0x1b   :  { %334 = vmatpush3.bf16.msra.mxu0 %v347_v7 }
  0x1c   :  { %335 = vmatprep.subr.bf16.mxu0 %v348_v8 }
  0x1f   :  { %336 = vmatpush3.bf16.msra.mxu0 %v348_v8 }
  0x22   :  { %338 = vmatmul.mubr.bf16.vlgmr.msra.gmra.mxu0 %v350_v9 }
  0xe2   :  { %v339_v16 = vpop.f32.mrf.mxu0 }
  0xe3   :  { %v182_v20 = vadd.f32 %v339_v16, %v179_v15 }
  0xe4   :  { %v144_v18 = vpop.f32.mrf.mxu0 }
  0xe5   :  { %v180_v24 = vadd.f32 %v179_v15, %v144_v18  ;;  %v194_v29 = vadd.f32 %v297_v21, %v182_v20 }
  0xe6   :  { %v340_v23 = vpop.f32.mrf.mxu0 }
  0xe7   :  { %v183_v26 = vadd.f32 %v340_v23, %v179_v15  ;;  %v192_v32 = vadd.f32 %v293_v25, %v180_v24 }
  0xe8   :  { %v147_v28 = vpop.f32.mrf.mxu0 }
  0xe9   :  { %v195_v30 = vadd.f32 %v298_v22, %v183_v26  ;;  %v181_v31 = vadd.f32 %v179_v15, %v147_v28 }
  0xeb   :  { %v307_v33 = vpack.c.bf16 %v195_v30, %v194_v29  ;;  %v193_v34 = vadd.f32 %v294_v27, %v181_v31 }
  0xed   :  { %310 = vst [vmem:[#allocation3 + $0x8] sm:$0xff] %v307_v33   ;;  %v302_v35 = vpack.c.bf16 %v193_v34, %v192_v32 }
  0xef   :  { %303 = vst [vmem:[#allocation3] sm:$0xff] %v302_v35  }
  0xf4   :  { %v238_v36 = vld [vmem:[#allocation3 + $0x8] sm:$0xf] }
  0xf5   :  { %239 = vst [vmem:[%s425_s4 + $0x8] sm:$0xf] %v238_v36 }
  0xf6   :  { %v234_v37 = vld [vmem:[#allocation3] sm:$0xff]  }
  0xf7   :  { %235 = vst [vmem:[%s425_s4] sm:$0xff] %v234_v37  }

// kernel: timesformer_forward.23
= control target key start
LH: loop header
LB: loop body
LE: loop exit
PB: predicated region body
PF: predicated region fallthrough
CT: control target
= control target key end

     0   :  { %s1372_s6 = smov 0   ;;  %s1718_s0 = inlined_call_operand.vmem [shape: bf16[2,9,48], index: 0, kind: input, shape index: {}]   ;;  %s1719_s1 = inlined_call_operand.vmem [shape: bf16[2,9,16], index: 1, kind: output, shape index: {}]  }
   0x1 LB: > { %s1170_s7 = sadd.s32 4294967295, %s1350_s6   ;;  %p1174_p0 = scmp.ge.s32.totalorder %s1350_s6, 1  ;;  %s1350_s6 = sphi %s1372_s6, %s11_s6  }
   0x2   : > { %p87_p1 = scmp.lt.s32.totalorder %s1350_s6, 3 }
   0x4   : > { %p88_p2 = pnand %p1174_p0, %p87_p1 }
   0x5   : > { %p107_p3 = scmp.lt.s32.totalorder (!%p88_p2), %s1170_s7, 1  ;;  %s1354_s12 = smov (!%p88_p2), 112  }
   0x6   : > { %91 = sbr.rel (%p88_p2) target bundleno = 2246 (0x8c6), region = 24  ;;  %s1356_s13 = smov (!%p88_p2), 96  }
   0x7   : > { %s1357_s14 = smov (!%p88_p2), 104   ;;  %s1358_s15 = smov (!%p88_p2), 120  }
   0x8   : > { %s1359_s16 = smov (!%p88_p2), 16   ;;  %s1360_s17 = smov (!%p88_p2), 88  }
   0x9   : > { %s1361_s21 = smov (!%p88_p2), 8  }
   0xb   : > { %s1725_s7 = smov (!%p107_p3, %s1170_s7), 1  ;;  %v1352_v0 = vmov 0.0   ;;  %vm1353_vm0 = vmmov 0   ;;  %v124_v6 = vlaneseq  ;;  %vm242_vm1 = vcmask 64512  }
   0xc   : > { %1223 = vmatprep.subr.bf16.mxu0 %v1352_v0  ;;  %1229 = vmatprep.subr.bf16.mxu1 %v1352_v0  ;;  %s1199_s8 = sshll.u32 %s1725_s7, 3  ;;  %vm293_vm2 = vcmask 61441   ;;  %vm297_vm3 = vcmask 27648   ;;  %v1355_v29 = vmov 0   ;;  %vm342_vm4 = vcmask 1041408  }
   0xd   : > { %1225 = vmatprep.mubr.msk.bf16.mxu0 %vm1353_vm0, %v1352_v0  ;;  %1231 = vmatprep.mubr.msk.bf16.mxu1 %vm1353_vm0, %v1352_v0  ;;  %s1394_s11 = scalar_lea.vmem %s1718_s0, %s1199_s8  ;;  %v125_v9 = vshrl.u32 %v124_v6, 7  ;;  %vm338_vm5 = vcmask 31744   ;;  %vm471_vm6 = vcmask 64517   ;;  %vm146_vm7 = vcmask 57344   ;;  %s1592_s20 = scalar_lea.vmem %s1719_s1, %s1199_s8 }
   0xe   : > { %v120_v1 = vld [vmem:[%s1394_s11] sm:$0xf]  ;;  %v616_v24 = vld [vmem:[%s1394_s11 + $0x4] sm:$0x1]  ;;  %1289 = vset.pattern.permute.xlu0 %v1355_v29  ;;  %1295 = vset.pattern.permute.xlu1 %v1355_v29  ;;  %vm142_vm8 = vcmask 64513   ;;  %vm483_vm9 = vcmask 1042432  }
   0xf   : > { %v1180_v2 = vcombine.low %v120_v1, %v120_v1  ;;  %v118_v5 = vld [vmem:[%s1394_s11] sm:$0x1]  ;;  %v1400_v11 = vsub.s32 0, %v125_v9  ;;  %v1410_v15 = vunpack.c.l.bf16 %v120_v1  ;;  %v121_v36 = vld [vmem:[%s1394_s11 + $0x4] sm:$0x1]  ;;  %v1457_v54 = vunpack.c.l.bf16 %v616_v24 }
  0x10   : > { %v1398_v8 = vunpack.c.l.bf16 %v118_v5  ;;  %v615_v23 = vld [vmem:[%s1394_s11] sm:$0xf]  ;;  %v1184_v37 = vcombine.low %v120_v1, %v121_v36  ;;  %v1484_v9 = vunpack.c.l.bf16 %v121_v36  ;;  %vm158_vm10 = vcmask 1047553  }
  0x11   : > { %v234_v3 = vshrl.u32 %v1180_v2, 16  ;;  %v236_v4 = vshll.u32 %v1180_v2, 16  ;;  %v1193_v26 = vcombine.low %v615_v23, %v616_v24  ;;  %v613_v32 = vld [vmem:[%s1394_s11] sm:$0x1]  ;;  %v1189_v41 = vcombine.low %v615_v23, %v615_v23 }
  0x12   : > { %v1405_v12 = vrot.slane %v1398_v8, %v1400_v11  ;;  %v1434_v34 = vunpack.c.l.bf16 %v613_v32  ;;  %v415_v39 = vshrl.u32 %v1184_v37, 16  ;;  %v418_v40 = vshll.u32 %v1184_v37, 16 }
  0x13   : > { %v238_v7 = vrot.slane %v236_v4, 1  ;;  %v910_v27 = vshrl.u32 %v1193_v26, 16  ;;  %v913_v28 = vshll.u32 %v1193_v26, 16  ;;  %v729_v45 = vshll.u32 %v1189_v41, 16 }
  0x14   : > { %v1440_v35 = vrot.slane %v1434_v34, %v1400_v11  ;;  %v417_v43 = vrot.slane %v415_v39, 2  ;;  %v420_v44 = vrot.slane %v418_v40, 3  ;;  %v727_v49 = vshrl.u32 %v1189_v41, 16 }
  0x15   : > { %v239_v10 = vor.u32 %v238_v7, %v234_v3  ;;  %v912_v30 = vrot.slane %v910_v27, 2  ;;  %v915_v31 = vrot.slane %v913_v28, 3  ;;  %v731_v50 = vrot.slane %v729_v45, 1 }
  0x16   : > { %v1451_v48 = vor.u32 %v420_v44, %v417_v43  ;;  %v1464_v57 = vunpack.c.l.bf16 %v615_v23  ;;  %vm160_vm11 = vcmask 1040384   ;;  %vm185_vm12 = vcmask 1046528  }
  0x17   : > { %240 = vrot.lane.b32.xlu0 %v239_v10, %s1354_s12  ;;  %v1432_v33 = vor.u32 %v915_v31, %v912_v30  ;;  %v1455_v52 = vor.u32 %v731_v50, %v727_v49  ;;  %vm205_vm13 = vcmask 326912   ;;  %vm225_vm14 = vsmask.f32 256 }
  0x18   : > { %vm1596_vm15 = vmand %vm146_vm7, %vm225_vm14 }
  0x1b   : > { %289 = vrot.lane.b32.xlu0 %v1405_v12, %s1354_s12 }
  0x89   : > { %v241_v13 = vpop.permute.xlu0 %240 }
  0x8a   : > { %v247_v14 = vsel %vm242_vm1, %v241_v13, 0 }
  0x8b   : > { %1224 = vmatpush3.bf16.xpose.msra.mxu0 %v247_v14 }
  0x8c   : > { %1241 = vmatprep.subr.bf16.mxu0 %v1352_v0 }
  0x8d   : > { %v1413_v16 = vpop.permute.xlu0 %289 }
  0x8e   : > { %v1417_v17 = vmul.f32 %v1413_v16, %v1410_v15 }
  0x90   : > { %v294_v18 = vsel %vm293_vm2, %v1417_v17, 0.0 }
  0x91   : > { %295 = vadd.xlane.f32.xlu1 %v294_v18 }
  0x92   : > { %1226 = vmatmul.mubr.msk.bf16.vlgmr.msra.gmra.mxu0 %vm242_vm1, %v239_v10 }
  0x93   : > { %1243 = vmatprep.mubr.msk.bf16.mxu0 %vm1353_vm0, %v1352_v0 }
 0x11a   : > { %v1445_v38 = vpop.xlane.xlu1 %295 }
 0x11b   : > { %v302_v42 = vrot.slane %v1445_v38, 1 }
 0x152   : > { %v1424_v19 = vpop.f32.mrf.mxu0 }
 0x153   : > { %v298_v20 = vsel %vm297_vm3, %v1424_v19, -inf }
 0x154   : > { %v1227_v21 = vpop.f32.mrf.mxu0  ;;  %299 = vmax.xlane.f32.xlu1 %v298_v20  ;;  %v470_v20 = vmul.f32 %v1413_v16, %v1484_v9 }
 0x155   : > { %v472_v21 = vsel %vm471_vm6, %v1417_v17, 0.0 }
 0x156   : > { %v286_v22 = vpop.f32.mrf.mxu0 }
 0x157   : > { %v475_v22 = vsel %vm146_vm7, %v470_v20, 0.0 }
 0x158   : > { %v1228_v25 = vpop.f32.mrf.mxu0 }
 0x165   : > { %331 = vrot.lane.b32.xlu1 %v239_v10, %s1356_s13 }
 0x169   : > { %919 = vrot.lane.b32.xlu1 %v1432_v33, %s1357_s14 }
 0x16d   : > { %783 = vrot.lane.b32.xlu1 %v1440_v35, %s1354_s12 }
 0x1dd   : > { %v300_v46 = vpop.xlane.xlu1 %299 }
 0x1de   : > { %v1448_v47 = vmax.f32 %v300_v46, %v302_v42 }
 0x1e0   : > { %307 = vperm.xlu0 %1289, %v1448_v47  }
 0x1e1   : > { %v332_v51 = vpop.permute.xlu1 %331 }
 0x1e2   : > { %v344_v58 = vsel %vm342_vm4, %v332_v51, 0 }
 0x1e3   : > { %1230 = vmatpush3.bf16.msra.mxu1 %v344_v58 }
 0x1e4   : > { %422 = vrot.lane.b32.xlu0 %v1451_v48, %s1354_s12  ;;  %1235 = vmatprep.subr.bf16.mxu1 %v1352_v0 }
 0x1e5   : > { %v920_v53 = vpop.permute.xlu1 %919 }
 0x1e8   : > { %735 = vrot.lane.b32.xlu0 %v1455_v52, %s1357_s14 }
 0x1e9   : > { %v784_v55 = vpop.permute.xlu1 %783 }
 0x1ea   : > { %v967_v56 = vmul.f32 %v784_v55, %v1457_v54  ;;  %v786_v59 = vmul.f32 %v784_v55, %v1464_v57 }
 0x1ec   : > { %733 = vrot.lane.b32.xlu0 %v1455_v52, %s1358_s15  ;;  %969 = vrot.lane.b32.xlu1 %v967_v56, %s1358_s15  ;;  %v1290_v56 = vpack.i.bf16 %v1434_v34, %v1398_v8 }
 0x1f0   : > { %917 = vrot.lane.b32.xlu0 %v1432_v33, %s1358_s15 }
 0x1f4   : > { %788 = vrot.lane.b32.xlu0 %v786_v59, %s1358_s15 }
 0x1f8   : > { %129 = vrot.lane.b32.xlu0 %v1405_v12, %s1359_s16 }
 0x25b   : > { %v308_v60 = vpop.permute.xlu0 %307 }
 0x25c   : > { %v310_v61 = vsub.f32 %v1424_v19, %v308_v60  ;;  %v925_v19 = vsel %vm242_vm1, %v920_v53, 0 }
 0x25e   : > { %v311_v62 = vmul.f32 1.442695, %v310_v61  ;;  %v970_v25 = vpop.permute.xlu1 %969 }
 0x25f   : > { %v423_v63 = vpop.permute.xlu0 %422  ;;  %v975_v43 = vsel %vm146_vm7, %v970_v25, 0.0 }
 0x260   : > { %1300 = vpow2.f32 %v311_v62  ;;  %v428_v5 = vsel %vm242_vm1, %v423_v63, 0 }
 0x263   : > { %v736_v1 = vpop.permute.xlu0 %735 }
 0x264   : > { %v741_v18 = vsel %vm242_vm1, %v736_v1, 0 }
 0x267   : > { %v734_v2 = vpop.permute.xlu0 %733 }
 0x26b   : > { %v918_v3 = vpop.permute.xlu0 %917 }
 0x26d   : > { %v1476_v4 = vpop.eup %1300 }
 0x26e   : > { %v325_v6 = vpack.c.bf16 %v1476_v4, %v1476_v4  ;;  %v318_v58 = vsel %vm297_vm3, %v1476_v4, 0.0 }
 0x26f   : > { %v789_v7 = vpop.permute.xlu0 %788 }
 0x270   : > { %1232 = vmatmul.mubr.msk.bf16.vlgmr.msra.gmra.mxu1 %vm338_vm5, %v325_v6  ;;  %v791_v23 = vsel %vm293_vm2, %v789_v7, 0.0  ;;  %v972_v24 = vsel %vm471_vm6, %v789_v7, 0.0  ;;  %vm604_vm6 = vcmask 60418  }
 0x271   : > { %1236 = vmatpush3.bf16.xpose.msra.mxu1 %v428_v5  ;;  %1237 = vmatprep.mubr.msk.bf16.mxu1 %vm1353_vm0, %v1352_v0 }
 0x272   : > { %1247 = vmatprep.subr.bf16.mxu1 %v1352_v0 }
 0x273   : > { %v130_v10 = vpop.permute.xlu0 %129 }
 0x274   : > { %v132_v13 = vmul.f32 %v130_v10, %v1410_v15  ;;  %v133_v14 = vmul.f32 %v130_v10, %v1484_v9 }
 0x276   : > { %138 = vrot.lane.b32.xlu0 %v133_v14, %s1354_s12  ;;  %136 = vrot.lane.b32.xlu1 %v132_v13, %s1354_s12 }
 0x278   : > { %1238 = vmatmul.mubr.msk.bf16.vlgmr.msra.gmra.mxu1 %vm242_vm1, %v1451_v48 }
 0x279   : > { %1248 = vmatpush3.bf16.xpose.msra.mxu1 %v741_v18  ;;  %1249 = vmatprep.mubr.msk.bf16.mxu1 %vm1353_vm0, %v1352_v0 }
 0x27a   : > { %1259 = vmatprep.subr.bf16.mxu1 %v1352_v0 }
 0x280   : > { %1250 = vmatmul.mubr.msk.bf16.vlgmr.msra.gmra.mxu1 %vm242_vm1, %v734_v2 }
 0x281   : > { %1260 = vmatpush3.bf16.xpose.msra.mxu1 %v925_v19  ;;  %1261 = vmatprep.mubr.msk.bf16.mxu1 %vm1353_vm0, %v1352_v0 }
 0x288   : > { %1262 = vmatmul.mubr.msk.bf16.vlgmr.msra.gmra.mxu1 %vm242_vm1, %v918_v3  ;;  %vm406_vm1 = vsmask.f32 2306 }
 0x295   : > { %473 = vadd.xlane.f32.xlu0 %v472_v21 }
 0x299   : > { %476 = vadd.xlane.f32.xlu0 %v475_v22 }
 0x29d   : > { %792 = vadd.xlane.f32.xlu0 %v791_v23 }
 0x2a1   : > { %973 = vadd.xlane.f32.xlu0 %v972_v24 }
 0x2e8   : > { %v137_v26 = vpop.permute.xlu1 %136  ;;  %v139_v44 = vpop.permute.xlu0 %138 }
 0x2e9   : > { %v143_v27 = vsel %vm142_vm8, %v137_v26, 0.0  ;;  %v147_v46 = vsel %vm146_vm7, %v139_v44, 0.0 }
 0x2ea   : > { %144 = vadd.xlane.f32.xlu1 %v143_v27 }
 0x31e   : > { %v1529_v59 = vpop.xlane.xlu0 %473 }
 0x322   : > { %v1531_v61 = vpop.xlane.xlu0 %476 }
 0x326   : > { %v1533_v62 = vpop.xlane.xlu0 %792 }
 0x32a   : > { %v1539_v2 = vpop.xlane.xlu0 %973 }
 0x32b   : > { %v983_v5 = vrot.slane %v1539_v2, 5 }
 0x330   : > { %v1508_v28 = vpop.f32.mrf.mxu1 }
 0x332   : > { %v1233_v16 = vpop.f32.mrf.mxu1 }
 0x334   : > { %v383_v17 = vpop.f32.mrf.mxu1 }
 0x336   : > { %v1234_v29 = vpop.f32.mrf.mxu1 }
 0x338   : > { %v1510_v30 = vpop.f32.mrf.mxu1 }
 0x339   : > { %v478_v31 = vsel %vm297_vm3, %v1510_v30, -inf }
 0x33a   : > { %v1239_v32 = vpop.f32.mrf.mxu1  ;;  %479 = vmax.xlane.f32.xlu1 %v478_v31 }
 0x33c   : > { %v467_v36 = vpop.f32.mrf.mxu1 }
 0x33e   : > { %v1240_v37 = vpop.f32.mrf.mxu1 }
 0x340   : > { %v1514_v39 = vpop.f32.mrf.mxu1 }
 0x341   : > { %v794_v40 = vsel %vm297_vm3, %v1514_v39, -inf }
 0x342   : > { %v1251_v41 = vpop.f32.mrf.mxu1  ;;  %795 = vmax.xlane.f32.xlu1 %v794_v40 }
 0x344   : > { %v780_v42 = vpop.f32.mrf.mxu1 }
 0x346   : > { %v1252_v45 = vpop.f32.mrf.mxu1  ;;  %976 = vadd.xlane.f32.xlu1 %v975_v43 }
 0x348   : > { %v1520_v49 = vpop.f32.mrf.mxu1 }
 0x349   : > { %v978_v50 = vsel %vm297_vm3, %v1520_v49, -inf }
 0x34a   : > { %v1263_v51 = vpop.f32.mrf.mxu1  ;;  %979 = vmax.xlane.f32.xlu0 %v978_v50  ;;  %148 = vadd.xlane.f32.xlu1 %v147_v46 }
 0x34c   : > { %v964_v53 = vpop.f32.mrf.mxu1 }
 0x34e   : > { %v1264_v55 = vpop.f32.mrf.mxu1 }
 0x360   : > { %1291 = vrot.lane.b32.xlu0 %v1290_v56, %s1354_s12 }
 0x373   : > { %v145_v60 = vpop.xlane.xlu1 %144 }
 0x374   : > { %v159_v23 = vsel %vm158_vm10, %v145_v60, -inf }
 0x37f   : > { %319 = vadd.xlane.f32.xlu0 %v318_v58 }
 0x3c3   : > { %v1535_v63 = vpop.xlane.xlu1 %479 }
 0x3cb   : > { %v1537_v1 = vpop.xlane.xlu1 %795 }
 0x3cf   : > { %v977_v3 = vpop.xlane.xlu1 %976 }
 0x3d0   : > { %v984_v6 = vrot.slane %v977_v3, 5 }
 0x3d2   : > { %v985_v4 = vsel %vm483_vm9, %v983_v5, %v984_v6 }
 0x3d3   : > { %v980_v7 = vpop.xlane.xlu0 %979  ;;  %v149_v22 = vpop.xlane.xlu1 %148 }
 0x3d4   : > { %v1543_v10 = vmax.f32 %v980_v7, %v985_v4  ;;  %v161_v24 = vsel %vm160_vm11, %v149_v22, -inf }
 0x3d5   : > { %v162_v25 = vmax.f32 %v159_v23, %v161_v24 }
 0x3d6   : > { %v996_v13 = vrot.slane %v1543_v10, 3 }
 0x3d7   : > { %v1546_v14 = vpop.permute.xlu0 %1291  ;;  %v163_v26 = vrot.slane %v162_v25, 4 }
 0x3d8   : > { %v1550_v18 = vsub.f32 %v977_v3, %v996_v13  ;;  %v1293_v19 = vunpack.i.l.bf16 %v1546_v14 }
 0x3d9   : > { %v164_v27 = vmax.f32 %v162_v25, %v163_v26 }
 0x3da   : > { %v154_v20 = vmul.f32 %v1293_v19, %v1398_v8 }
 0x3db   : > { %v165_v16 = vrot.slane %v164_v27, 2 }
 0x3dc   : > { %v155_v21 = vsel %vm146_vm7, %v154_v20, 0.0 }
 0x3dd   : > { %156 = vadd.xlane.f32.xlu1 %v155_v21  ;;  %v166_v17 = vmax.f32 %v164_v27, %v165_v16 }
 0x3df   : > { %v167_v29 = vrot.slane %v166_v17, 1 }
 0x3e1   : > { %v168_v31 = vmax.f32 %v166_v17, %v167_v29 }
 0x466   : > { %v157_v32 = vpop.xlane.xlu1 %156 }
 0x467   : > { %v169_v36 = vmax.f32 %v168_v31, %v157_v32 }
 0x469   : > { %v173_v37 = vrot.slane %v169_v36, %v1400_v11  ;;  %v180_v44 = vsub.f32 %v157_v32, %v169_v36  ;;  %v485_v36 = vrot.slane %v1531_v61, 5 }
 0x46b   : > { %v174_v40 = vsub.f32 %v145_v60, %v173_v37  ;;  %v175_v41 = vsub.f32 %v149_v22, %v173_v37  ;;  %v181_v45 = vmul.f32 1.442695, %v180_v44  ;;  %v798_v44 = vrot.slane %v1533_v62, 1 }
 0x46d   : > { %v176_v42 = vmul.f32 1.442695, %v174_v40  ;;  %v178_v43 = vmul.f32 1.442695, %v175_v41  ;;  %v484_v40 = vrot.slane %v1529_v59, 5 }
 0x46f   : > { %1302 = vpow2.f32 %v176_v42  ;;  %v486_v41 = vsel %vm483_vm9, %v484_v40, %v485_v36 }
 0x470   : > { %1304 = vpow2.f32 %v178_v43  ;;  %v1568_v42 = vmax.f32 %v1535_v63, %v486_v41  ;;  %v313_v43 = vrot.slane %v1448_v47, 7  ;;  %v320_v47 = vpop.xlane.xlu0 %319 }
 0x471   : > { %1306 = vpow2.f32 %v181_v45 }
 0x472   : > { %v315_v45 = vsub.f32 %v1445_v38, %v313_v43 }
 0x47c   : > { %v1303_v46 = vpop.eup %1302 }
 0x47d   : > { %v1305_v50 = vpop.eup %1304  ;;  %v186_v51 = vrot.slane %v1303_v46, 1  ;;  %v197_v53 = vmul.f32 %v1303_v46, %v1410_v15  ;;  %v316_v46 = vmul.f32 1.442695, %v315_v45 }
 0x47e   : > { %v187_v55 = vrot.slane %v1305_v50, 1  ;;  %v198_v56 = vmul.f32 %v1305_v50, %v1484_v9  ;;  %v1307_v25 = vpop.eup %1306 }
 0x47f   : > { %v201_v58 = vrot.slane %v197_v53, 1  ;;  %v213_v17 = vmul.f32 %v1307_v25, %v1398_v8  ;;  %v1574_v8 = vmax.f32 %v1537_v1, %v798_v44 }
 0x480   : > { %v188_v60 = vsel %vm185_vm12, %v186_v51, %v187_v55  ;;  %v202_v3 = vrot.slane %v198_v56, 1 }
 0x481   : > { %v190_v5 = vrot.slane %v188_v60, 4 }
 0x482   : > { %v203_v6 = vsel %vm185_vm12, %v201_v58, %v202_v3 }
 0x483   : > { %v191_v4 = vadd.f32 %v190_v5, %v188_v60  ;;  %v206_v7 = vsel %vm205_vm13, %v203_v6, 0.0 }
 0x484   : > { %v207_v19 = vrot.slane %v206_v7, 4 }
 0x485   : > { %v192_v20 = vrot.slane %v191_v4, 2 }
 0x486   : > { %v208_v22 = vadd.f32 %v207_v19, %v206_v7 }
 0x487   : > { %v193_v21 = vadd.f32 %v192_v20, %v191_v4 }
 0x488   : > { %v209_v24 = vrot.slane %v208_v22, 2 }
 0x489   : > { %v194_v23 = vrot.slane %v193_v21, 1 }
 0x48a   : > { %v210_v26 = vadd.f32 %v209_v24, %v208_v22 }
 0x48b   : > { %v195_v15 = vadd.f32 %v194_v23, %v193_v21 }
 0x48c   : > { %v211_v27 = vrot.slane %v210_v26, 1 }
 0x48d   : > { %v196_v9 = vadd.f32 %v1307_v25, %v195_v15 }
 0x48e   : > { %v212_v16 = vadd.f32 %v211_v27, %v210_v26 }
 0x48f   : > { %1308 = vrcp.f32 %v196_v9 }
 0x490   : > { %v214_v29 = vadd.f32 %v213_v17, %v212_v16  ;;  %1310 = vpow2.f32 %v316_v46  ;;  %v1294_v17 = vunpack.i.h.bf16 %v1546_v14 }
 0x49c   : > { %v1309_v31 = vpop.eup %1308 }
 0x49d   : > { %v216_v32 = vmul.f32 %v1309_v31, %v214_v29  ;;  %v1311_v38 = vpop.eup %1310  ;;  %v647_v31 = vmul.f32 %v1294_v17, %v1434_v34 }
 0x49e   : > { %v322_v63 = vrot.slane %v1311_v38, 1 }
 0x49f   : > { %v1201_v37 = vpack.c.bf16 %v216_v32, %v216_v32 }
 0x4a0   : > { %v324_v1 = vadd.f32 %v322_v63, %v320_v47 }
 0x4a1   : > { %221 = vrot.lane.b32.xlu1 %v1201_v37, %s1356_s13 }
 0x4a5   : > { %491 = vperm.xlu1 %1295, %v1568_v42  }
 0x4a9   : > { %803 = vperm.xlu1 %1295, %v1574_v8  }
 0x4ad   : > { %990 = vperm.xlu1 %1295, %v1543_v10  }
 0x4b1   : > { %526 = vrot.lane.b32.xlu1 %v1451_v48, %s1356_s13 }
 0x4b5   : > { %624 = vrot.lane.b32.xlu1 %v1440_v35, %s1359_s16 }
 0x4b9   : > { %827 = vrot.lane.b32.xlu1 %v1455_v52, %s1360_s17 }
 0x4bd   : > { %1025 = vrot.lane.b32.xlu1 %v1432_v33, %s1360_s17  ;;  %v227_v33 = vld [vmem:[%s1592_s20] sm:$0x1] }
 0x4c1   : > { %327 = vperm.xlu1 %1295, %v1311_v38  }
 0x4c5   : > { %388 = vperm.xlu1 %1295, %v324_v1  }
 0x513   : > { %v222_v52 = vpop.permute.xlu1 %221 }
 0x514   : > { %v228_v50 = vsel %vm1596_vm15, %v222_v52, %v227_v33 }
 0x515   : > { %229 = vst [vmem:[%s1592_s20] sm:$0x1] %v228_v50 }
 0x51c   : > { %v408_v1 = vld [vmem:[%s1592_s20] sm:$0x7] }
 0x520   : > { %v492_v51 = vpop.permute.xlu1 %491 }
 0x521   : > { %v494_v53 = vsub.f32 %v1510_v30, %v492_v51  ;;  %v998_v51 = vsub.f32 %v1539_v2, %v996_v13 }
 0x523   : > { %v495_v55 = vmul.f32 1.442695, %v494_v53 }
 0x524   : > { %v804_v56 = vpop.permute.xlu1 %803 }
 0x525   : > { %1312 = vpow2.f32 %v495_v55  ;;  %v806_v58 = vsub.f32 %v1514_v39, %v804_v56  ;;  %v1000_v55 = vmul.f32 1.442695, %v998_v51 }
 0x527   : > { %v807_v60 = vmul.f32 1.442695, %v806_v58 }
 0x528   : > { %v991_v3 = vpop.permute.xlu1 %990 }
 0x529   : > { %1314 = vpow2.f32 %v807_v60  ;;  %v993_v5 = vsub.f32 %v1520_v49, %v991_v3 }
 0x52b   : > { %v994_v7 = vmul.f32 1.442695, %v993_v5 }
 0x52c   : > { %v527_v6 = vpop.permute.xlu1 %526 }
 0x52d   : > { %v540_v4 = vsel %vm342_vm4, %v527_v6, 0  ;;  %1316 = vpow2.f32 %v994_v7 }
 0x52e   : > { %1242 = vmatpush3.bf16.msra.mxu0 %v540_v4 }
 0x52f   : > { %1253 = vmatprep.subr.bf16.mxu0 %v1352_v0 }
 0x530   : > { %v625_v19 = vpop.permute.xlu1 %624 }
 0x531   : > { %v627_v27 = vmul.f32 %v625_v19, %v1464_v57  ;;  %v628_v29 = vmul.f32 %v625_v19, %v1457_v54 }
 0x532   : > { %v1313_v20 = vpop.eup %1312 }
 0x533   : > { %v515_v30 = vpack.c.bf16 %v1313_v20, %v1313_v20  ;;  %v505_v33 = vsel %vm297_vm3, %v1313_v20, 0.0 }
 0x534   : > { %v828_v21 = vpop.permute.xlu1 %827 }
 0x535   : > { %v838_v22 = vsel %vm342_vm4, %v828_v21, 0  ;;  %1244 = vmatmul.mubr.msk.bf16.vlgmr.msra.gmra.mxu0 %vm338_vm5, %v515_v30  ;;  %v497_v21 = vrot.slane %v1568_v42, 3 }
 0x536   : > { %1254 = vmatpush3.bf16.msra.mxu0 %v838_v22  ;;  %1255 = vmatprep.mubr.msk.bf16.mxu0 %vm1353_vm0, %v1352_v0  ;;  %v1315_v39 = vpop.eup %1314 }
 0x537   : > { %1265 = vmatprep.subr.bf16.mxu0 %v1352_v0  ;;  %v821_v23 = vpack.c.bf16 %v1315_v39, %v1315_v39  ;;  %v814_v53 = vsel %vm297_vm3, %v1315_v39, 0.0  ;;  %v499_v22 = vsub.f32 %v1529_v59, %v497_v21  ;;  %v500_v39 = vsub.f32 %v1531_v61, %v497_v21 }
 0x538   : > { %v1026_v49 = vpop.permute.xlu1 %1025 }
 0x539   : > { %v1039_v24 = vsel %vm342_vm4, %v1026_v49, 0  ;;  %v501_v49 = vmul.f32 1.442695, %v499_v22  ;;  %vm718_vm4 = vcmask 122944  }
 0x53a   : > { %v1317_v26 = vpop.eup %1316 }
 0x53b   : > { %v1014_v16 = vpack.c.bf16 %v1317_v26, %v1317_v26  ;;  %v1004_v56 = vsel %vm297_vm3, %v1317_v26, 0.0  ;;  %vm699_vm3 = vcmask 392512  }
 0x53c   : > { %v328_v15 = vpop.permute.xlu1 %327 }
 0x53d   : > { %v330_v25 = vmul.f32 %v328_v15, %v1405_v12  ;;  %1256 = vmatmul.mubr.msk.bf16.vlgmr.msra.gmra.mxu0 %vm338_vm5, %v821_v23  ;;  %v503_v23 = vmul.f32 1.442695, %v500_v39  ;;  %v809_v39 = vrot.slane %v1574_v8, 7 }
 0x53e   : > { %1266 = vmatpush3.bf16.msra.mxu0 %v1039_v24  ;;  %1267 = vmatprep.mubr.msk.bf16.mxu0 %vm1353_vm0, %v1352_v0  ;;  %vm405_vm0 = vcmask 59392  }
 0x53f   : > { %v334_v9 = vrot.slane %v330_v25, 1  ;;  %vm407_vm2 = vmand %vm405_vm0, %vm406_vm1 }
 0x540   : > { %v389_v0 = vpop.permute.xlu1 %388 }
 0x541   : > { %335 = vrot.lane.b32.xlu0 %v334_v9, %s1356_s13  ;;  %1318 = vrcp.f32 %v389_v0 }
 0x542   : > { %1320 = vpow2.f32 %v1000_v55 }
 0x543   : > { %1322 = vpow2.f32 %v501_v49 }
 0x544   : > { %1324 = vpow2.f32 %v503_v23  ;;  %v811_v23 = vsub.f32 %v1533_v62, %v809_v39 }
 0x545   : > { %1268 = vmatmul.mubr.msk.bf16.vlgmr.msra.gmra.mxu0 %vm338_vm5, %v1014_v16  ;;  %631 = vrot.lane.b32.xlu0 %v627_v27, %s1357_s14  ;;  %vm1674_vm5 = vmand %vm718_vm4, %vm225_vm14 }
 0x549   : > { %633 = vrot.lane.b32.xlu0 %v628_v29, %s1357_s14 }
 0x54d   : > { %649 = vrot.lane.b32.xlu0 %v647_v31, %s1358_s15 }
 0x54e   : > { %v1319_v37 = vpop.eup %1318 }
 0x54f   : > { %v1641_v58 = vpop.eup %1320 }
 0x550   : > { %v1653_v15 = vpop.eup %1322 }
 0x551   : > { %v1655_v24 = vpop.eup %1324  ;;  %v510_v26 = vrot.slane %v1653_v15, 5 }
 0x552   : > { %v511_v27 = vrot.slane %v1655_v24, 5 }
 0x554   : > { %v512_v17 = vsel %vm483_vm9, %v510_v26, %v511_v27  ;;  %v812_v26 = vmul.f32 1.442695, %v811_v23  ;;  %v1009_v23 = vrot.slane %v1641_v58, 5 }
 0x5b3   : > { %v336_v32 = vpop.permute.xlu0 %335 }
 0x5b4   : > { %v381_v36 = vadd.f32 %v1508_v28, %v336_v32 }
 0x5b6   : > { %v392_v40 = vmul.f32 %v1319_v37, %v381_v36 }
 0x5b7   : > { %v632_v41 = vpop.permute.xlu0 %631 }
 0x5b8   : > { %v1202_v43 = vpack.c.bf16 %v392_v40, %v392_v40  ;;  %v637_v14 = vsel %vm142_vm8, %v632_v41, 0.0 }
 0x5b9   : > { %638 = vadd.xlane.f32.xlu0 %v637_v14 }
 0x5ba   : > { %v398_v44 = vshrl.u32 %v1202_v43, 16  ;;  %v401_v38 = vshll.u32 %v1202_v43, 16 }
 0x5bb   : > { %v634_v45 = vpop.permute.xlu0 %633 }
 0x5bc   : > { %v400_v46 = vrot.slane %v398_v44, 7  ;;  %v640_v47 = vsel %vm146_vm7, %v634_v45, 0.0 }
 0x5bd   : > { %641 = vadd.xlane.f32.xlu1 %v640_v47 }
 0x5be   : > { %v403_v28 = vor.u32 %v401_v38, %v400_v46 }
 0x5bf   : > { %v650_v63 = vpop.permute.xlu0 %649 }
 0x5c0   : > { %v652_v52 = vsel %vm146_vm7, %v650_v63, 0.0  ;;  %v409_v50 = vsel %vm407_vm2, %v403_v28, %v408_v1  ;;  %vm605_vm7 = vsmask.f32 7946 }
 0x5c1   : > { %506 = vadd.xlane.f32.xlu1 %v505_v33  ;;  %653 = vadd.xlane.f32.xlu0 %v652_v52  ;;  %410 = vst [vmem:[%s1592_s20] sm:$0x7] %v409_v50  ;;  %vm606_vm8 = vmand %vm604_vm6, %vm605_vm7 }
 0x5c5   : > { %815 = vadd.xlane.f32.xlu1 %v814_v53 }
 0x5c9   : > { %1005 = vadd.xlane.f32.xlu1 %v1004_v56 }
 0x5da   : > { %1016 = vperm.xlu1 %1295, %v1641_v58  }
 0x5f5   : > { %v1644_v60 = vpop.f32.mrf.mxu0 }
 0x5f7   : > { %v1245_v3 = vpop.f32.mrf.mxu0 }
 0x5f9   : > { %v579_v5 = vpop.f32.mrf.mxu0 }
 0x5fb   : > { %v1246_v6 = vpop.f32.mrf.mxu0 }
 0x5fd   : > { %v1646_v10 = vpop.f32.mrf.mxu0 }
 0x5ff   : > { %v1257_v2 = vpop.f32.mrf.mxu0 }
 0x601   : > { %v877_v13 = vpop.f32.mrf.mxu0 }
 0x603   : > { %v1258_v4 = vpop.f32.mrf.mxu0 }
 0x605   : > { %v1648_v7 = vpop.f32.mrf.mxu0 }
 0x607   : > { %v1269_v19 = vpop.f32.mrf.mxu0 }
 0x609   : > { %v1078_v20 = vpop.f32.mrf.mxu0 }
 0x60b   : > { %v1270_v30 = vpop.f32.mrf.mxu0 }
 0x642   : > { %v639_v25 = vpop.xlane.xlu0 %638 }
 0x643   : > { %v655_v42 = vsel %vm158_vm10, %v639_v25, -inf  ;;  %vm901_vm10 = vcmask 124992  }
 0x646   : > { %v642_v9 = vpop.xlane.xlu1 %641 }
 0x647   : > { %v656_v59 = vsel %vm160_vm11, %v642_v9, -inf  ;;  %vm902_vm11 = vmand %vm901_vm10, %vm406_vm1 }
 0x648   : > { %v657_v16 = vmax.f32 %v655_v42, %v656_v59 }
 0x64a   : > { %v658_v61 = vrot.slane %v657_v16, 4  ;;  %v507_v29 = vpop.xlane.xlu1 %506  ;;  %v654_v41 = vpop.xlane.xlu0 %653 }
 0x64b   : > { %v514_v31 = vadd.f32 %v512_v17, %v507_v29  ;;  %v1002_v29 = vmul.f32 1.442695, %v1550_v18 }
 0x64c   : > { %v659_v0 = vmax.f32 %v657_v16, %v658_v61 }
 0x64d   : > { %584 = vperm.xlu1 %1295, %v514_v31  }
 0x64e   : > { %v660_v32 = vrot.slane %v659_v0, 2  ;;  %v816_v18 = vpop.xlane.xlu1 %815 }
 0x650   : > { %v661_v36 = vmax.f32 %v659_v0, %v660_v32 }
 0x652   : > { %v662_v37 = vrot.slane %v661_v36, 1 }
 0x654   : > { %v663_v40 = vmax.f32 %v661_v36, %v662_v37 }
 0x656   : > { %v664_v43 = vmax.f32 %v663_v40, %v654_v41 }
 0x658   : > { %v668_v14 = vrot.slane %v664_v43, %v1400_v11  ;;  %v675_v47 = vsub.f32 %v654_v41, %v664_v43 }
 0x65a   : > { %v669_v44 = vsub.f32 %v639_v25, %v668_v14  ;;  %v670_v45 = vsub.f32 %v642_v9, %v668_v14  ;;  %v676_v28 = vmul.f32 1.442695, %v675_v47 }
 0x65c   : > { %v671_v46 = vmul.f32 1.442695, %v669_v44  ;;  %v673_v38 = vmul.f32 1.442695, %v670_v45 }
 0x65e   : > { %1326 = vpow2.f32 %v671_v46 }
 0x65f   : > { %1328 = vpow2.f32 %v673_v38 }
 0x660   : > { %1330 = vpow2.f32 %v676_v28 }
 0x66b   : > { %v1327_v63 = vpop.eup %1326 }
 0x66c   : > { %v1329_v1 = vpop.eup %1328  ;;  %v680_v33 = vrot.slane %v1327_v63, 1  ;;  %v691_v52 = vmul.f32 %v1327_v63, %v1464_v57 }
 0x66d   : > { %v681_v50 = vrot.slane %v1329_v1, 1  ;;  %v692_v51 = vmul.f32 %v1329_v1, %v1457_v54  ;;  %v1331_v21 = vpop.eup %1330 }
 0x66e   : > { %v695_v53 = vrot.slane %v691_v52, 1  ;;  %v707_v9 = vmul.f32 %v1331_v21, %v1434_v34  ;;  %v720_v34 = vld [vmem:[%s1592_s20] sm:$0x1] }
 0x66f   : > { %v682_v11 = vsel %vm185_vm12, %v680_v33, %v681_v50  ;;  %v696_v55 = vrot.slane %v692_v51, 1 }
 0x670   : > { %v684_v56 = vrot.slane %v682_v11, 4 }
 0x671   : > { %v697_v3 = vsel %vm185_vm12, %v695_v53, %v696_v55 }
 0x672   : > { %v685_v5 = vadd.f32 %v684_v56, %v682_v11  ;;  %v700_v6 = vsel %vm699_vm3, %v697_v3, 0.0  ;;  %v610_v11 = vld [vmem:[%s1592_s20 + $0x4] sm:$0x1] }
 0x673   : > { %v701_v2 = vrot.slane %v700_v6, 4 }
 0x674   : > { %v686_v13 = vrot.slane %v685_v5, 2 }
 0x675   : > { %v702_v19 = vadd.f32 %v701_v2, %v700_v6 }
 0x676   : > { %v687_v4 = vadd.f32 %v686_v13, %v685_v5  ;;  %v607_v5 = vld [vmem:[%s1592_s20] sm:$0xc] }
 0x677   : > { %v703_v30 = vrot.slane %v702_v19, 2 }
 0x678   : > { %v688_v20 = vrot.slane %v687_v4, 1 }
 0x679   : > { %v704_v22 = vadd.f32 %v703_v30, %v702_v19 }
 0x67a   : > { %v689_v57 = vadd.f32 %v688_v20, %v687_v4 }
 0x67b   : > { %v705_v49 = vrot.slane %v704_v22, 1 }
 0x67c   : > { %v690_v54 = vadd.f32 %v1331_v21, %v689_v57 }
 0x67d   : > { %v706_v25 = vadd.f32 %v705_v49, %v704_v22 }
 0x67e   : > { %1332 = vrcp.f32 %v690_v54 }
 0x67f   : > { %v708_v27 = vadd.f32 %v707_v9, %v706_v25  ;;  %1334 = vpow2.f32 %v812_v26 }
 0x680   : > { %1336 = vpow2.f32 %v1002_v29 }
 0x68b   : > { %v1333_v42 = vpop.eup %1332 }
 0x68c   : > { %v710_v59 = vmul.f32 %v1333_v42, %v708_v27  ;;  %v1335_v8 = vpop.eup %1334 }
 0x68d   : > { %v1337_v43 = vpop.eup %1336  ;;  %v818_v44 = vrot.slane %v1335_v8, 1 }
 0x68e   : > { %v1204_v16 = vpack.c.bf16 %v710_v59, %v710_v59  ;;  %v1010_v25 = vrot.slane %v1337_v43, 5 }
 0x68f   : > { %v820_v45 = vadd.f32 %v818_v44, %v816_v18 }
 0x690   : > { %715 = vrot.lane.b32.xlu0 %v1204_v16, %s1356_s13  ;;  %v1011_v26 = vsel %vm483_vm9, %v1009_v23, %v1010_v25 }
 0x694   : > { %517 = vperm.xlu0 %1289, %v1653_v15  }
 0x698   : > { %521 = vperm.xlu0 %1289, %v1655_v24  }
 0x69c   : > { %823 = vperm.xlu0 %1289, %v1335_v8  }
 0x702   : > { %v716_v61 = vpop.permute.xlu0 %715 }
 0x703   : > { %v721_v17 = vsel %vm1674_vm5, %v716_v61, %v720_v34 }
 0x704   : > { %722 = vst [vmem:[%s1592_s20] sm:$0x1] %v721_v17 }
 0x70f   : > { %v518_v15 = vpop.permute.xlu0 %517 }
 0x710   : > { %v524_v24 = vmul.f32 %v518_v15, %v1405_v12 }
 0x712   : > { %v530_v32 = vrot.slane %v524_v24, 5 }
 0x713   : > { %v522_v31 = vpop.permute.xlu0 %521 }
 0x714   : > { %v525_v0 = vmul.f32 %v522_v31, %v1405_v12  ;;  %v1006_v12 = vpop.xlane.xlu1 %1005 }
 0x715   : > { %v1013_v27 = vadd.f32 %v1011_v26, %v1006_v12 }
 0x716   : > { %v531_v36 = vrot.slane %v525_v0, 5 }
 0x717   : > { %v824_v37 = vpop.permute.xlu0 %823 }
 0x718   : > { %v532_v40 = vsel %vm483_vm9, %v530_v32, %v531_v36  ;;  %v826_v41 = vmul.f32 %v824_v37, %v1440_v35  ;;  %v1017_v46 = vpop.permute.xlu1 %1016 }
 0x719   : > { %533 = vrot.lane.b32.xlu0 %v532_v40, %s1356_s13  ;;  %v1023_v3 = vmul.f32 %v1017_v46, %v1440_v35 }
 0x71a   : > { %v830_v14 = vrot.slane %v826_v41, 1 }
 0x71b   : > { %v1029_v4 = vrot.slane %v1023_v3, 5 }
 0x71c   : > { %v585_v38 = vpop.permute.xlu1 %584 }
 0x71d   : > { %1020 = vperm.xlu0 %1289, %v1337_v43   ;;  %1338 = vrcp.f32 %v585_v38 }
 0x721   : > { %831 = vrot.lane.b32.xlu0 %v830_v14, %s1360_s17 }
 0x725   : > { %882 = vperm.xlu0 %1289, %v820_v45  }
 0x72a   : > { %v1339_v63 = vpop.eup %1338 }
 0x78b   : > { %v534_v47 = vpop.permute.xlu0 %533 }
 0x78c   : > { %v577_v28 = vadd.f32 %v1644_v60, %v534_v47 }
 0x78e   : > { %v588_v1 = vmul.f32 %v1339_v63, %v577_v28 }
 0x790   : > { %v1203_v33 = vpack.c.bf16 %v588_v1, %v588_v1 }
 0x792   : > { %v594_v52 = vshrl.u32 %v1203_v33, 16  ;;  %v597_v50 = vshll.u32 %v1203_v33, 16 }
 0x794   : > { %v596_v51 = vrot.slane %v594_v52, 5  ;;  %v599_v53 = vrot.slane %v597_v50, 6 }
 0x796   : > { %v600_v55 = vor.u32 %v599_v53, %v596_v51  ;;  %v601_v56 = vrot.slane %v596_v51, 4 }
 0x798   : > { %v611_v60 = vsel %vm1596_vm15, %v601_v56, %v610_v11  ;;  %v1021_v6 = vpop.permute.xlu0 %1020  ;;  %v608_v2 = vsel %vm606_vm8, %v600_v55, %v607_v5 }
 0x799   : > { %612 = vst [vmem:[%s1592_s20 + $0x4] sm:$0x1] %v611_v60  ;;  %v1024_v13 = vmul.f32 %v1021_v6, %v1440_v35  ;;  %609 = vst [vmem:[%s1592_s20] sm:$0xc] %v608_v2 }
 0x79b   : > { %v1030_v19 = vrot.slane %v1024_v13, 5 }
 0x79c   : > { %v832_v20 = vpop.permute.xlu0 %831 }
 0x79d   : > { %v1031_v57 = vsel %vm483_vm9, %v1029_v4, %v1030_v19  ;;  %v875_v21 = vadd.f32 %v1646_v10, %v832_v20  ;;  %vm1107_vm9 = vcmask 126018  }
 0x79e   : > { %1032 = vrot.lane.b32.xlu1 %v1031_v57, %s1360_s17  ;;  %vm1108_vm12 = vmand %vm1107_vm9, %vm605_vm7 }
 0x7a0   : > { %v883_v30 = vpop.permute.xlu0 %882  ;;  %v903_v42 = vld [vmem:[%s1592_s20] sm:$0x7]  ;;  %v1112_v36 = vld [vmem:[%s1592_s20 + $0x4] sm:$0x1] }
 0x7a1   : > { %1340 = vrcp.f32 %v883_v30 }
 0x7ae   : > { %v1341_v54 = vpop.eup %1340 }
 0x7af   : > { %v886_v48 = vmul.f32 %v1341_v54, %v875_v21 }
 0x7b1   : > { %v1205_v22 = vpack.c.bf16 %v886_v48, %v886_v48 }
 0x7b3   : > { %v892_v39 = vshrl.u32 %v1205_v22, 16  ;;  %v895_v35 = vshll.u32 %v1205_v22, 16 }
 0x7b5   : > { %v894_v49 = vrot.slane %v892_v39, 7 }
 0x7b7   : > { %v897_v9 = vor.u32 %v895_v35, %v894_v49 }
 0x7b9   : > { %898 = vrot.lane.b32.xlu0 %v897_v9, %s1361_s21 }
 0x7bd   : > { %1083 = vperm.xlu0 %1289, %v1013_v27  }
 0x810   : > { %v1033_v8 = vpop.permute.xlu1 %1032 }
 0x811   : > { %v1076_v58 = vadd.f32 %v1648_v7, %v1033_v8 }
 0x82b   : > { %v899_v10 = vpop.permute.xlu0 %898 }
 0x82c   : > { %v904_v59 = vsel %vm902_vm11, %v899_v10, %v903_v42 }
 0x82d   : > { %905 = vst [vmem:[%s1592_s20] sm:$0x7] %v904_v59 }
 0x834   : > { %v1109_v7 = vld [vmem:[%s1592_s20] sm:$0xc] }
 0x838   : > { %v1084_v16 = vpop.permute.xlu0 %1083 }
 0x839   : > { %1342 = vrcp.f32 %v1084_v16 }
 0x846   : > { %v1343_v34 = vpop.eup %1342 }
 0x847   : > { %v1087_v61 = vmul.f32 %v1343_v34, %v1076_v58 }
 0x849   : > { %v1206_v17 = vpack.c.bf16 %v1087_v61, %v1087_v61 }
 0x84b   : > { %v1093_v29 = vshrl.u32 %v1206_v17, 16  ;;  %v1096_v15 = vshll.u32 %v1206_v17, 16 }
 0x84d   : > { %v1095_v24 = vrot.slane %v1093_v29, 5  ;;  %v1098_v31 = vrot.slane %v1096_v15, 6 }
 0x84f   : > { %v1100_v0 = vrot.slane %v1095_v24, 4  ;;  %v1099_v32 = vor.u32 %v1098_v31, %v1095_v24 }
 0x851   : > { %1103 = vrot.lane.b32.xlu0 %v1100_v0, %s1361_s21  ;;  %1101 = vrot.lane.b32.xlu1 %v1099_v32, %s1361_s21 }
 0x8c3   : > { %v1104_v37 = vpop.permute.xlu0 %1103  ;;  %v1102_v40 = vpop.permute.xlu1 %1101 }
 0x8c4   : > { %v1113_v41 = vsel %vm1674_vm5, %v1104_v37, %v1112_v36  ;;  %v1110_v43 = vsel %vm1108_vm12, %v1102_v40, %v1109_v7 }
 0x8c5   : > { %1114 = vst [vmem:[%s1592_s20 + $0x4] sm:$0x1] %v1113_v41  ;;  %1111 = vst [vmem:[%s1592_s20] sm:$0xc] %v1110_v43 }
 0x8c6 PF: > { %s11_s6 = sadd.s32 1, %s1350_s6  }
 0x8c7   : > { %p8_p4 = scmp.ge.s32.totalorder %s11_s6, 4  }
 0x8c9   :  { %10 = sbr.rel (!%p8_p4) target bundleno = 1 (0x1), region = 54 }

// kernel: timesformer_forward.35
= control target key start
LH: loop header
LB: loop body
LE: loop exit
PB: predicated region body
PF: predicated region fallthrough
CT: control target
= control target key end

     0   :  { %v87_v3 = vlaneseq  ;;  %v1137_v10 = vmov 1983009808   ;;  %vm154_vm0 = vcmask 261120   ;;  %s1588_s0 = inlined_call_operand.vmem [shape: bf16[2,32], index: 0, kind: input, shape index: {}]   ;;  %s1589_s1 = inlined_call_operand.vmem [shape: bf16[1,32], index: 1, kind: input, shape index: {}]   ;;  %s1590_s2 = inlined_call_operand.vmem [shape: bf16[1,32], index: 2, kind: input, shape index: {}]   ;;  %s1591_s3 = inlined_call_operand.vmem [shape: bf16[32,128], index: 3, kind: input, shape index: {}]   ;;  %s1592_s4 = inlined_call_operand.vmem [shape: bf16[1,128], index: 4, kind: input, shape index: {}]   ;;  %s1593_s5 = inlined_call_operand.hbm [shape: bf16[2,128], index: 5, kind: output, shape index: {}]  }
   0x1   :  { %v1179_v0 = vld [vmem:[%s1588_s0] sm:$0x1]  ;;  %v1184_v1 = vld [vmem:[%s1588_s0 + $0x1] sm:$0x1]  ;;  %v1189_v2 = vld [vmem:[%s1588_s0 + $0x2] sm:$0x1]  ;;  %v85_v11 = vunpack.c.l.s4 %v1137_v10 }
   0x2   :  { %v1194_v4 = vld [vmem:[%s1588_s0 + $0x3] sm:$0x1]  ;;  %v50_v5 = vunpack.c.l.bf16 %v1179_v0  ;;  %v51_v6 = vunpack.c.l.bf16 %v1184_v1  ;;  %v52_v7 = vunpack.c.l.bf16 %v1189_v2  ;;  %v1202_v8 = vld [vmem:[%s1588_s0 + $0x8] sm:$0x1]  ;;  %v1205_v12 = vshrl.u32 %v87_v3, 7 }
   0x3   :  { %v53_v9 = vunpack.c.l.bf16 %v1194_v4  ;;  %v1210_v13 = vld [vmem:[%s1588_s0 + $0x9] sm:$0x1]  ;;  %v1215_v14 = vld [vmem:[%s1588_s0 + $0xa] sm:$0x1]  ;;  %v1224_v16 = vld [vmem:[%s1588_s0 + $0xb] sm:$0x1]  ;;  %v58_v17 = vunpack.c.l.bf16 %v1202_v8  ;;  %v86_v23 = vunpack.c.0.s8 %v85_v11 }
   0x4   :  { %v82_v15 = vcombine.low %v50_v5, %v51_v6  ;;  %v59_v18 = vunpack.c.l.bf16 %v1210_v13  ;;  %v60_v19 = vunpack.c.l.bf16 %v1215_v14  ;;  %v1232_v20 = vld [vmem:[%s1588_s0 + $0x4] sm:$0x1]  ;;  %v1237_v21 = vld [vmem:[%s1588_s0 + $0x5] sm:$0x1]  ;;  %v61_v24 = vunpack.c.l.bf16 %v1224_v16  ;;  %v1247_v25 = vld [vmem:[%s1588_s0 + $0x6] sm:$0x1] }
   0x5   :  { %v83_v22 = vcombine.low %v52_v7, %v53_v9  ;;  %v1252_v26 = vld [vmem:[%s1588_s0 + $0x7] sm:$0x1]  ;;  %v54_v27 = vunpack.c.l.bf16 %v1232_v20  ;;  %v1258_v28 = vld [vmem:[%s1588_s0 + $0xc] sm:$0x1]  ;;  %v55_v30 = vunpack.c.l.bf16 %v1237_v21  ;;  %v56_v31 = vunpack.c.l.bf16 %v1247_v25  ;;  %v1270_v33 = vld [vmem:[%s1588_s0 + $0xd] sm:$0x1] }
   0x6   :  { %v116_v29 = vcombine.low %v58_v17, %v59_v18  ;;  %v57_v32 = vunpack.c.l.bf16 %v1252_v26  ;;  %v1275_v34 = vld [vmem:[%s1588_s0 + $0xe] sm:$0x1]  ;;  %v1280_v35 = vld [vmem:[%s1588_s0 + $0xf] sm:$0x1]  ;;  %v1283_v36 = vsub.s32 %v86_v23, %v1205_v12  ;;  %v117_v37 = vcombine.low %v60_v19, %v61_v24 }
   0x7   :  { %v62_v38 = vunpack.c.l.bf16 %v1258_v28  ;;  %v63_v39 = vunpack.c.l.bf16 %v1270_v33 }
   0x8   :  { %10 = vsyncpa [#allocation5], 0  ;;  %v99_v40 = vcombine.low %v54_v27, %v55_v30  ;;  %v100_v41 = vcombine.low %v56_v31, %v57_v32  ;;  %v64_v42 = vunpack.c.l.bf16 %v1275_v34  ;;  %v65_v43 = vunpack.c.l.bf16 %v1280_v35 }
   0x9   :  { %v90_v44 = vrot.slane %v82_v15, %v1283_v36  ;;  %v97_v45 = vrot.slane %v83_v22, %v1283_v36  ;;  %v124_v46 = vrot.slane %v116_v29, %v1283_v36  ;;  %v131_v47 = vrot.slane %v117_v37, %v1283_v36 }
   0xa   :  { %v107_v48 = vrot.slane %v99_v40, %v1283_v36  ;;  %v114_v49 = vrot.slane %v100_v41, %v1283_v36  ;;  %v133_v50 = vcombine.low %v62_v38, %v63_v39  ;;  %v134_v51 = vcombine.low %v64_v42, %v65_v43 }
   0xb   :  { %v98_v52 = vcombine.low %v90_v44, %v97_v45  ;;  %v132_v53 = vcombine.low %v124_v46, %v131_v47  ;;  %v1138_v62 = vmov 269488144   ;;  %v1139_v3 = vmov 842150450  }
   0xc   :  { %v115_v54 = vcombine.low %v107_v48, %v114_v49  ;;  %v141_v55 = vrot.slane %v133_v50, %v1283_v36  ;;  %v148_v56 = vrot.slane %v134_v51, %v1283_v36  ;;  %v177_v63 = vunpack.c.l.s4 %v1138_v62 }
   0xd   :  { %v155_v57 = vsel %vm154_vm0, %v98_v52, 0.0  ;;  %v161_v58 = vsel %vm154_vm0, %v132_v53, 0.0  ;;  %v184_v10 = vunpack.c.l.s4 %v1139_v3  ;;  %v1140_v11 = vmov 1414812756  }
   0xe   :  { %156 = vadd.xlane.f32.xlu0 %v155_v57  ;;  %162 = vadd.xlane.f32.xlu1 %v161_v58  ;;  %v149_v59 = vcombine.low %v141_v55, %v148_v56  ;;  %v158_v60 = vsel %vm154_vm0, %v115_v54, 0.0  ;;  %v191_v15 = vunpack.c.l.s4 %v1140_v11  ;;  %v1141_v22 = vmov 1987475062  }
   0xf   :  { %v198_v23 = vunpack.c.l.s4 %v1141_v22  ;;  %v178_v29 = vunpack.c.0.s8 %v177_v63  ;;  %v185_v37 = vunpack.c.0.s8 %v184_v10  ;;  %vm788_vm1 = vcmask 257024  }
  0x10   :  { %v164_v61 = vsel %vm154_vm0, %v149_v59, 0.0  ;;  %v192_v40 = vunpack.c.0.s8 %v191_v15 }
  0x11   :  { %v199_v41 = vunpack.c.0.s8 %v198_v23  ;;  %v1322_v44 = vsub.s32 %v178_v29, %v1205_v12  ;;  %v1325_v45 = vsub.s32 %v185_v37, %v1205_v12 }
  0x12   :  { %159 = vadd.xlane.f32.xlu0 %v158_v60  ;;  %165 = vadd.xlane.f32.xlu1 %v164_v61  ;;  %v1328_v46 = vsub.s32 %v192_v40, %v1205_v12 }
  0x13   :  { %v1331_v47 = vsub.s32 %v199_v41, %v1205_v12 }
  0x97   :  { %v157_v48 = vpop.xlane.xlu0 %156  ;;  %v163_v49 = vpop.xlane.xlu1 %162 }
  0x98   :  { %v168_v50 = vmul.f32 0.03125, %v157_v48  ;;  %v170_v51 = vmul.f32 0.03125, %v163_v49 }
  0x9a   :  { %v182_v52 = vrot.slane %v168_v50, %v1322_v44  ;;  %v189_v53 = vrot.slane %v168_v50, %v1325_v45  ;;  %v196_v54 = vrot.slane %v168_v50, %v1328_v46  ;;  %v203_v55 = vrot.slane %v168_v50, %v1331_v47 }
  0x9b   :  { %v238_v56 = vrot.slane %v170_v51, %v1322_v44  ;;  %v245_v57 = vrot.slane %v170_v51, %v1325_v45  ;;  %v252_v58 = vrot.slane %v170_v51, %v1328_v46  ;;  %v259_v59 = vrot.slane %v170_v51, %v1331_v47  ;;  %v160_v60 = vpop.xlane.xlu0 %159  ;;  %v166_v61 = vpop.xlane.xlu1 %165 }
  0x9c   :  { %v169_v62 = vmul.f32 0.03125, %v160_v60  ;;  %v171_v63 = vmul.f32 0.03125, %v166_v61  ;;  %v1343_v3 = vsub.f32 %v50_v5, %v182_v52  ;;  %v1347_v10 = vsub.f32 %v51_v6, %v189_v53 }
  0x9d   :  { %v1351_v11 = vsub.f32 %v52_v7, %v196_v54  ;;  %v1355_v15 = vsub.f32 %v53_v9, %v203_v55  ;;  %v1359_v22 = vsub.f32 %v58_v17, %v238_v56  ;;  %v1363_v0 = vsub.f32 %v59_v18, %v245_v57 }
  0x9e   :  { %v210_v1 = vrot.slane %v169_v62, %v1322_v44  ;;  %v217_v5 = vrot.slane %v169_v62, %v1325_v45  ;;  %v224_v2 = vrot.slane %v169_v62, %v1328_v46  ;;  %v231_v6 = vrot.slane %v169_v62, %v1331_v47 }
  0x9f   :  { %v266_v4 = vrot.slane %v171_v63, %v1322_v44  ;;  %v273_v7 = vrot.slane %v171_v63, %v1325_v45  ;;  %v280_v8 = vrot.slane %v171_v63, %v1328_v46  ;;  %v287_v9 = vrot.slane %v171_v63, %v1331_v47 }
  0xa0   :  { %v320_v13 = vmul.f32 %v1343_v3, %v1343_v3  ;;  %v321_v17 = vmul.f32 %v1347_v10, %v1347_v10  ;;  %v322_v18 = vmul.f32 %v1351_v11, %v1351_v11  ;;  %v323_v23 = vmul.f32 %v1355_v15, %v1355_v15 }
  0xa1   :  { %v1383_v29 = vsub.f32 %v60_v19, %v252_v58  ;;  %v1387_v37 = vsub.f32 %v61_v24, %v259_v59  ;;  %v328_v40 = vmul.f32 %v1359_v22, %v1359_v22  ;;  %v329_v41 = vmul.f32 %v1363_v0, %v1363_v0 }
  0xa2   :  { %v352_v48 = vcombine.low %v320_v13, %v321_v17  ;;  %v353_v49 = vcombine.low %v322_v18, %v323_v23  ;;  %v1395_v50 = vsub.f32 %v54_v27, %v210_v1  ;;  %v1399_v14 = vsub.f32 %v55_v30, %v217_v5  ;;  %v596_v13 = vld [vmem:[%s1589_s1] sm:$0x1] }
  0xa3   :  { %v330_v16 = vmul.f32 %v1383_v29, %v1383_v29  ;;  %v331_v19 = vmul.f32 %v1387_v37, %v1387_v37  ;;  %v386_v24 = vcombine.low %v328_v40, %v329_v41  ;;  %v1407_v51 = vsub.f32 %v56_v31, %v224_v2 }
  0xa4   :  { %v360_v52 = vrot.slane %v352_v48, %v1283_v36  ;;  %v367_v20 = vrot.slane %v353_v49, %v1283_v36  ;;  %v1413_v21 = vsub.f32 %v57_v32, %v231_v6  ;;  %v324_v27 = vmul.f32 %v1395_v50, %v1395_v50  ;;  %v640_v48 = vld [vmem:[%s1590_s2] sm:$0x1] }
  0xa5   :  { %v387_v30 = vcombine.low %v330_v16, %v331_v19  ;;  %v394_v53 = vrot.slane %v386_v24, %v1283_v36  ;;  %v325_v54 = vmul.f32 %v1399_v14, %v1399_v14  ;;  %v326_v25 = vmul.f32 %v1407_v51, %v1407_v51 }
  0xa6   :  { %v368_v31 = vcombine.low %v360_v52, %v367_v20  ;;  %v327_v55 = vmul.f32 %v1413_v21, %v1413_v21  ;;  %v1426_v26 = vsub.f32 %v62_v38, %v266_v4  ;;  %v1430_v32 = vsub.f32 %v63_v39, %v273_v7 }
  0xa7   :  { %v401_v56 = vrot.slane %v387_v30, %v1283_v36  ;;  %v369_v57 = vcombine.low %v324_v27, %v325_v54  ;;  %v1435_v58 = vsub.f32 %v64_v42, %v280_v8  ;;  %v1439_v59 = vsub.f32 %v65_v43, %v287_v9  ;;  %v1103_v8 = vld [vmem:[%s1591_s3 + $0x8] sm:$0xff]   ;;  %v1104_v9 = vld [vmem:[%s1591_s3] sm:$0xff]  }
  0xa8   :  { %v424_v60 = vsel %vm154_vm0, %v368_v31, 0.0  ;;  %v370_v28 = vcombine.low %v326_v25, %v327_v55  ;;  %v332_v38 = vmul.f32 %v1426_v26, %v1426_v26  ;;  %v333_v33 = vmul.f32 %v1430_v32, %v1430_v32  ;;  %1086 = vmatprep.subr.bf16.mxu0 %v1103_v8 }
  0xa9   :  { %425 = vadd.xlane.f32.xlu0 %v424_v60  ;;  %v402_v39 = vcombine.low %v394_v53, %v401_v56  ;;  %v377_v61 = vrot.slane %v369_v57, %v1283_v36  ;;  %v334_v34 = vmul.f32 %v1435_v58, %v1435_v58  ;;  %v335_v35 = vmul.f32 %v1439_v59, %v1439_v59 }
  0xaa   :  { %v384_v42 = vrot.slane %v370_v28, %v1283_v36  ;;  %v403_v43 = vcombine.low %v332_v38, %v333_v33  ;;  %1087 = vmatpush3.bf16.msra.mxu0 %v1103_v8  ;;  %v597_v23 = vunpack.c.l.bf16 %v596_v13  ;;  %v1467_v40 = vsub.s32 0, %v1205_v12 }
  0xab   :  { %v430_v62 = vsel %vm154_vm0, %v402_v39, 0.0  ;;  %v404_v63 = vcombine.low %v334_v34, %v335_v35  ;;  %1088 = vmatprep.subr.bf16.mxu0 %v1104_v9  ;;  %v641_v52 = vunpack.c.l.bf16 %v640_v48 }
  0xac   :  { %v385_v1 = vcombine.low %v377_v61, %v384_v42  ;;  %v411_v5 = vrot.slane %v403_v43, %v1283_v36  ;;  %v601_v24 = vrot.slane %v597_v23, %v1467_v40 }
  0xad   :  { %431 = vadd.xlane.f32.xlu0 %v430_v62  ;;  %v418_v2 = vrot.slane %v404_v63, %v1283_v36  ;;  %v645_v25 = vrot.slane %v641_v52, %v1467_v40 }
  0xae   :  { %v427_v6 = vsel %vm154_vm0, %v385_v1, 0.0  ;;  %1089 = vmatpush3.bf16.msra.mxu0 %v1104_v9  ;;  %v603_v54 = vcombine.high %v601_v24, %v601_v24  ;;  %v1475_v56 = vrot.slane %v601_v24, %v1283_v36 }
  0xaf   :  { %428 = vadd.xlane.f32.xlu1 %v427_v6  ;;  %v419_v4 = vcombine.low %v411_v5, %v418_v2  ;;  %v647_v60 = vcombine.high %v645_v25, %v645_v25  ;;  %v1489_v39 = vrot.slane %v645_v25, %v1283_v36 }
  0xb0   :  { %v1478_v57 = vrot.slane %v603_v54, %v1283_v36  ;;  %v1482_v38 = vcombine.high %v1475_v56, %v1475_v56 }
  0xb1   :  { %v433_v7 = vsel %vm154_vm0, %v419_v4, 0.0  ;;  %v1492_v61 = vrot.slane %v647_v60, %v1283_v36  ;;  %v1504_v6 = vcombine.high %v1489_v39, %v1489_v39 }
  0xb2   :  { %v1486_v33 = vcombine.high %v1478_v57, %v1478_v57 }
  0xb3   :  { %434 = vadd.xlane.f32.xlu1 %v433_v7  ;;  %v1508_v4 = vcombine.high %v1492_v61, %v1492_v61 }
 0x132   :  { %v426_v17 = vpop.xlane.xlu0 %425 }
 0x133   :  { %v436_v18 = vmul.f32 0.03125, %v426_v17 }
 0x135   :  { %v440_v41 = vadd.f32 1e-05, %v436_v18 }
 0x136   :  { %v432_v49 = vpop.xlane.xlu0 %431 }
 0x137   :  { %1107 = vrsqrt.f32 %v440_v41  ;;  %v438_v16 = vmul.f32 0.03125, %v432_v49 }
 0x138   :  { %v429_v19 = vpop.xlane.xlu1 %428 }
 0x139   :  { %v437_v20 = vmul.f32 0.03125, %v429_v19  ;;  %v442_v27 = vadd.f32 1e-05, %v438_v16 }
 0x13b   :  { %v441_v30 = vadd.f32 1e-05, %v437_v20  ;;  %1109 = vrsqrt.f32 %v442_v27 }
 0x13c   :  { %v435_v53 = vpop.xlane.xlu1 %434 }
 0x13d   :  { %1111 = vrsqrt.f32 %v441_v30  ;;  %v439_v31 = vmul.f32 0.03125, %v435_v53 }
 0x13f   :  { %v443_v55 = vadd.f32 1e-05, %v439_v31 }
 0x141   :  { %1113 = vrsqrt.f32 %v443_v55 }
 0x144   :  { %v1108_v28 = vpop.eup %1107 }
 0x145   :  { %v458_v34 = vrot.slane %v1108_v28, %v1322_v44  ;;  %v465_v35 = vrot.slane %v1108_v28, %v1325_v45  ;;  %v472_v42 = vrot.slane %v1108_v28, %v1328_v46  ;;  %v479_v43 = vrot.slane %v1108_v28, %v1331_v47 }
 0x147   :  { %v580_v62 = vmul.f32 %v458_v34, %v1343_v3  ;;  %v581_v63 = vmul.f32 %v465_v35, %v1347_v10  ;;  %v582_v1 = vmul.f32 %v472_v42, %v1351_v11  ;;  %v583_v5 = vmul.f32 %v479_v43, %v1355_v15 }
 0x148   :  { %v1110_v2 = vpop.eup %1109 }
 0x149   :  { %v624_v7 = vmul.f32 %v1475_v56, %v580_v62  ;;  %v625_v8 = vmul.f32 %v1482_v38, %v581_v63  ;;  %v626_v3 = vmul.f32 %v1478_v57, %v582_v1  ;;  %v627_v10 = vmul.f32 %v1486_v33, %v583_v5 }
 0x14a   :  { %v1112_v11 = vpop.eup %1111  ;;  %v514_v15 = vrot.slane %v1110_v2, %v1322_v44  ;;  %v521_v9 = vrot.slane %v1110_v2, %v1325_v45  ;;  %v528_v13 = vrot.slane %v1110_v2, %v1328_v46  ;;  %v535_v17 = vrot.slane %v1110_v2, %v1331_v47 }
 0x14b   :  { %v486_v18 = vrot.slane %v1112_v11, %v1322_v44  ;;  %v493_v23 = vrot.slane %v1112_v11, %v1325_v45  ;;  %v500_v41 = vrot.slane %v1112_v11, %v1328_v46  ;;  %v507_v48 = vrot.slane %v1112_v11, %v1331_v47 }
 0x14c   :  { %v668_v49 = vadd.f32 %v1489_v39, %v624_v7  ;;  %v669_v16 = vadd.f32 %v1504_v6, %v625_v8  ;;  %v670_v19 = vadd.f32 %v1492_v61, %v626_v3  ;;  %v671_v24 = vadd.f32 %v1508_v4, %v627_v10 }
 0x14d   :  { %v584_v52 = vmul.f32 %v486_v18, %v1395_v50  ;;  %v585_v20 = vmul.f32 %v493_v23, %v1399_v14  ;;  %v586_v27 = vmul.f32 %v500_v41, %v1407_v51  ;;  %v587_v30 = vmul.f32 %v507_v48, %v1413_v21 }
 0x14e   :  { %v1114_v53 = vpop.eup %1113  ;;  %v700_v54 = vcombine.low %v668_v49, %v669_v16  ;;  %v701_v25 = vcombine.low %v670_v19, %v671_v24  ;;  %v588_v31 = vmul.f32 %v514_v15, %v1359_v22  ;;  %v589_v55 = vmul.f32 %v521_v9, %v1363_v0 }
 0x14f   :  { %v628_v60 = vmul.f32 %v1475_v56, %v584_v52  ;;  %v629_v28 = vmul.f32 %v1482_v38, %v585_v20  ;;  %v630_v34 = vmul.f32 %v1478_v57, %v586_v27  ;;  %v631_v50 = vmul.f32 %v1486_v33, %v587_v30 }
 0x150   :  { %v708_v14 = vrot.slane %v700_v54, %v1283_v36  ;;  %v715_v51 = vrot.slane %v701_v25, %v1283_v36  ;;  %v542_v21 = vrot.slane %v1114_v53, %v1322_v44  ;;  %v549_v35 = vrot.slane %v1114_v53, %v1325_v45  ;;  %v898_v25 = vld [vmem:[%s1592_s4] sm:$0x1] }
 0x151   :  { %v672_v22 = vadd.f32 %v1489_v39, %v628_v60  ;;  %v673_v0 = vadd.f32 %v1504_v6, %v629_v28  ;;  %v674_v42 = vadd.f32 %v1492_v61, %v630_v34  ;;  %v675_v43 = vadd.f32 %v1508_v4, %v631_v50 }
 0x152   :  { %v716_v62 = vcombine.low %v708_v14, %v715_v51  ;;  %v556_v63 = vrot.slane %v1114_v53, %v1328_v46  ;;  %v563_v1 = vrot.slane %v1114_v53, %v1331_v47  ;;  %v590_v5 = vmul.f32 %v528_v13, %v1383_v29 }
 0x153   :  { %v717_v2 = vcombine.low %v672_v22, %v673_v0  ;;  %v718_v7 = vcombine.low %v674_v42, %v675_v43  ;;  %v591_v44 = vmul.f32 %v535_v17, %v1387_v37  ;;  %v592_v45 = vmul.f32 %v542_v21, %v1426_v26 }
 0x154   :  { %v1078_v8 = vpack.c.bf16 %v716_v62, %v716_v62  ;;  %v593_v3 = vmul.f32 %v549_v35, %v1430_v32  ;;  %v594_v10 = vmul.f32 %v556_v63, %v1435_v58  ;;  %v595_v11 = vmul.f32 %v563_v1, %v1439_v59 }
 0x155   :  { %v725_v15 = vrot.slane %v717_v2, %v1283_v36  ;;  %v732_v46 = vrot.slane %v718_v7, %v1283_v36  ;;  %v632_v47 = vmul.f32 %v1475_v56, %v588_v31  ;;  %v633_v29 = vmul.f32 %v1482_v38, %v589_v55 }
 0x156   :  { %789 = vst.msk [vmem:[#allocation3] sm:$0xf] %vm788_vm1, %v1078_v8  ;;  %v634_v37 = vmul.f32 %v1478_v57, %v590_v5  ;;  %v635_v26 = vmul.f32 %v1486_v33, %v591_v44  ;;  %v636_v32 = vmul.f32 %v1475_v56, %v592_v45  ;;  %v637_v58 = vmul.f32 %v1482_v38, %v593_v3 }
 0x157   :  { %v733_v9 = vcombine.low %v725_v15, %v732_v46  ;;  %v638_v59 = vmul.f32 %v1478_v57, %v594_v10  ;;  %v639_v13 = vmul.f32 %v1486_v33, %v595_v11  ;;  %v676_v17 = vadd.f32 %v1489_v39, %v632_v47 }
 0x158   :  { %v677_v18 = vadd.f32 %v1504_v6, %v633_v29  ;;  %v678_v23 = vadd.f32 %v1492_v61, %v634_v37  ;;  %v679_v41 = vadd.f32 %v1508_v4, %v635_v26  ;;  %v680_v48 = vadd.f32 %v1489_v39, %v636_v32 }
 0x159   :  { %v1079_v49 = vpack.c.bf16 %v733_v9, %v733_v9  ;;  %v681_v56 = vadd.f32 %v1504_v6, %v637_v58  ;;  %v682_v38 = vadd.f32 %v1492_v61, %v638_v59  ;;  %v683_v16 = vadd.f32 %v1508_v4, %v639_v13 }
 0x15a   :  { %v734_v57 = vcombine.low %v676_v17, %v677_v18  ;;  %v735_v19 = vcombine.low %v678_v23, %v679_v41  ;;  %v899_v31 = vunpack.c.l.bf16 %v898_v25 }
 0x15b   :  { %790 = vst.msk [vmem:[#allocation3 + $0x4] sm:$0xf] %vm788_vm1, %v1079_v49  ;;  %v751_v33 = vcombine.low %v680_v48, %v681_v56  ;;  %v752_v24 = vcombine.low %v682_v38, %v683_v16 }
 0x15c   :  { %v742_v52 = vrot.slane %v734_v57, %v1283_v36  ;;  %v749_v20 = vrot.slane %v735_v19, %v1283_v36  ;;  %v903_v28 = vrot.slane %v899_v31, %v1467_v40 }
 0x15d   :  { %v759_v27 = vrot.slane %v751_v33, %v1283_v36  ;;  %v766_v39 = vrot.slane %v752_v24, %v1283_v36  ;;  %v1142_v36 = vmov 1966171168  }
 0x15e   :  { %v750_v30 = vcombine.low %v742_v52, %v749_v20  ;;  %v914_v55 = vunpack.c.l.s4 %v1142_v36 }
 0x15f   :  { %v767_v6 = vcombine.low %v759_v27, %v766_v39 }
 0x160   :  { %v1080_v53 = vpack.c.bf16 %v750_v30, %v750_v30  ;;  %v915_v34 = vunpack.c.0.s8 %v914_v55 }
 0x161   :  { %v1081_v61 = vpack.c.bf16 %v767_v6, %v767_v6 }
 0x162   :  { %v1105_v54 = vld [vmem:[#allocation3] sm:$0xff]   ;;  %791 = vst.msk [vmem:[#allocation3 + $0x8] sm:$0xf] %vm788_vm1, %v1080_v53  ;;  %v918_v35 = vsub.s32 %v915_v34, %v1205_v12 }
 0x163   :  { %792 = vst.msk [vmem:[#allocation3 + $0xc] sm:$0xf] %vm788_vm1, %v1081_v61  ;;  %1090 = vmatprep.mubr.msk.bf16.mxu0 %vm154_vm0, %v1105_v54 }
 0x16a   :  { %v1106_v4 = vld [vmem:[#allocation3 + $0x8] sm:$0xff]  }
 0x16b   :  { %1091 = vmatmul.mubr.msk.bf16.vlgmr.msra.gmra.mxu0 %vm154_vm0, %v1106_v4 }
 0x22b   :  { %v1092_v60 = vpop.f32.mrf.mxu0 }
 0x22c   :  { %v906_v51 = vadd.f32 %v1092_v60, %v903_v28 }
 0x22d   :  { %v868_v50 = vpop.f32.mrf.mxu0 }
 0x22e   :  { %v904_v0 = vadd.f32 %v903_v28, %v868_v50 }
 0x22f   :  { %v1093_v14 = vpop.f32.mrf.mxu0 }
 0x230   :  { %v907_v21 = vadd.f32 %v1093_v14, %v903_v28 }
 0x231   :  { %v871_v22 = vpop.f32.mrf.mxu0 }
 0x232   :  { %v909_v42 = vpack.c.bf16 %v907_v21, %v906_v51  ;;  %v1069_v43 = vpack.c.bf16 %v907_v21, %v907_v21  ;;  %v905_v62 = vadd.f32 %v903_v28, %v871_v22 }
 0x234   :  { %v968_v63 = vrot.slane %v909_v42, %v918_v35  ;;  %v975_v1 = vrot.slane %v1069_v43, %v918_v35  ;;  %v908_v5 = vpack.c.bf16 %v905_v62, %v904_v0  ;;  %v1068_v2 = vpack.c.bf16 %v905_v62, %v905_v62 }
 0x236   :  { %v976_v7 = vcombine.high %v968_v63, %v968_v63  ;;  %v977_v44 = vcombine.high %v975_v1, %v975_v1  ;;  %v984_v45 = vrot.slane %v968_v63, %v918_v35  ;;  %v991_v40 = vrot.slane %v975_v1, %v918_v35  ;;  %1074 = vst.sshfl [vmem:[#allocation4 + $0x8] sm:$0x1 pattern:$0x73625140] %v968_v63 }
 0x237   :  { %1076 = vst.sshfl [vmem:[#allocation4 + $0xc] sm:$0x1 pattern:$0x73625140] %v975_v1  ;;  %v919_v8 = vrot.slane %v908_v5, %v918_v35  ;;  %v926_v3 = vrot.slane %v1068_v2, %v918_v35 }
 0x238   :  { %v998_v10 = vrot.slane %v976_v7, %v918_v35  ;;  %v1005_v11 = vrot.slane %v977_v44, %v918_v35  ;;  %v1006_v12 = vcombine.high %v984_v45, %v984_v45  ;;  %v1007_v15 = vcombine.high %v991_v40, %v991_v40  ;;  %1075 = vst.sshfl [vmem:[#allocation4 + $0x9] sm:$0x1 pattern:$0x73625140] %v976_v7 }
 0x239   :  { %1077 = vst.sshfl [vmem:[#allocation4 + $0xd] sm:$0x1 pattern:$0x73625140] %v977_v44  ;;  %v927_v46 = vcombine.high %v919_v8, %v919_v8  ;;  %v928_v47 = vcombine.high %v926_v3, %v926_v3  ;;  %v935_v29 = vrot.slane %v919_v8, %v918_v35  ;;  %v942_v37 = vrot.slane %v926_v3, %v918_v35 }
 0x23a   :  { %1070 = vst.sshfl [vmem:[#allocation4] sm:$0x1 pattern:$0x73625140] %v919_v8  ;;  %v1008_v26 = vcombine.high %v998_v10, %v998_v10  ;;  %v1009_v32 = vcombine.high %v1005_v11, %v1005_v11  ;;  %1036 = vst [vmem:[#allocation4 + $0xa] sm:$0x1] %v1006_v12 }
 0x23b   :  { %1072 = vst.sshfl [vmem:[#allocation4 + $0x4] sm:$0x1 pattern:$0x73625140] %v926_v3  ;;  %1040 = vst [vmem:[#allocation4 + $0xe] sm:$0x1] %v1007_v15  ;;  %v949_v58 = vrot.slane %v927_v46, %v918_v35  ;;  %v956_v9 = vrot.slane %v928_v47, %v918_v35  ;;  %v957_v59 = vcombine.high %v935_v29, %v935_v29 }
 0x23c   :  { %v958_v13 = vcombine.high %v942_v37, %v942_v37  ;;  %1071 = vst.sshfl [vmem:[#allocation4 + $0x1] sm:$0x1 pattern:$0x73625140] %v927_v46  ;;  %1037 = vst [vmem:[#allocation4 + $0xb] sm:$0x1] %v1008_v26 }
 0x23d   :  { %1073 = vst.sshfl [vmem:[#allocation4 + $0x5] sm:$0x1 pattern:$0x73625140] %v928_v47  ;;  %1041 = vst [vmem:[#allocation4 + $0xf] sm:$0x1] %v1009_v32  ;;  %v959_v17 = vcombine.high %v949_v58, %v949_v58  ;;  %v960_v18 = vcombine.high %v956_v9, %v956_v9 }
 0x23e   :  { %1028 = vst [vmem:[#allocation4 + $0x2] sm:$0x1] %v957_v59  ;;  %1032 = vst [vmem:[#allocation4 + $0x6] sm:$0x1] %v958_v13 }
 0x23f   :  { %1029 = vst [vmem:[#allocation4 + $0x3] sm:$0x1] %v959_v17  ;;  %1033 = vst [vmem:[#allocation4 + $0x7] sm:$0x1] %v960_v18 }
 0x240   :  { %1046 = vsyncadd [#allocation5], 240  ;;  %s1143_s3 = smov [#allocation4]  }
 0x241   :  { %s1047_s4 = sshll.u32 %s1143_s3, 4  ;;  %s1048_s4 = int_to_ptr.vmem [resolvable:$true] %s1047_s4 }
 0x242   :  { %s1115_s7 = scalar_lea.vmem %s1048_s4, 16  ;;  %s1119_s8 = scalar_lea.vmem %s1048_s4, 256 }
 0x243   :  { %p1116_p0 = scmp.ne.s32.totalorder %s1048_s4, %s1115_s7  ;;  %p1120_p1 = scmp.lt.s32.totalorder %s1048_s4, %s1048_s4 }
 0x244   :  { %p1121_p2 = scmp.lt.s32.totalorder %s1119_s8, %s1115_s7 }
 0x246   :  { %p1122_p3 = por %p1121_p2, %p1120_p1 }
 0x248   :  { %p1123_p4 = pnand %p1122_p3, %p1116_p0 }
 0x24a   :  { %1126 = shalt.err (!%p1123_p4)
}
 0x24b   :  { %s1144_s9 = smov 16   ;;  %s1145_s10 = smov 1  }
 0x24c   :  { %1053 = dma.vmem_to_hbm [thread:$0]  %s1048_s4, 16, %s1593_s5, [#allocation5], %s1144_s9, %s1144_s9, %s1145_s10  }
 0x24d   :  { %1135 = dma.done.wait [#allocation5], 256  }
 0x24e   :  { %1136 = vsyncadd [#allocation5], 4294967040 }
 0x24f   :  { %1057 = vsyncpa [#allocation5], 1 }

</bundles_post_ra>
